<compile_context>
chip_gen: v7x
topology: tpu7x:2x2x1
jax: 0.10.0
libtpu: 0.0.40
codegen_flags: <defaults>
</compile_context>

<pallas_src>
import functools

import jax
import jax.numpy as jnp
from jax.experimental import pallas as pl
from jax.experimental.pallas import tpu as pltpu

NEG_SLOPE = 0.01  # torch.nn.LeakyReLU default


def _round_up(n: int, m: int) -> int:
    return ((n + m - 1) // m) * m


def _mlp_kernel(x_ref, *refs, n_sub: int):
    """Fused MLP. refs = (w0, b0, w1, b1, ..., wL, bL, o_ref).

    x_ref / w_i are bf16 (MXU operands), b_i are f32, accumulation in f32.
    The M tile is processed in `n_sub` independent static sub-tiles so the
    VPU epilogue of one sub-tile can co-issue with the next sub-tile's MXU
    pushes (only enabled for small hidden dims where matmuls are short).
    """
    o_ref = refs[-1]
    params = refs[:-1]
    n_layers = len(params) // 2
    bm = x_ref.shape[0]
    sub = bm // n_sub

    for s in range(n_sub):
        h = x_ref[s * sub:(s + 1) * sub, :]              # bf16 (sub, d0_pad)
        for i in range(n_layers):
            w = params[2 * i][...]                       # bf16 (din, dout)
            b = params[2 * i + 1][...]                   # f32  (1, dout)
            acc = jnp.dot(h, w, preferred_element_type=jnp.float32) + b
            if i < n_layers - 1:                         # LeakyReLU except last
                acc = jnp.maximum(acc, NEG_SLOPE * acc)  # f32 epilogue
                h = acc.astype(jnp.bfloat16)             # bf16 for next matmul
            else:
                h = acc
        o_ref[s * sub:(s + 1) * sub, :] = h.astype(o_ref.dtype)


def prepare_mlp_params(weights, biases):
    """Pad feature dims to 128-lane multiples and cast weights to bf16.

    Call ONCE at init (hoisted out of the hot path); pass the result to
    mlp_forward.  weights[i]: (in_i, out_i); biases[i]: (1, out_i) or (out_i,).
    """
    d_in = weights[0].shape[0]
    dims = [d_in] + [w.shape[1] for w in weights]
    dims_pad = [_round_up(d, 128) for d in dims]

    w_p, b_p = [], []
    for i, (w, b) in enumerate(zip(weights, biases)):
        wp = jnp.pad(w.astype(jnp.bfloat16),
                     ((0, dims_pad[i] - dims[i]),
                      (0, dims_pad[i + 1] - dims[i + 1])))
        bp = jnp.pad(jnp.reshape(b, (1, -1)).astype(jnp.float32),
                     ((0, 0), (0, dims_pad[i + 1] - dims[i + 1])))
        w_p.append(wp)
        b_p.append(bp)
    return {"w": w_p, "b": b_p, "dims": dims, "dims_pad": dims_pad}


def mlp_forward(x, params, *, block_m=None):
    """x: (B, input_dim).  params: output of prepare_mlp_params.

    Returns (B, output_dim) in x.dtype.
    """
    w_p, b_p = params["w"], params["b"]
    dims, dims_pad = params["dims"], params["dims_pad"]
    B, d_in = x.shape
    assert d_in == dims[0], "input dim mismatch"
    n_layers = len(w_p)
    out_dim_pad = dims_pad[-1]

    param_bytes = sum(int(a.size) * a.dtype.itemsize for a in w_p + b_p)
    try:
        phys_vmem = pltpu.get_tpu_info().vmem_capacity_bytes
    except Exception:
        phys_vmem = 64 << 20                 # v7x-conservative fallback
    headroom = 8 << 20

    def tiles_bytes(bm):
        x_tile = 2 * bm * dims_pad[0] * 2    # double-buffered bf16 input tile
        o_tile = 2 * bm * out_dim_pad * 2    # double-buffered bf16 output tile
        act_tmp = 4 * bm * max(dims_pad) * 4  # a few f32 activation temps
        return x_tile + o_tile + act_tmp

    # --- block_m selection: biggest MXU-friendly tile that fits VMEM, never
    # padding tiny batches up, and keeping >= 2 grid steps when B > 128 so the
    # two TensorCores on v7x both get work. ---
    if block_m is None:
        b_rounded = _round_up(B, 128)
        block_m = 128
        for bm in (512, 256):
            if bm > b_rounded:                       # would pad a small batch up
                continue
            if B > 128 and _round_up(B, bm) // bm < 2:  # keep >= 2 grid steps
                continue
            if param_bytes + tiles_bytes(bm) <= phys_vmem - headroom:
                block_m = bm
                break

    needed_single = param_bytes + tiles_bytes(block_m)
    if needed_single > phys_vmem - headroom:
        # TODO(synk): add a layer/dout-tiled fallback (extra grid axis or
        # pltpu.emit_pipeline over weight column blocks) for MLPs whose
        # weights exceed VMEM instead of failing.
        raise ValueError(
            f"MLP params ({param_bytes / 2**20:.1f} MiB) + tiles exceed VMEM "
            f"({phys_vmem / 2**20:.0f} MiB); needs a tiled variant.")

    B_pad = _round_up(B, block_m)
    grid_m = B_pad // block_m
    if grid_m > 1 and grid_m % 2 == 1:       # balance the two TCs on v7x
        grid_m += 1
        B_pad = grid_m * block_m

    # --- pad input (zero padding is exact for Linear + LeakyReLU) ---
    x_p = jnp.pad(x.astype(jnp.bfloat16),
                  ((0, B_pad - B), (0, dims_pad[0] - d_in)))

    args = [x_p]
    for wp, bp in zip(w_p, b_p):
        args.append(wp)
        args.append(bp)

    # Overlap VPU epilogue with MXU only when matmuls are short.
    n_sub = 2 if (max(dims_pad) <= 256 and block_m % 16 == 0) else 1

    flops = 2 * B_pad * sum(dims_pad[i] * dims_pad[i + 1]
                            for i in range(n_layers))
    bytes_accessed = (int(x_p.size) * 2 + param_bytes + B_pad * out_dim_pad * 2)

    out_spec = pl.BlockSpec((block_m, out_dim_pad), lambda i: (i, 0))

    def build_in_specs(buffer_params: bool):
        specs = [pl.BlockSpec((block_m, dims_pad[0]), lambda i: (i, 0))]
        for wp, bp in zip(w_p, b_p):
            if buffer_params:
                # Single-buffered resident weights: constant block index, so
                # one buffer suffices and halves their VMEM footprint.
                specs.append(pl.BlockSpec(wp.shape, lambda i: (0, 0),
                                          pipeline_mode=pl.Buffered(1)))
                specs.append(pl.BlockSpec(bp.shape, lambda i: (0, 0),
                                          pipeline_mode=pl.Buffered(1)))
            else:
                specs.append(pl.BlockSpec(wp.shape, lambda i: (0, 0)))
                specs.append(pl.BlockSpec(bp.shape, lambda i: (0, 0)))
        return specs

    def run(buffer_params: bool):
        pb = param_bytes if buffer_params else 2 * param_bytes
        need = pb + tiles_bytes(block_m)
        vmem_limit = int(min(max(int(1.5 * need), 32 << 20),
                             phys_vmem - (4 << 20)))
        return pl.pallas_call(
            functools.partial(_mlp_kernel, n_sub=n_sub),
            out_shape=jax.ShapeDtypeStruct((B_pad, out_dim_pad), jnp.bfloat16),
            grid_spec=pltpu.PrefetchScalarGridSpec(
                num_scalar_prefetch=0,
                grid=(grid_m,),
                in_specs=build_in_specs(buffer_params),
                out_specs=out_spec,
            ),
            compiler_params=pltpu.CompilerParams(
                dimension_semantics=("parallel",),
                vmem_limit_bytes=vmem_limit,
            ),
            cost_estimate=pl.CostEstimate(
                flops=flops, transcendentals=0,
                bytes_accessed=bytes_accessed),
        )(*args)

    try:
        out_pad = run(True)
    except Exception:
        # Fallback if this jax version rejects Buffered(1) on pallas_call.
        out_pad = run(False)

    return out_pad[:B, :dims[-1]].astype(x.dtype)


def init_mlp_params(key, input_dim, output_dim, hidden_dim, num_layers=5):
    """Deterministic synthetic params matching the torch module's shapes.

    Weights returned pre-transposed to (in, out); biases as (1, out).
    """
    dims = [input_dim] + [hidden_dim] * num_layers + [output_dim]
    weights, biases = [], []
    for i in range(len(dims) - 1):
        key, kw, kb = jax.random.split(key, 3)
        fan_in, fan_out = dims[i], dims[i + 1]
        bound = 1.0 / jnp.sqrt(fan_in)
        w = jax.random.uniform(kw, (fan_in, fan_out), jnp.float32,
                               minval=-bound, maxval=bound)
        b = jax.random.uniform(kb, (1, fan_out), jnp.float32,
                               minval=-bound, maxval=bound)
        weights.append(w)
        biases.append(b)
    return weights, biases


def mlp_reference(x, weights, biases):
    """Pure-JAX f32 reference for correctness checking."""
    h = x
    for i, (w, b) in enumerate(zip(weights, biases)):
        h = h @ w + b
        if i < len(weights) - 1:
            h = jnp.where(h > 0, h, NEG_SLOPE * h)
    return h


if __name__ == "__main__":
    input_dim, output_dim, hidden_dim, num_layers = 16, 8, 32, 5
    batch = 16

    key = jax.random.PRNGKey(0)
    key, kx = jax.random.split(key)
    x = jax.random.normal(kx, (batch, input_dim), jnp.float32)

    weights, biases = init_mlp_params(key, input_dim, output_dim,
                                      hidden_dim, num_layers)

    # Pad + cast params ONCE (hoisted out of the hot path).
    prepared = prepare_mlp_params(weights, biases)

    out = mlp_forward(x, prepared)
    out = jax.block_until_ready(out)

    ref = mlp_reference(x, weights, biases)
    assert out.shape == (batch, output_dim)
    # bf16 MXU operands + bf16 output -> loosen tolerance vs the f32 reference.
    assert jnp.allclose(out, ref, atol=5e-2, rtol=5e-2), "mismatch vs reference"

    print("KERNEL_OK")
</pallas_src>

<mosaic_0001>
module attributes {stable_mosaic.version = 11 : i64} {
  func.func @_mlp_kernel(%arg0: i32, %arg1: memref<128x128xbf16, #tpu.memory_space<vmem>>, %arg2: memref<128x128xbf16, #tpu.memory_space<vmem>>, %arg3: memref<1x128xf32, #tpu.memory_space<vmem>>, %arg4: memref<128x128xbf16, #tpu.memory_space<vmem>>, %arg5: memref<1x128xf32, #tpu.memory_space<vmem>>, %arg6: memref<128x128xbf16, #tpu.memory_space<vmem>>, %arg7: memref<1x128xf32, #tpu.memory_space<vmem>>, %arg8: memref<128x128xbf16, #tpu.memory_space<vmem>>, %arg9: memref<1x128xf32, #tpu.memory_space<vmem>>, %arg10: memref<128x128xbf16, #tpu.memory_space<vmem>>, %arg11: memref<1x128xf32, #tpu.memory_space<vmem>>, %arg12: memref<128x128xbf16, #tpu.memory_space<vmem>>, %arg13: memref<1x128xf32, #tpu.memory_space<vmem>>, %arg14: memref<128x128xbf16, #tpu.memory_space<vmem>>) attributes {dimension_semantics = [#tpu.dimension_semantics<parallel>], iteration_bounds = array<i64: 1>, scalar_prefetch = 0 : i64, scratch_operands = 0 : i64, tpu.core_type = #tpu.core_type<tc>, window_params = [{transform_indices = @transform_0, window_bounds = array<i64: 128, 128>}, {pipeline_mode = #tpu.pipeline_mode<synchronous>, transform_indices = @transform_1, window_bounds = array<i64: 128, 128>}, {pipeline_mode = #tpu.pipeline_mode<synchronous>, transform_indices = @transform_2, window_bounds = array<i64: 1, 128>}, {pipeline_mode = #tpu.pipeline_mode<synchronous>, transform_indices = @transform_3, window_bounds = array<i64: 128, 128>}, {pipeline_mode = #tpu.pipeline_mode<synchronous>, transform_indices = @transform_4, window_bounds = array<i64: 1, 128>}, {pipeline_mode = #tpu.pipeline_mode<synchronous>, transform_indices = @transform_5, window_bounds = array<i64: 128, 128>}, {pipeline_mode = #tpu.pipeline_mode<synchronous>, transform_indices = @transform_6, window_bounds = array<i64: 1, 128>}, {pipeline_mode = #tpu.pipeline_mode<synchronous>, transform_indices = @transform_7, window_bounds = array<i64: 128, 128>}, {pipeline_mode = #tpu.pipeline_mode<synchronous>, transform_indices = @transform_8, window_bounds = array<i64: 1, 128>}, {pipeline_mode = #tpu.pipeline_mode<synchronous>, transform_indices = @transform_9, window_bounds = array<i64: 128, 128>}, {pipeline_mode = #tpu.pipeline_mode<synchronous>, transform_indices = @transform_10, window_bounds = array<i64: 1, 128>}, {pipeline_mode = #tpu.pipeline_mode<synchronous>, transform_indices = @transform_11, window_bounds = array<i64: 128, 128>}, {pipeline_mode = #tpu.pipeline_mode<synchronous>, transform_indices = @transform_12, window_bounds = array<i64: 1, 128>}, {transform_indices = @transform_13, window_bounds = array<i64: 128, 128>}]} {
    %c0 = arith.constant 0 : index
    %c0_0 = arith.constant 0 : index
    %0 = vector.load %arg1[%c0, %c0_0] : memref<128x128xbf16, #tpu.memory_space<vmem>>, vector<64x128xbf16>
    %c0_1 = arith.constant 0 : index
    %c0_2 = arith.constant 0 : index
    %1 = vector.load %arg2[%c0_1, %c0_2] : memref<128x128xbf16, #tpu.memory_space<vmem>>, vector<128x128xbf16>
    %c0_3 = arith.constant 0 : index
    %c0_4 = arith.constant 0 : index
    %2 = vector.load %arg3[%c0_3, %c0_4] : memref<1x128xf32, #tpu.memory_space<vmem>>, vector<1x128xf32>
    %cst = arith.constant dense<0.000000e+00> : vector<64x128xf32>
    %3 = tpu.matmul %0, %1, %cst {dimension_numbers = #tpu.dot_dimension_numbers<[1], [0], [0], [1], [0, 0, 1, 1], [], []>} : vector<64x128xbf16>, vector<128x128xbf16>, vector<64x128xf32> -> vector<64x128xf32>
    %4 = vector.broadcast %2 : vector<1x128xf32> to vector<64x128xf32>
    %5 = arith.addf %3, %4 : vector<64x128xf32>
    %cst_5 = arith.constant 0.00999999977 : f32
    %6 = vector.broadcast %cst_5 : f32 to vector<64x128xf32>
    %7 = arith.mulf %6, %5 : vector<64x128xf32>
    %8 = arith.maximumf %5, %7 : vector<64x128xf32>
    %9 = arith.truncf %8 : vector<64x128xf32> to vector<64x128xbf16>
    %c0_6 = arith.constant 0 : index
    %c0_7 = arith.constant 0 : index
    %10 = vector.load %arg4[%c0_6, %c0_7] : memref<128x128xbf16, #tpu.memory_space<vmem>>, vector<128x128xbf16>
    %c0_8 = arith.constant 0 : index
    %c0_9 = arith.constant 0 : index
    %11 = vector.load %arg5[%c0_8, %c0_9] : memref<1x128xf32, #tpu.memory_space<vmem>>, vector<1x128xf32>
    %cst_10 = arith.constant dense<0.000000e+00> : vector<64x128xf32>
    %12 = tpu.matmul %9, %10, %cst_10 {dimension_numbers = #tpu.dot_dimension_numbers<[1], [0], [0], [1], [0, 0, 1, 1], [], []>} : vector<64x128xbf16>, vector<128x128xbf16>, vector<64x128xf32> -> vector<64x128xf32>
    %13 = vector.broadcast %11 : vector<1x128xf32> to vector<64x128xf32>
    %14 = arith.addf %12, %13 : vector<64x128xf32>
    %cst_11 = arith.constant 0.00999999977 : f32
    %15 = vector.broadcast %cst_11 : f32 to vector<64x128xf32>
    %16 = arith.mulf %15, %14 : vector<64x128xf32>
    %17 = arith.maximumf %14, %16 : vector<64x128xf32>
    %18 = arith.truncf %17 : vector<64x128xf32> to vector<64x128xbf16>
    %c0_12 = arith.constant 0 : index
    %c0_13 = arith.constant 0 : index
    %19 = vector.load %arg6[%c0_12, %c0_13] : memref<128x128xbf16, #tpu.memory_space<vmem>>, vector<128x128xbf16>
    %c0_14 = arith.constant 0 : index
    %c0_15 = arith.constant 0 : index
    %20 = vector.load %arg7[%c0_14, %c0_15] : memref<1x128xf32, #tpu.memory_space<vmem>>, vector<1x128xf32>
    %cst_16 = arith.constant dense<0.000000e+00> : vector<64x128xf32>
    %21 = tpu.matmul %18, %19, %cst_16 {dimension_numbers = #tpu.dot_dimension_numbers<[1], [0], [0], [1], [0, 0, 1, 1], [], []>} : vector<64x128xbf16>, vector<128x128xbf16>, vector<64x128xf32> -> vector<64x128xf32>
    %22 = vector.broadcast %20 : vector<1x128xf32> to vector<64x128xf32>
    %23 = arith.addf %21, %22 : vector<64x128xf32>
    %cst_17 = arith.constant 0.00999999977 : f32
    %24 = vector.broadcast %cst_17 : f32 to vector<64x128xf32>
    %25 = arith.mulf %24, %23 : vector<64x128xf32>
    %26 = arith.maximumf %23, %25 : vector<64x128xf32>
    %27 = arith.truncf %26 : vector<64x128xf32> to vector<64x128xbf16>
    %c0_18 = arith.constant 0 : index
    %c0_19 = arith.constant 0 : index
    %28 = vector.load %arg8[%c0_18, %c0_19] : memref<128x128xbf16, #tpu.memory_space<vmem>>, vector<128x128xbf16>
    %c0_20 = arith.constant 0 : index
    %c0_21 = arith.constant 0 : index
    %29 = vector.load %arg9[%c0_20, %c0_21] : memref<1x128xf32, #tpu.memory_space<vmem>>, vector<1x128xf32>
    %cst_22 = arith.constant dense<0.000000e+00> : vector<64x128xf32>
    %30 = tpu.matmul %27, %28, %cst_22 {dimension_numbers = #tpu.dot_dimension_numbers<[1], [0], [0], [1], [0, 0, 1, 1], [], []>} : vector<64x128xbf16>, vector<128x128xbf16>, vector<64x128xf32> -> vector<64x128xf32>
    %31 = vector.broadcast %29 : vector<1x128xf32> to vector<64x128xf32>
    %32 = arith.addf %30, %31 : vector<64x128xf32>
    %cst_23 = arith.constant 0.00999999977 : f32
    %33 = vector.broadcast %cst_23 : f32 to vector<64x128xf32>
    %34 = arith.mulf %33, %32 : vector<64x128xf32>
    %35 = arith.maximumf %32, %34 : vector<64x128xf32>
    %36 = arith.truncf %35 : vector<64x128xf32> to vector<64x128xbf16>
    %c0_24 = arith.constant 0 : index
    %c0_25 = arith.constant 0 : index
    %37 = vector.load %arg10[%c0_24, %c0_25] : memref<128x128xbf16, #tpu.memory_space<vmem>>, vector<128x128xbf16>
    %c0_26 = arith.constant 0 : index
    %c0_27 = arith.constant 0 : index
    %38 = vector.load %arg11[%c0_26, %c0_27] : memref<1x128xf32, #tpu.memory_space<vmem>>, vector<1x128xf32>
    %cst_28 = arith.constant dense<0.000000e+00> : vector<64x128xf32>
    %39 = tpu.matmul %36, %37, %cst_28 {dimension_numbers = #tpu.dot_dimension_numbers<[1], [0], [0], [1], [0, 0, 1, 1], [], []>} : vector<64x128xbf16>, vector<128x128xbf16>, vector<64x128xf32> -> vector<64x128xf32>
    %40 = vector.broadcast %38 : vector<1x128xf32> to vector<64x128xf32>
    %41 = arith.addf %39, %40 : vector<64x128xf32>
    %cst_29 = arith.constant 0.00999999977 : f32
    %42 = vector.broadcast %cst_29 : f32 to vector<64x128xf32>
    %43 = arith.mulf %42, %41 : vector<64x128xf32>
    %44 = arith.maximumf %41, %43 : vector<64x128xf32>
    %45 = arith.truncf %44 : vector<64x128xf32> to vector<64x128xbf16>
    %c0_30 = arith.constant 0 : index
    %c0_31 = arith.constant 0 : index
    %46 = vector.load %arg12[%c0_30, %c0_31] : memref<128x128xbf16, #tpu.memory_space<vmem>>, vector<128x128xbf16>
    %c0_32 = arith.constant 0 : index
    %c0_33 = arith.constant 0 : index
    %47 = vector.load %arg13[%c0_32, %c0_33] : memref<1x128xf32, #tpu.memory_space<vmem>>, vector<1x128xf32>
    %cst_34 = arith.constant dense<0.000000e+00> : vector<64x128xf32>
    %48 = tpu.matmul %45, %46, %cst_34 {dimension_numbers = #tpu.dot_dimension_numbers<[1], [0], [0], [1], [0, 0, 1, 1], [], []>} : vector<64x128xbf16>, vector<128x128xbf16>, vector<64x128xf32> -> vector<64x128xf32>
    %49 = vector.broadcast %47 : vector<1x128xf32> to vector<64x128xf32>
    %50 = arith.addf %48, %49 : vector<64x128xf32>
    %51 = arith.truncf %50 : vector<64x128xf32> to vector<64x128xbf16>
    %c0_35 = arith.constant 0 : index
    %c0_36 = arith.constant 0 : index
    %52 = vector.load %arg14[%c0_35, %c0_36] : memref<128x128xbf16, #tpu.memory_space<vmem>>, vector<64x128xbf16>
    tpu.vector_store %arg14[%c0_35, %c0_36], %51 {strides = array<i32>} : memref<128x128xbf16, #tpu.memory_space<vmem>>, vector<64x128xbf16>,
    %c64 = arith.constant 64 : index
    %c0_37 = arith.constant 0 : index
    %53 = vector.load %arg1[%c64, %c0_37] : memref<128x128xbf16, #tpu.memory_space<vmem>>, vector<64x128xbf16>
    %c0_38 = arith.constant 0 : index
    %c0_39 = arith.constant 0 : index
    %54 = vector.load %arg2[%c0_38, %c0_39] : memref<128x128xbf16, #tpu.memory_space<vmem>>, vector<128x128xbf16>
    %c0_40 = arith.constant 0 : index
    %c0_41 = arith.constant 0 : index
    %55 = vector.load %arg3[%c0_40, %c0_41] : memref<1x128xf32, #tpu.memory_space<vmem>>, vector<1x128xf32>
    %cst_42 = arith.constant dense<0.000000e+00> : vector<64x128xf32>
    %56 = tpu.matmul %53, %54, %cst_42 {dimension_numbers = #tpu.dot_dimension_numbers<[1], [0], [0], [1], [0, 0, 1, 1], [], []>} : vector<64x128xbf16>, vector<128x128xbf16>, vector<64x128xf32> -> vector<64x128xf32>
    %57 = vector.broadcast %55 : vector<1x128xf32> to vector<64x128xf32>
    %58 = arith.addf %56, %57 : vector<64x128xf32>
    %cst_43 = arith.constant 0.00999999977 : f32
    %59 = vector.broadcast %cst_43 : f32 to vector<64x128xf32>
    %60 = arith.mulf %59, %58 : vector<64x128xf32>
    %61 = arith.maximumf %58, %60 : vector<64x128xf32>
    %62 = arith.truncf %61 : vector<64x128xf32> to vector<64x128xbf16>
    %c0_44 = arith.constant 0 : index
    %c0_45 = arith.constant 0 : index
    %63 = vector.load %arg4[%c0_44, %c0_45] : memref<128x128xbf16, #tpu.memory_space<vmem>>, vector<128x128xbf16>
    %c0_46 = arith.constant 0 : index
    %c0_47 = arith.constant 0 : index
    %64 = vector.load %arg5[%c0_46, %c0_47] : memref<1x128xf32, #tpu.memory_space<vmem>>, vector<1x128xf32>
    %cst_48 = arith.constant dense<0.000000e+00> : vector<64x128xf32>
    %65 = tpu.matmul %62, %63, %cst_48 {dimension_numbers = #tpu.dot_dimension_numbers<[1], [0], [0], [1], [0, 0, 1, 1], [], []>} : vector<64x128xbf16>, vector<128x128xbf16>, vector<64x128xf32> -> vector<64x128xf32>
    %66 = vector.broadcast %64 : vector<1x128xf32> to vector<64x128xf32>
    %67 = arith.addf %65, %66 : vector<64x128xf32>
    %cst_49 = arith.constant 0.00999999977 : f32
    %68 = vector.broadcast %cst_49 : f32 to vector<64x128xf32>
    %69 = arith.mulf %68, %67 : vector<64x128xf32>
    %70 = arith.maximumf %67, %69 : vector<64x128xf32>
    %71 = arith.truncf %70 : vector<64x128xf32> to vector<64x128xbf16>
    %c0_50 = arith.constant 0 : index
    %c0_51 = arith.constant 0 : index
    %72 = vector.load %arg6[%c0_50, %c0_51] : memref<128x128xbf16, #tpu.memory_space<vmem>>, vector<128x128xbf16>
    %c0_52 = arith.constant 0 : index
    %c0_53 = arith.constant 0 : index
    %73 = vector.load %arg7[%c0_52, %c0_53] : memref<1x128xf32, #tpu.memory_space<vmem>>, vector<1x128xf32>
    %cst_54 = arith.constant dense<0.000000e+00> : vector<64x128xf32>
    %74 = tpu.matmul %71, %72, %cst_54 {dimension_numbers = #tpu.dot_dimension_numbers<[1], [0], [0], [1], [0, 0, 1, 1], [], []>} : vector<64x128xbf16>, vector<128x128xbf16>, vector<64x128xf32> -> vector<64x128xf32>
    %75 = vector.broadcast %73 : vector<1x128xf32> to vector<64x128xf32>
    %76 = arith.addf %74, %75 : vector<64x128xf32>
    %cst_55 = arith.constant 0.00999999977 : f32
    %77 = vector.broadcast %cst_55 : f32 to vector<64x128xf32>
    %78 = arith.mulf %77, %76 : vector<64x128xf32>
    %79 = arith.maximumf %76, %78 : vector<64x128xf32>
    %80 = arith.truncf %79 : vector<64x128xf32> to vector<64x128xbf16>
    %c0_56 = arith.constant 0 : index
    %c0_57 = arith.constant 0 : index
    %81 = vector.load %arg8[%c0_56, %c0_57] : memref<128x128xbf16, #tpu.memory_space<vmem>>, vector<128x128xbf16>
    %c0_58 = arith.constant 0 : index
    %c0_59 = arith.constant 0 : index
    %82 = vector.load %arg9[%c0_58, %c0_59] : memref<1x128xf32, #tpu.memory_space<vmem>>, vector<1x128xf32>
    %cst_60 = arith.constant dense<0.000000e+00> : vector<64x128xf32>
    %83 = tpu.matmul %80, %81, %cst_60 {dimension_numbers = #tpu.dot_dimension_numbers<[1], [0], [0], [1], [0, 0, 1, 1], [], []>} : vector<64x128xbf16>, vector<128x128xbf16>, vector<64x128xf32> -> vector<64x128xf32>
    %84 = vector.broadcast %82 : vector<1x128xf32> to vector<64x128xf32>
    %85 = arith.addf %83, %84 : vector<64x128xf32>
    %cst_61 = arith.constant 0.00999999977 : f32
    %86 = vector.broadcast %cst_61 : f32 to vector<64x128xf32>
    %87 = arith.mulf %86, %85 : vector<64x128xf32>
    %88 = arith.maximumf %85, %87 : vector<64x128xf32>
    %89 = arith.truncf %88 : vector<64x128xf32> to vector<64x128xbf16>
    %c0_62 = arith.constant 0 : index
    %c0_63 = arith.constant 0 : index
    %90 = vector.load %arg10[%c0_62, %c0_63] : memref<128x128xbf16, #tpu.memory_space<vmem>>, vector<128x128xbf16>
    %c0_64 = arith.constant 0 : index
    %c0_65 = arith.constant 0 : index
    %91 = vector.load %arg11[%c0_64, %c0_65] : memref<1x128xf32, #tpu.memory_space<vmem>>, vector<1x128xf32>
    %cst_66 = arith.constant dense<0.000000e+00> : vector<64x128xf32>
    %92 = tpu.matmul %89, %90, %cst_66 {dimension_numbers = #tpu.dot_dimension_numbers<[1], [0], [0], [1], [0, 0, 1, 1], [], []>} : vector<64x128xbf16>, vector<128x128xbf16>, vector<64x128xf32> -> vector<64x128xf32>
    %93 = vector.broadcast %91 : vector<1x128xf32> to vector<64x128xf32>
    %94 = arith.addf %92, %93 : vector<64x128xf32>
    %cst_67 = arith.constant 0.00999999977 : f32
    %95 = vector.broadcast %cst_67 : f32 to vector<64x128xf32>
    %96 = arith.mulf %95, %94 : vector<64x128xf32>
    %97 = arith.maximumf %94, %96 : vector<64x128xf32>
    %98 = arith.truncf %97 : vector<64x128xf32> to vector<64x128xbf16>
    %c0_68 = arith.constant 0 : index
    %c0_69 = arith.constant 0 : index
    %99 = vector.load %arg12[%c0_68, %c0_69] : memref<128x128xbf16, #tpu.memory_space<vmem>>, vector<128x128xbf16>
    %c0_70 = arith.constant 0 : index
    %c0_71 = arith.constant 0 : index
    %100 = vector.load %arg13[%c0_70, %c0_71] : memref<1x128xf32, #tpu.memory_space<vmem>>, vector<1x128xf32>
    %cst_72 = arith.constant dense<0.000000e+00> : vector<64x128xf32>
    %101 = tpu.matmul %98, %99, %cst_72 {dimension_numbers = #tpu.dot_dimension_numbers<[1], [0], [0], [1], [0, 0, 1, 1], [], []>} : vector<64x128xbf16>, vector<128x128xbf16>, vector<64x128xf32> -> vector<64x128xf32>
    %102 = vector.broadcast %100 : vector<1x128xf32> to vector<64x128xf32>
    %103 = arith.addf %101, %102 : vector<64x128xf32>
    %104 = arith.truncf %103 : vector<64x128xf32> to vector<64x128xbf16>
    %c64_73 = arith.constant 64 : index
    %c0_74 = arith.constant 0 : index
    %105 = vector.load %arg14[%c64_73, %c0_74] : memref<128x128xbf16, #tpu.memory_space<vmem>>, vector<64x128xbf16>
    tpu.vector_store %arg14[%c64_73, %c0_74], %104 {strides = array<i32>} : memref<128x128xbf16, #tpu.memory_space<vmem>>, vector<64x128xbf16>,
    return
  }
  func.func @transform_0(%arg0: i32) -> (i32, i32) {
    %c0_i32 = arith.constant 0 : i32
    %c0_i32_0 = arith.constant 0 : i32
    return %arg0, %c0_i32 : i32, i32
  }
  func.func @transform_1(%arg0: i32) -> (i32, i32) {
    %c0_i32 = arith.constant 0 : i32
    %c0_i32_0 = arith.constant 0 : i32
    %c0_i32_1 = arith.constant 0 : i32
    return %c0_i32, %c0_i32_0 : i32, i32
  }
  func.func @transform_2(%arg0: i32) -> (i32, i32) {
    %c0_i32 = arith.constant 0 : i32
    %c0_i32_0 = arith.constant 0 : i32
    %c0_i32_1 = arith.constant 0 : i32
    return %c0_i32, %c0_i32_0 : i32, i32
  }
  func.func @transform_3(%arg0: i32) -> (i32, i32) {
    %c0_i32 = arith.constant 0 : i32
    %c0_i32_0 = arith.constant 0 : i32
    %c0_i32_1 = arith.constant 0 : i32
    return %c0_i32, %c0_i32_0 : i32, i32
  }
  func.func @transform_4(%arg0: i32) -> (i32, i32) {
    %c0_i32 = arith.constant 0 : i32
    %c0_i32_0 = arith.constant 0 : i32
    %c0_i32_1 = arith.constant 0 : i32
    return %c0_i32, %c0_i32_0 : i32, i32
  }
  func.func @transform_5(%arg0: i32) -> (i32, i32) {
    %c0_i32 = arith.constant 0 : i32
    %c0_i32_0 = arith.constant 0 : i32
    %c0_i32_1 = arith.constant 0 : i32
    return %c0_i32, %c0_i32_0 : i32, i32
  }
  func.func @transform_6(%arg0: i32) -> (i32, i32) {
    %c0_i32 = arith.constant 0 : i32
    %c0_i32_0 = arith.constant 0 : i32
    %c0_i32_1 = arith.constant 0 : i32
    return %c0_i32, %c0_i32_0 : i32, i32
  }
  func.func @transform_7(%arg0: i32) -> (i32, i32) {
    %c0_i32 = arith.constant 0 : i32
    %c0_i32_0 = arith.constant 0 : i32
    %c0_i32_1 = arith.constant 0 : i32
    return %c0_i32, %c0_i32_0 : i32, i32
  }
  func.func @transform_8(%arg0: i32) -> (i32, i32) {
    %c0_i32 = arith.constant 0 : i32
    %c0_i32_0 = arith.constant 0 : i32
    %c0_i32_1 = arith.constant 0 : i32
    return %c0_i32, %c0_i32_0 : i32, i32
  }
  func.func @transform_9(%arg0: i32) -> (i32, i32) {
    %c0_i32 = arith.constant 0 : i32
    %c0_i32_0 = arith.constant 0 : i32
    %c0_i32_1 = arith.constant 0 : i32
    return %c0_i32, %c0_i32_0 : i32, i32
  }
  func.func @transform_10(%arg0: i32) -> (i32, i32) {
    %c0_i32 = arith.constant 0 : i32
    %c0_i32_0 = arith.constant 0 : i32
    %c0_i32_1 = arith.constant 0 : i32
    return %c0_i32, %c0_i32_0 : i32, i32
  }
  func.func @transform_11(%arg0: i32) -> (i32, i32) {
    %c0_i32 = arith.constant 0 : i32
    %c0_i32_0 = arith.constant 0 : i32
    %c0_i32_1 = arith.constant 0 : i32
    return %c0_i32, %c0_i32_0 : i32, i32
  }
  func.func @transform_12(%arg0: i32) -> (i32, i32) {
    %c0_i32 = arith.constant 0 : i32
    %c0_i32_0 = arith.constant 0 : i32
    %c0_i32_1 = arith.constant 0 : i32
    return %c0_i32, %c0_i32_0 : i32, i32
  }
  func.func @transform_13(%arg0: i32) -> (i32, i32) {
    %c0_i32 = arith.constant 0 : i32
    %c0_i32_0 = arith.constant 0 : i32
    return %arg0, %c0_i32 : i32, i32
  }
}

module attributes {stable_mosaic.version = 11 : i64} {
  func.func @_mlp_kernel(%arg0: i32, %arg1: memref<128x128xbf16, #tpu.memory_space<vmem>>, %arg2: memref<128x128xbf16, #tpu.memory_space<vmem>>, %arg3: memref<1x128xf32, #tpu.memory_space<vmem>>, %arg4: memref<128x128xbf16, #tpu.memory_space<vmem>>, %arg5: memref<1x128xf32, #tpu.memory_space<vmem>>, %arg6: memref<128x128xbf16, #tpu.memory_space<vmem>>, %arg7: memref<1x128xf32, #tpu.memory_space<vmem>>, %arg8: memref<128x128xbf16, #tpu.memory_space<vmem>>, %arg9: memref<1x128xf32, #tpu.memory_space<vmem>>, %arg10: memref<128x128xbf16, #tpu.memory_space<vmem>>, %arg11: memref<1x128xf32, #tpu.memory_space<vmem>>, %arg12: memref<128x128xbf16, #tpu.memory_space<vmem>>, %arg13: memref<1x128xf32, #tpu.memory_space<vmem>>, %arg14: memref<128x128xbf16, #tpu.memory_space<vmem>>) attributes {dimension_semantics = [#tpu.dimension_semantics<parallel>], iteration_bounds = array<i64: 1>, scalar_prefetch = 0 : i64, scratch_operands = 0 : i64, tpu.core_type = #tpu.core_type<tc>, window_params = [{transform_indices = @transform_0, window_bounds = array<i64: 128, 128>}, {pipeline_mode = #tpu.pipeline_mode<synchronous>, transform_indices = @transform_1, window_bounds = array<i64: 128, 128>}, {pipeline_mode = #tpu.pipeline_mode<synchronous>, transform_indices = @transform_2, window_bounds = array<i64: 1, 128>}, {pipeline_mode = #tpu.pipeline_mode<synchronous>, transform_indices = @transform_3, window_bounds = array<i64: 128, 128>}, {pipeline_mode = #tpu.pipeline_mode<synchronous>, transform_indices = @transform_4, window_bounds = array<i64: 1, 128>}, {pipeline_mode = #tpu.pipeline_mode<synchronous>, transform_indices = @transform_5, window_bounds = array<i64: 128, 128>}, {pipeline_mode = #tpu.pipeline_mode<synchronous>, transform_indices = @transform_6, window_bounds = array<i64: 1, 128>}, {pipeline_mode = #tpu.pipeline_mode<synchronous>, transform_indices = @transform_7, window_bounds = array<i64: 128, 128>}, {pipeline_mode = #tpu.pipeline_mode<synchronous>, transform_indices = @transform_8, window_bounds = array<i64: 1, 128>}, {pipeline_mode = #tpu.pipeline_mode<synchronous>, transform_indices = @transform_9, window_bounds = array<i64: 128, 128>}, {pipeline_mode = #tpu.pipeline_mode<synchronous>, transform_indices = @transform_10, window_bounds = array<i64: 1, 128>}, {pipeline_mode = #tpu.pipeline_mode<synchronous>, transform_indices = @transform_11, window_bounds = array<i64: 128, 128>}, {pipeline_mode = #tpu.pipeline_mode<synchronous>, transform_indices = @transform_12, window_bounds = array<i64: 1, 128>}, {transform_indices = @transform_13, window_bounds = array<i64: 128, 128>}]} {
    %c0 = arith.constant 0 : index
    %c0_0 = arith.constant 0 : index
    %0 = vector.load %arg1[%c0, %c0_0] : memref<128x128xbf16, #tpu.memory_space<vmem>>, vector<64x128xbf16>
    %c0_1 = arith.constant 0 : index
    %c0_2 = arith.constant 0 : index
    %1 = vector.load %arg2[%c0_1, %c0_2] : memref<128x128xbf16, #tpu.memory_space<vmem>>, vector<128x128xbf16>
    %c0_3 = arith.constant 0 : index
    %c0_4 = arith.constant 0 : index
    %2 = vector.load %arg3[%c0_3, %c0_4] : memref<1x128xf32, #tpu.memory_space<vmem>>, vector<1x128xf32>
    %cst = arith.constant dense<0.000000e+00> : vector<64x128xf32>
    %3 = tpu.matmul %0, %1, %cst {dimension_numbers = #tpu.dot_dimension_numbers<[1], [0], [0], [1], [0, 0, 1, 1], [], []>} : vector<64x128xbf16>, vector<128x128xbf16>, vector<64x128xf32> -> vector<64x128xf32>
    %4 = vector.broadcast %2 : vector<1x128xf32> to vector<64x128xf32>
    %5 = arith.addf %3, %4 : vector<64x128xf32>
    %cst_5 = arith.constant 0.00999999977 : f32
    %6 = vector.broadcast %cst_5 : f32 to vector<64x128xf32>
    %7 = arith.mulf %6, %5 : vector<64x128xf32>
    %8 = arith.maximumf %5, %7 : vector<64x128xf32>
    %9 = arith.truncf %8 : vector<64x128xf32> to vector<64x128xbf16>
    %c0_6 = arith.constant 0 : index
    %c0_7 = arith.constant 0 : index
    %10 = vector.load %arg4[%c0_6, %c0_7] : memref<128x128xbf16, #tpu.memory_space<vmem>>, vector<128x128xbf16>
    %c0_8 = arith.constant 0 : index
    %c0_9 = arith.constant 0 : index
    %11 = vector.load %arg5[%c0_8, %c0_9] : memref<1x128xf32, #tpu.memory_space<vmem>>, vector<1x128xf32>
    %cst_10 = arith.constant dense<0.000000e+00> : vector<64x128xf32>
    %12 = tpu.matmul %9, %10, %cst_10 {dimension_numbers = #tpu.dot_dimension_numbers<[1], [0], [0], [1], [0, 0, 1, 1], [], []>} : vector<64x128xbf16>, vector<128x128xbf16>, vector<64x128xf32> -> vector<64x128xf32>
    %13 = vector.broadcast %11 : vector<1x128xf32> to vector<64x128xf32>
    %14 = arith.addf %12, %13 : vector<64x128xf32>
    %cst_11 = arith.constant 0.00999999977 : f32
    %15 = vector.broadcast %cst_11 : f32 to vector<64x128xf32>
    %16 = arith.mulf %15, %14 : vector<64x128xf32>
    %17 = arith.maximumf %14, %16 : vector<64x128xf32>
    %18 = arith.truncf %17 : vector<64x128xf32> to vector<64x128xbf16>
    %c0_12 = arith.constant 0 : index
    %c0_13 = arith.constant 0 : index
    %19 = vector.load %arg6[%c0_12, %c0_13] : memref<128x128xbf16, #tpu.memory_space<vmem>>, vector<128x128xbf16>
    %c0_14 = arith.constant 0 : index
    %c0_15 = arith.constant 0 : index
    %20 = vector.load %arg7[%c0_14, %c0_15] : memref<1x128xf32, #tpu.memory_space<vmem>>, vector<1x128xf32>
    %cst_16 = arith.constant dense<0.000000e+00> : vector<64x128xf32>
    %21 = tpu.matmul %18, %19, %cst_16 {dimension_numbers = #tpu.dot_dimension_numbers<[1], [0], [0], [1], [0, 0, 1, 1], [], []>} : vector<64x128xbf16>, vector<128x128xbf16>, vector<64x128xf32> -> vector<64x128xf32>
    %22 = vector.broadcast %20 : vector<1x128xf32> to vector<64x128xf32>
    %23 = arith.addf %21, %22 : vector<64x128xf32>
    %cst_17 = arith.constant 0.00999999977 : f32
    %24 = vector.broadcast %cst_17 : f32 to vector<64x128xf32>
    %25 = arith.mulf %24, %23 : vector<64x128xf32>
    %26 = arith.maximumf %23, %25 : vector<64x128xf32>
    %27 = arith.truncf %26 : vector<64x128xf32> to vector<64x128xbf16>
    %c0_18 = arith.constant 0 : index
    %c0_19 = arith.constant 0 : index
    %28 = vector.load %arg8[%c0_18, %c0_19] : memref<128x128xbf16, #tpu.memory_space<vmem>>, vector<128x128xbf16>
    %c0_20 = arith.constant 0 : index
    %c0_21 = arith.constant 0 : index
    %29 = vector.load %arg9[%c0_20, %c0_21] : memref<1x128xf32, #tpu.memory_space<vmem>>, vector<1x128xf32>
    %cst_22 = arith.constant dense<0.000000e+00> : vector<64x128xf32>
    %30 = tpu.matmul %27, %28, %cst_22 {dimension_numbers = #tpu.dot_dimension_numbers<[1], [0], [0], [1], [0, 0, 1, 1], [], []>} : vector<64x128xbf16>, vector<128x128xbf16>, vector<64x128xf32> -> vector<64x128xf32>
    %31 = vector.broadcast %29 : vector<1x128xf32> to vector<64x128xf32>
    %32 = arith.addf %30, %31 : vector<64x128xf32>
    %cst_23 = arith.constant 0.00999999977 : f32
    %33 = vector.broadcast %cst_23 : f32 to vector<64x128xf32>
    %34 = arith.mulf %33, %32 : vector<64x128xf32>
    %35 = arith.maximumf %32, %34 : vector<64x128xf32>
    %36 = arith.truncf %35 : vector<64x128xf32> to vector<64x128xbf16>
    %c0_24 = arith.constant 0 : index
    %c0_25 = arith.constant 0 : index
    %37 = vector.load %arg10[%c0_24, %c0_25] : memref<128x128xbf16, #tpu.memory_space<vmem>>, vector<128x128xbf16>
    %c0_26 = arith.constant 0 : index
    %c0_27 = arith.constant 0 : index
    %38 = vector.load %arg11[%c0_26, %c0_27] : memref<1x128xf32, #tpu.memory_space<vmem>>, vector<1x128xf32>
    %cst_28 = arith.constant dense<0.000000e+00> : vector<64x128xf32>
    %39 = tpu.matmul %36, %37, %cst_28 {dimension_numbers = #tpu.dot_dimension_numbers<[1], [0], [0], [1], [0, 0, 1, 1], [], []>} : vector<64x128xbf16>, vector<128x128xbf16>, vector<64x128xf32> -> vector<64x128xf32>
    %40 = vector.broadcast %38 : vector<1x128xf32> to vector<64x128xf32>
    %41 = arith.addf %39, %40 : vector<64x128xf32>
    %cst_29 = arith.constant 0.00999999977 : f32
    %42 = vector.broadcast %cst_29 : f32 to vector<64x128xf32>
    %43 = arith.mulf %42, %41 : vector<64x128xf32>
    %44 = arith.maximumf %41, %43 : vector<64x128xf32>
    %45 = arith.truncf %44 : vector<64x128xf32> to vector<64x128xbf16>
    %c0_30 = arith.constant 0 : index
    %c0_31 = arith.constant 0 : index
    %46 = vector.load %arg12[%c0_30, %c0_31] : memref<128x128xbf16, #tpu.memory_space<vmem>>, vector<128x128xbf16>
    %c0_32 = arith.constant 0 : index
    %c0_33 = arith.constant 0 : index
    %47 = vector.load %arg13[%c0_32, %c0_33] : memref<1x128xf32, #tpu.memory_space<vmem>>, vector<1x128xf32>
    %cst_34 = arith.constant dense<0.000000e+00> : vector<64x128xf32>
    %48 = tpu.matmul %45, %46, %cst_34 {dimension_numbers = #tpu.dot_dimension_numbers<[1], [0], [0], [1], [0, 0, 1, 1], [], []>} : vector<64x128xbf16>, vector<128x128xbf16>, vector<64x128xf32> -> vector<64x128xf32>
    %49 = vector.broadcast %47 : vector<1x128xf32> to vector<64x128xf32>
    %50 = arith.addf %48, %49 : vector<64x128xf32>
    %51 = arith.truncf %50 : vector<64x128xf32> to vector<64x128xbf16>
    %c0_35 = arith.constant 0 : index
    %c0_36 = arith.constant 0 : index
    %52 = vector.load %arg14[%c0_35, %c0_36] : memref<128x128xbf16, #tpu.memory_space<vmem>>, vector<64x128xbf16>
    tpu.vector_store %arg14[%c0_35, %c0_36], %51 {strides = array<i32>} : memref<128x128xbf16, #tpu.memory_space<vmem>>, vector<64x128xbf16>,
    %c64 = arith.constant 64 : index
    %c0_37 = arith.constant 0 : index
    %53 = vector.load %arg1[%c64, %c0_37] : memref<128x128xbf16, #tpu.memory_space<vmem>>, vector<64x128xbf16>
    %c0_38 = arith.constant 0 : index
    %c0_39 = arith.constant 0 : index
    %54 = vector.load %arg2[%c0_38, %c0_39] : memref<128x128xbf16, #tpu.memory_space<vmem>>, vector<128x128xbf16>
    %c0_40 = arith.constant 0 : index
    %c0_41 = arith.constant 0 : index
    %55 = vector.load %arg3[%c0_40, %c0_41] : memref<1x128xf32, #tpu.memory_space<vmem>>, vector<1x128xf32>
    %cst_42 = arith.constant dense<0.000000e+00> : vector<64x128xf32>
    %56 = tpu.matmul %53, %54, %cst_42 {dimension_numbers = #tpu.dot_dimension_numbers<[1], [0], [0], [1], [0, 0, 1, 1], [], []>} : vector<64x128xbf16>, vector<128x128xbf16>, vector<64x128xf32> -> vector<64x128xf32>
    %57 = vector.broadcast %55 : vector<1x128xf32> to vector<64x128xf32>
    %58 = arith.addf %56, %57 : vector<64x128xf32>
    %cst_43 = arith.constant 0.00999999977 : f32
    %59 = vector.broadcast %cst_43 : f32 to vector<64x128xf32>
    %60 = arith.mulf %59, %58 : vector<64x128xf32>
    %61 = arith.maximumf %58, %60 : vector<64x128xf32>
    %62 = arith.truncf %61 : vector<64x128xf32> to vector<64x128xbf16>
    %c0_44 = arith.constant 0 : index
    %c0_45 = arith.constant 0 : index
    %63 = vector.load %arg4[%c0_44, %c0_45] : memref<128x128xbf16, #tpu.memory_space<vmem>>, vector<128x128xbf16>
    %c0_46 = arith.constant 0 : index
    %c0_47 = arith.constant 0 : index
    %64 = vector.load %arg5[%c0_46, %c0_47] : memref<1x128xf32, #tpu.memory_space<vmem>>, vector<1x128xf32>
    %cst_48 = arith.constant dense<0.000000e+00> : vector<64x128xf32>
    %65 = tpu.matmul %62, %63, %cst_48 {dimension_numbers = #tpu.dot_dimension_numbers<[1], [0], [0], [1], [0, 0, 1, 1], [], []>} : vector<64x128xbf16>, vector<128x128xbf16>, vector<64x128xf32> -> vector<64x128xf32>
    %66 = vector.broadcast %64 : vector<1x128xf32> to vector<64x128xf32>
    %67 = arith.addf %65, %66 : vector<64x128xf32>
    %cst_49 = arith.constant 0.00999999977 : f32
    %68 = vector.broadcast %cst_49 : f32 to vector<64x128xf32>
    %69 = arith.mulf %68, %67 : vector<64x128xf32>
    %70 = arith.maximumf %67, %69 : vector<64x128xf32>
    %71 = arith.truncf %70 : vector<64x128xf32> to vector<64x128xbf16>
    %c0_50 = arith.constant 0 : index
    %c0_51 = arith.constant 0 : index
    %72 = vector.load %arg6[%c0_50, %c0_51] : memref<128x128xbf16, #tpu.memory_space<vmem>>, vector<128x128xbf16>
    %c0_52 = arith.constant 0 : index
    %c0_53 = arith.constant 0 : index
    %73 = vector.load %arg7[%c0_52, %c0_53] : memref<1x128xf32, #tpu.memory_space<vmem>>, vector<1x128xf32>
    %cst_54 = arith.constant dense<0.000000e+00> : vector<64x128xf32>
    %74 = tpu.matmul %71, %72, %cst_54 {dimension_numbers = #tpu.dot_dimension_numbers<[1], [0], [0], [1], [0, 0, 1, 1], [], []>} : vector<64x128xbf16>, vector<128x128xbf16>, vector<64x128xf32> -> vector<64x128xf32>
    %75 = vector.broadcast %73 : vector<1x128xf32> to vector<64x128xf32>
    %76 = arith.addf %74, %75 : vector<64x128xf32>
    %cst_55 = arith.constant 0.00999999977 : f32
    %77 = vector.broadcast %cst_55 : f32 to vector<64x128xf32>
    %78 = arith.mulf %77, %76 : vector<64x128xf32>
    %79 = arith.maximumf %76, %78 : vector<64x128xf32>
    %80 = arith.truncf %79 : vector<64x128xf32> to vector<64x128xbf16>
    %c0_56 = arith.constant 0 : index
    %c0_57 = arith.constant 0 : index
    %81 = vector.load %arg8[%c0_56, %c0_57] : memref<128x128xbf16, #tpu.memory_space<vmem>>, vector<128x128xbf16>
    %c0_58 = arith.constant 0 : index
    %c0_59 = arith.constant 0 : index
    %82 = vector.load %arg9[%c0_58, %c0_59] : memref<1x128xf32, #tpu.memory_space<vmem>>, vector<1x128xf32>
    %cst_60 = arith.constant dense<0.000000e+00> : vector<64x128xf32>
    %83 = tpu.matmul %80, %81, %cst_60 {dimension_numbers = #tpu.dot_dimension_numbers<[1], [0], [0], [1], [0, 0, 1, 1], [], []>} : vector<64x128xbf16>, vector<128x128xbf16>, vector<64x128xf32> -> vector<64x128xf32>
    %84 = vector.broadcast %82 : vector<1x128xf32> to vector<64x128xf32>
    %85 = arith.addf %83, %84 : vector<64x128xf32>
    %cst_61 = arith.constant 0.00999999977 : f32
    %86 = vector.broadcast %cst_61 : f32 to vector<64x128xf32>
    %87 = arith.mulf %86, %85 : vector<64x128xf32>
    %88 = arith.maximumf %85, %87 : vector<64x128xf32>
    %89 = arith.truncf %88 : vector<64x128xf32> to vector<64x128xbf16>
    %c0_62 = arith.constant 0 : index
    %c0_63 = arith.constant 0 : index
    %90 = vector.load %arg10[%c0_62, %c0_63] : memref<128x128xbf16, #tpu.memory_space<vmem>>, vector<128x128xbf16>
    %c0_64 = arith.constant 0 : index
    %c0_65 = arith.constant 0 : index
    %91 = vector.load %arg11[%c0_64, %c0_65] : memref<1x128xf32, #tpu.memory_space<vmem>>, vector<1x128xf32>
    %cst_66 = arith.constant dense<0.000000e+00> : vector<64x128xf32>
    %92 = tpu.matmul %89, %90, %cst_66 {dimension_numbers = #tpu.dot_dimension_numbers<[1], [0], [0], [1], [0, 0, 1, 1], [], []>} : vector<64x128xbf16>, vector<128x128xbf16>, vector<64x128xf32> -> vector<64x128xf32>
    %93 = vector.broadcast %91 : vector<1x128xf32> to vector<64x128xf32>
    %94 = arith.addf %92, %93 : vector<64x128xf32>
    %cst_67 = arith.constant 0.00999999977 : f32
    %95 = vector.broadcast %cst_67 : f32 to vector<64x128xf32>
    %96 = arith.mulf %95, %94 : vector<64x128xf32>
    %97 = arith.maximumf %94, %96 : vector<64x128xf32>
    %98 = arith.truncf %97 : vector<64x128xf32> to vector<64x128xbf16>
    %c0_68 = arith.constant 0 : index
    %c0_69 = arith.constant 0 : index
    %99 = vector.load %arg12[%c0_68, %c0_69] : memref<128x128xbf16, #tpu.memory_space<vmem>>, vector<128x128xbf16>
    %c0_70 = arith.constant 0 : index
    %c0_71 = arith.constant 0 : index
    %100 = vector.load %arg13[%c0_70, %c0_71] : memref<1x128xf32, #tpu.memory_space<vmem>>, vector<1x128xf32>
    %cst_72 = arith.constant dense<0.000000e+00> : vector<64x128xf32>
    %101 = tpu.matmul %98, %99, %cst_72 {dimension_numbers = #tpu.dot_dimension_numbers<[1], [0], [0], [1], [0, 0, 1, 1], [], []>} : vector<64x128xbf16>, vector<128x128xbf16>, vector<64x128xf32> -> vector<64x128xf32>
    %102 = vector.broadcast %100 : vector<1x128xf32> to vector<64x128xf32>
    %103 = arith.addf %101, %102 : vector<64x128xf32>
    %104 = arith.truncf %103 : vector<64x128xf32> to vector<64x128xbf16>
    %c64_73 = arith.constant 64 : index
    %c0_74 = arith.constant 0 : index
    %105 = vector.load %arg14[%c64_73, %c0_74] : memref<128x128xbf16, #tpu.memory_space<vmem>>, vector<64x128xbf16>
    tpu.vector_store %arg14[%c64_73, %c0_74], %104 {strides = array<i32>} : memref<128x128xbf16, #tpu.memory_space<vmem>>, vector<64x128xbf16>,
    return
  }
  func.func @transform_0(%arg0: i32) -> (i32, i32) {
    %c0_i32 = arith.constant 0 : i32
    %c0_i32_0 = arith.constant 0 : i32
    return %arg0, %c0_i32 : i32, i32
  }
  func.func @transform_1(%arg0: i32) -> (i32, i32) {
    %c0_i32 = arith.constant 0 : i32
    %c0_i32_0 = arith.constant 0 : i32
    %c0_i32_1 = arith.constant 0 : i32
    return %c0_i32, %c0_i32_0 : i32, i32
  }
  func.func @transform_2(%arg0: i32) -> (i32, i32) {
    %c0_i32 = arith.constant 0 : i32
    %c0_i32_0 = arith.constant 0 : i32
    %c0_i32_1 = arith.constant 0 : i32
    return %c0_i32, %c0_i32_0 : i32, i32
  }
  func.func @transform_3(%arg0: i32) -> (i32, i32) {
    %c0_i32 = arith.constant 0 : i32
    %c0_i32_0 = arith.constant 0 : i32
    %c0_i32_1 = arith.constant 0 : i32
    return %c0_i32, %c0_i32_0 : i32, i32
  }
  func.func @transform_4(%arg0: i32) -> (i32, i32) {
    %c0_i32 = arith.constant 0 : i32
    %c0_i32_0 = arith.constant 0 : i32
    %c0_i32_1 = arith.constant 0 : i32
    return %c0_i32, %c0_i32_0 : i32, i32
  }
  func.func @transform_5(%arg0: i32) -> (i32, i32) {
    %c0_i32 = arith.constant 0 : i32
    %c0_i32_0 = arith.constant 0 : i32
    %c0_i32_1 = arith.constant 0 : i32
    return %c0_i32, %c0_i32_0 : i32, i32
  }
  func.func @transform_6(%arg0: i32) -> (i32, i32) {
    %c0_i32 = arith.constant 0 : i32
    %c0_i32_0 = arith.constant 0 : i32
    %c0_i32_1 = arith.constant 0 : i32
    return %c0_i32, %c0_i32_0 : i32, i32
  }
  func.func @transform_7(%arg0: i32) -> (i32, i32) {
    %c0_i32 = arith.constant 0 : i32
    %c0_i32_0 = arith.constant 0 : i32
    %c0_i32_1 = arith.constant 0 : i32
    return %c0_i32, %c0_i32_0 : i32, i32
  }
  func.func @transform_8(%arg0: i32) -> (i32, i32) {
    %c0_i32 = arith.constant 0 : i32
    %c0_i32_0 = arith.constant 0 : i32
    %c0_i32_1 = arith.constant 0 : i32
    return %c0_i32, %c0_i32_0 : i32, i32
  }
  func.func @transform_9(%arg0: i32) -> (i32, i32) {
    %c0_i32 = arith.constant 0 : i32
    %c0_i32_0 = arith.constant 0 : i32
    %c0_i32_1 = arith.constant 0 : i32
    return %c0_i32, %c0_i32_0 : i32, i32
  }
  func.func @transform_10(%arg0: i32) -> (i32, i32) {
    %c0_i32 = arith.constant 0 : i32
    %c0_i32_0 = arith.constant 0 : i32
    %c0_i32_1 = arith.constant 0 : i32
    return %c0_i32, %c0_i32_0 : i32, i32
  }
  func.func @transform_11(%arg0: i32) -> (i32, i32) {
    %c0_i32 = arith.constant 0 : i32
    %c0_i32_0 = arith.constant 0 : i32
    %c0_i32_1 = arith.constant 0 : i32
    return %c0_i32, %c0_i32_0 : i32, i32
  }
  func.func @transform_12(%arg0: i32) -> (i32, i32) {
    %c0_i32 = arith.constant 0 : i32
    %c0_i32_0 = arith.constant 0 : i32
    %c0_i32_1 = arith.constant 0 : i32
    return %c0_i32, %c0_i32_0 : i32, i32
  }
  func.func @transform_13(%arg0: i32) -> (i32, i32) {
    %c0_i32 = arith.constant 0 : i32
    %c0_i32_0 = arith.constant 0 : i32
    return %arg0, %c0_i32 : i32, i32
  }
}

</mosaic_0001>

<bundles_post_ra>
// kernel: tpu_custom_call.1
= control target key start
LH: loop header
LB: loop body
LE: loop exit
PB: predicated region body
PF: predicated region fallthrough
CT: control target
= control target key end

     0   :  { %18 = vsyncpa [#allocation3], 0  ;;  %s3411_s0 = inlined_call_operand.hbm [shape: bf16[128,128], index: 0, kind: input, shape index: {}]   ;;  %s3412_s1 = inlined_call_operand.hbm [shape: bf16[128,128], index: 1, kind: input, shape index: {}]   ;;  %s3413_s2 = inlined_call_operand.vmem [shape: f32[1,128], index: 2, kind: input, shape index: {}]   ;;  %s3414_s3 = inlined_call_operand.hbm [shape: bf16[128,128], index: 3, kind: input, shape index: {}]   ;;  %s3415_s4 = inlined_call_operand.vmem [shape: f32[1,128], index: 4, kind: input, shape index: {}]   ;;  %s3416_s5 = inlined_call_operand.hbm [shape: bf16[128,128], index: 5, kind: input, shape index: {}]   ;;  %s3417_s6 = inlined_call_operand.vmem [shape: f32[1,128], index: 6, kind: input, shape index: {}]   ;;  %s3418_s7 = inlined_call_operand.hbm [shape: bf16[128,128], index: 7, kind: input, shape index: {}]   ;;  %s3419_s8 = inlined_call_operand.vmem [shape: f32[1,128], index: 8, kind: input, shape index: {}]   ;;  %s3420_s9 = inlined_call_operand.hbm [shape: bf16[128,128], index: 9, kind: input, shape index: {}]   ;;  %s3421_s10 = inlined_call_operand.vmem [shape: f32[1,128], index: 10, kind: input, shape index: {}]   ;;  %s3422_s11 = inlined_call_operand.hbm [shape: bf16[128,128], index: 11, kind: input, shape index: {}]   ;;  %s3423_s12 = inlined_call_operand.vmem [shape: f32[1,128], index: 12, kind: input, shape index: {}]   ;;  %s3424_s13 = inlined_call_operand.hbm [shape: bf16[128,128], index: 13, kind: output, shape index: {}]  }
   0x1   :  { %19 = vsyncpa [#allocation6], 0 }
   0x2   :  { %20 = vsyncpa [#allocation9], 0 }
   0x3   :  { %21 = vsyncpa [#allocation12], 0 }
   0x4   :  { %22 = vsyncpa [#allocation4], 0  ;;  %s3064_s25 = smov [#allocation5]   ;;  %s3065_s27 = smov [#allocation8]  }
   0x5   :  { %s40_s26 = sshll.u32 %s3064_s25, 4  ;;  %s68_s28 = sshll.u32 %s3065_s27, 4  ;;  %s41_s26 = int_to_ptr.vmem [resolvable:$true] %s40_s26  ;;  %s3144_s28 = int_to_ptr.vmem [resolvable:$true] %s68_s28 }
   0x6   :  { %s2878_s14 = scalar_lea.hbm %s3412_s1, 1024 }
   0x7   :  { %p2879_p0 = scmp.ne.s32.totalorder %s3412_s1, %s2878_s14  ;;  %p2882_p1 = scmp.lt.u32.totalorder %s2878_s14, %s3412_s1 }
   0x9   :  { %p2884_p2 = pnand %p2882_p1, %p2879_p0 }
   0xb   :  { %2887 = shalt.err (!%p2884_p2)
}
   0xc   :  { %s2888_s19 = scalar_lea.vmem %s41_s26, 1024  ;;  %p2893_p4 = scmp.lt.s32.totalorder %s41_s26, %s41_s26 }
   0xd   :  { %p2889_p3 = scmp.ne.s32.totalorder %s41_s26, %s2888_s19  ;;  %p2894_p5 = scmp.lt.s32.totalorder %s2888_s19, %s2888_s19 }
   0xf   :  { %p2895_p6 = por %p2894_p5, %p2893_p4 }
  0x11   :  { %p2896_p7 = pnand %p2895_p6, %p2889_p3 }
  0x13   :  { %2899 = shalt.err (!%p2896_p7)
}
  0x14   :  { %s3066_s20 = smov 64   ;;  %s3067_s21 = smov 4  }
  0x15   :  { %46 = dma.hbm_to_vmem [thread:$0]  %s3412_s1, 1024, %s41_s26, [#allocation6], %s3066_s20, %s3066_s20, %s3067_s21  }
  0x16   :  { %s2900_s27 = scalar_lea.hbm %s3416_s5, 1024 }
  0x17   :  { %p2901_p8 = scmp.ne.s32.totalorder %s3416_s5, %s2900_s27  ;;  %p2904_p9 = scmp.lt.u32.totalorder %s2900_s27, %s3416_s5 }
  0x19   :  { %p2906_p10 = pnand %p2904_p9, %p2901_p8 }
  0x1b   :  { %2909 = shalt.err (!%p2906_p10)
}
  0x1c   :  { %s2910_s16 = scalar_lea.vmem %s3144_s28, 1024  ;;  %p2915_p12 = scmp.lt.s32.totalorder %s3144_s28, %s3144_s28 }
  0x1d   :  { %p2911_p11 = scmp.ne.s32.totalorder %s3144_s28, %s2910_s16  ;;  %p2916_p13 = scmp.lt.s32.totalorder %s2910_s16, %s2910_s16 }
  0x1f   :  { %p2917_p0 = por %p2916_p13, %p2915_p12 }
  0x21   :  { %p2918_p1 = pnand %p2917_p0, %p2911_p11 }
  0x23   :  { %2921 = shalt.err (!%p2918_p1)
}
  0x24   :  { %74 = dma.hbm_to_vmem [thread:$0]  %s3416_s5, 1024, %s3144_s28, [#allocation9], %s3066_s20, %s3066_s20, %s3067_s21  }
  0x25   :  { %s3068_s17 = smov [#allocation11]   ;;  %s3069_s19 = smov [#allocation2]  }
  0x26   :  { %s96_s18 = sshll.u32 %s3068_s17, 4  ;;  %s28_s22 = sshll.u32 %s3069_s19, 4  ;;  %s97_s18 = int_to_ptr.vmem [resolvable:$true] %s96_s18  ;;  %s3181_s22 = int_to_ptr.vmem [resolvable:$true] %s28_s22 }
  0x27   :  { %s2922_s25 = scalar_lea.hbm %s3420_s9, 1024 }
  0x28   :  { %p2923_p2 = scmp.ne.s32.totalorder %s3420_s9, %s2922_s25  ;;  %p2926_p3 = scmp.lt.u32.totalorder %s2922_s25, %s3420_s9 }
  0x2a   :  { %p2928_p4 = pnand %p2926_p3, %p2923_p2 }
  0x2c   :  { %2931 = shalt.err (!%p2928_p4)
}
  0x2d   :  { %s2932_s5 = scalar_lea.vmem %s97_s18, 1024  ;;  %p2937_p6 = scmp.lt.s32.totalorder %s97_s18, %s97_s18 }
  0x2e   :  { %p2933_p5 = scmp.ne.s32.totalorder %s97_s18, %s2932_s5  ;;  %p2938_p7 = scmp.lt.s32.totalorder %s2932_s5, %s2932_s5 }
  0x30   :  { %p2939_p8 = por %p2938_p7, %p2937_p6 }
  0x32   :  { %p2940_p9 = pnand %p2939_p8, %p2933_p5 }
  0x34   :  { %2943 = shalt.err (!%p2940_p9)
}
  0x35   :  { %102 = dma.hbm_to_vmem [thread:$0]  %s3420_s9, 1024, %s97_s18, [#allocation12], %s3066_s20, %s3066_s20, %s3067_s21  }
  0x36   :  { %s2944_s26 = scalar_lea.hbm %s3411_s0, 1024 }
  0x37   :  { %p2945_p10 = scmp.ne.s32.totalorder %s3411_s0, %s2944_s26  ;;  %p2948_p11 = scmp.lt.u32.totalorder %s2944_s26, %s3411_s0 }
  0x39   :  { %p2950_p12 = pnand %p2948_p11, %p2945_p10 }
  0x3b   :  { %2953 = shalt.err (!%p2950_p12)
}
  0x3c   :  { %s2954_s25 = scalar_lea.vmem %s3181_s22, 1024  ;;  %p2959_p0 = scmp.lt.s32.totalorder %s3181_s22, %s3181_s22 }
  0x3d   :  { %p2955_p13 = scmp.ne.s32.totalorder %s3181_s22, %s2954_s25  ;;  %p2960_p1 = scmp.lt.s32.totalorder %s2954_s25, %s2954_s25 }
  0x3f   :  { %p2961_p2 = por %p2960_p1, %p2959_p0 }
  0x41   :  { %p2962_p3 = pnand %p2961_p2, %p2955_p13 }
  0x43   :  { %2965 = shalt.err (!%p2962_p3)
}
  0x44   :  { %34 = dma.hbm_to_vmem [thread:$0]  %s3411_s0, 1024, %s3181_s22, [#allocation3], %s3066_s20, %s3066_s20, %s3067_s21  }
  0x45   :  { %s3070_s27 = smov [#allocation7]   ;;  %s3071_s30 = smov [#allocation10]  }
  0x46   :  { %s54_s29 = sshll.u32 %s3070_s27, 4  ;;  %s82_s14 = sshll.u32 %s3071_s30, 4  ;;  %s55_s29 = int_to_ptr.vmem [resolvable:$true] %s54_s29  ;;  %s3218_s14 = int_to_ptr.vmem [resolvable:$true] %s82_s14 }
  0x47   :  { %s2966_s15 = scalar_lea.hbm %s3414_s3, 1024 }
  0x48   :  { %p2967_p4 = scmp.ne.s32.totalorder %s3414_s3, %s2966_s15  ;;  %p2970_p5 = scmp.lt.u32.totalorder %s2966_s15, %s3414_s3 }
  0x4a   :  { %p2972_p6 = pnand %p2970_p5, %p2967_p4 }
  0x4c   :  { %2975 = shalt.err (!%p2972_p6)
}
  0x4d   :  { %s2976_s0 = scalar_lea.vmem %s55_s29, 1024  ;;  %p2981_p8 = scmp.lt.s32.totalorder %s55_s29, %s55_s29 }
  0x4e   :  { %p2977_p7 = scmp.ne.s32.totalorder %s55_s29, %s2976_s0  ;;  %p2982_p9 = scmp.lt.s32.totalorder %s2976_s0, %s2976_s0 }
  0x50   :  { %p2983_p10 = por %p2982_p9, %p2981_p8 }
  0x52   :  { %p2984_p11 = pnand %p2983_p10, %p2977_p7 }
  0x54   :  { %2987 = shalt.err (!%p2984_p11)
}
  0x55   :  { %60 = dma.hbm_to_vmem [thread:$0]  %s3414_s3, 1024, %s55_s29, [#allocation6], %s3066_s20, %s3066_s20, %s3067_s21  }
  0x56   :  { %s2988_s25 = scalar_lea.hbm %s3418_s7, 1024 }
  0x57   :  { %p2989_p12 = scmp.ne.s32.totalorder %s3418_s7, %s2988_s25  ;;  %p2992_p13 = scmp.lt.u32.totalorder %s2988_s25, %s3418_s7 }
  0x59   :  { %p2994_p0 = pnand %p2992_p13, %p2989_p12 }
  0x5b   :  { %2997 = shalt.err (!%p2994_p0)
}
  0x5c   :  { %s2998_s5 = scalar_lea.vmem %s3218_s14, 1024  ;;  %p3003_p2 = scmp.lt.s32.totalorder %s3218_s14, %s3218_s14 }
  0x5d   :  { %p2999_p1 = scmp.ne.s32.totalorder %s3218_s14, %s2998_s5  ;;  %p3004_p3 = scmp.lt.s32.totalorder %s2998_s5, %s2998_s5 }
  0x5f   :  { %p3005_p4 = por %p3004_p3, %p3003_p2 }
  0x61   :  { %p3006_p5 = pnand %p3005_p4, %p2999_p1 }
  0x63   :  { %3009 = shalt.err (!%p3006_p5)
}
  0x64   :  { %88 = dma.hbm_to_vmem [thread:$0]  %s3418_s7, 1024, %s3218_s14, [#allocation9], %s3066_s20, %s3066_s20, %s3067_s21  }
  0x65   :  { %s3072_s28 = smov [#allocation13]   ;;  %s3010_s26 = scalar_lea.hbm %s3422_s11, 1024 }
  0x66   :  { %s110_s15 = sshll.u32 %s3072_s28, 4  ;;  %p3011_p6 = scmp.ne.s32.totalorder %s3422_s11, %s3010_s26  ;;  %s111_s15 = int_to_ptr.vmem [resolvable:$true] %s110_s15 }
  0x67   :  { %p3014_p7 = scmp.lt.u32.totalorder %s3010_s26, %s3422_s11 }
  0x69   :  { %p3016_p8 = pnand %p3014_p7, %p3011_p6 }
  0x6b   :  { %3019 = shalt.err (!%p3016_p8)
}
  0x6c   :  { %s3020_s23 = scalar_lea.vmem %s111_s15, 1024  ;;  %p3025_p10 = scmp.lt.s32.totalorder %s111_s15, %s111_s15 }
  0x6d   :  { %p3021_p9 = scmp.ne.s32.totalorder %s111_s15, %s3020_s23  ;;  %p3026_p11 = scmp.lt.s32.totalorder %s3020_s23, %s3020_s23 }
  0x6f   :  { %p3027_p12 = por %p3026_p11, %p3025_p10 }
  0x71   :  { %p3028_p13 = pnand %p3027_p12, %p3021_p9 }
  0x73   :  { %3031 = shalt.err (!%p3028_p13)
}
  0x74   :  { %116 = dma.hbm_to_vmem [thread:$0]  %s3422_s11, 1024, %s111_s15, [#allocation12], %s3066_s20, %s3066_s20, %s3067_s21  }
  0x75   :  { %3054 = dma.done.wait [#allocation3], 1024  }
  0x76   :  { %3055 = vsyncadd [#allocation3], 4294966272 }
  0x77   :  { %3056 = dma.done.wait [#allocation6], 2048  }
  0x78   :  { %3057 = vsyncadd [#allocation6], 4294965248 }
  0x79   :  { %3058 = dma.done.wait [#allocation9], 2048  }
  0x7a   :  { %3059 = vsyncadd [#allocation9], 4294965248 }
  0x7b   :  { %3060 = dma.done.wait [#allocation12], 2048  }
  0x7c   :  { %3061 = vsyncadd [#allocation12], 4294965248  ;;  %v2774_v0 = vld [vmem:[#allocation5] sm:$0xff]   ;;  %v2775_v1 = vld [vmem:[#allocation5 + $0x8] sm:$0xff]  }
  0x7d   :  { %2476 = vmatprep.subr.bf16.mxu0 %v2774_v0  ;;  %v2776_v2 = vld [vmem:[#allocation5 + $0x10] sm:$0xff]   ;;  %v2777_v3 = vld [vmem:[#allocation5 + $0x18] sm:$0xff]   ;;  %v2782_v4 = vld [vmem:[#allocation2] sm:$0xff]  }
  0x7e   :  { %2477 = vmatpush3.bf16.msra.mxu0 %v2774_v0  ;;  %2492 = vmatprep.mubr.bf16.mxu0 %v2782_v4  ;;  %v2778_v5 = vld [vmem:[#allocation5 + $0x20] sm:$0xff]   ;;  %v2787_v7 = vld [vmem:[#allocation7 + $0x8] sm:$0xff]   ;;  %v2788_v9 = vld [vmem:[#allocation7 + $0x10] sm:$0xff]  }
  0x7f   :  { %2478 = vmatprep.subr.bf16.mxu0 %v2775_v1  ;;  %v2786_v6 = vld [vmem:[#allocation7] sm:$0xff]   ;;  %v2779_v8 = vld [vmem:[#allocation5 + $0x28] sm:$0xff]   ;;  %v2780_v10 = vld [vmem:[#allocation5 + $0x30] sm:$0xff]  }
  0x80   :  { %2500 = vmatprep.subr.bf16.mxu1 %v2786_v6  ;;  %v2789_v11 = vld [vmem:[#allocation7 + $0x18] sm:$0xff]   ;;  %v2790_v13 = vld [vmem:[#allocation7 + $0x20] sm:$0xff]   ;;  %v2783_v14 = vld [vmem:[#allocation2 + $0x8] sm:$0xff]  }
  0x81   :  { %2501 = vmatpush3.bf16.msra.mxu1 %v2786_v6  ;;  %v2781_v12 = vld [vmem:[#allocation5 + $0x38] sm:$0xff]   ;;  %v2784_v15 = vld [vmem:[#allocation2 + $0x10] sm:$0xff]   ;;  %v2791_v17 = vld [vmem:[#allocation7 + $0x28] sm:$0xff]  }
  0x82   :  { %2479 = vmatpush3.bf16.msra.mxu0 %v2775_v1  ;;  %2502 = vmatprep.subr.bf16.mxu1 %v2787_v7  ;;  %v2785_v16 = vld [vmem:[#allocation2 + $0x18] sm:$0xff]   ;;  %v2792_v18 = vld [vmem:[#allocation7 + $0x30] sm:$0xff]   ;;  %v2794_v20 = vld [vmem:[#allocation8] sm:$0xff]  }
  0x83   :  { %2480 = vmatprep.subr.bf16.mxu0 %v2776_v2  ;;  %v2793_v19 = vld [vmem:[#allocation7 + $0x38] sm:$0xff]   ;;  %v2795_v21 = vld [vmem:[#allocation8 + $0x8] sm:$0xff]   ;;  %v2796_v22 = vld [vmem:[#allocation8 + $0x10] sm:$0xff]  }
  0x84   :  { %v2797_v23 = vld [vmem:[#allocation8 + $0x18] sm:$0xff]   ;;  %v2798_v24 = vld [vmem:[#allocation8 + $0x20] sm:$0xff]   ;;  %v2799_v62 = vld [vmem:[#allocation8 + $0x28] sm:$0xff]  }
  0x85   :  { %2503 = vmatpush3.bf16.msra.mxu1 %v2787_v7  ;;  %v3273_v25 = vld [vmem:[%s3413_s2] ss:$0 sm:$0xff]  ;;  %v2800_v63 = vld [vmem:[#allocation8 + $0x30] sm:$0xff]   ;;  %v2801_v0 = vld [vmem:[#allocation8 + $0x38] sm:$0xff]  }
  0x86   :  { %2481 = vmatpush3.bf16.msra.mxu0 %v2776_v2  ;;  %2504 = vmatprep.subr.bf16.mxu1 %v2788_v9  ;;  %v2802_v1 = vld [vmem:[#allocation10] sm:$0xff]   ;;  %v2803_v2 = vld [vmem:[#allocation10 + $0x8] sm:$0xff]   ;;  %v2805_v4 = vld [vmem:[#allocation10 + $0x18] sm:$0xff]  }
  0x87   :  { %2482 = vmatprep.subr.bf16.mxu0 %v2777_v3  ;;  %v3286_v6 = vld [vmem:[%s3415_s4] ss:$0 sm:$0xff] }
  0x89   :  { %2505 = vmatpush3.bf16.msra.mxu1 %v2788_v9 }
  0x8a   :  { %2483 = vmatpush3.bf16.msra.mxu0 %v2777_v3  ;;  %2506 = vmatprep.subr.bf16.mxu1 %v2789_v11  ;;  %v2804_v3 = vld [vmem:[#allocation10 + $0x10] sm:$0xff]  }
  0x8b   :  { %2484 = vmatprep.subr.bf16.mxu0 %v2778_v5 }
  0x8d   :  { %2507 = vmatpush3.bf16.msra.mxu1 %v2789_v11 }
  0x8e   :  { %2485 = vmatpush3.bf16.msra.mxu0 %v2778_v5  ;;  %2508 = vmatprep.subr.bf16.mxu1 %v2790_v13  ;;  %v2806_v5 = vld [vmem:[#allocation10 + $0x20] sm:$0xff]  }
  0x8f   :  { %2486 = vmatprep.subr.bf16.mxu0 %v2779_v8 }
  0x91   :  { %2509 = vmatpush3.bf16.msra.mxu1 %v2790_v13 }
  0x92   :  { %2487 = vmatpush3.bf16.msra.mxu0 %v2779_v8  ;;  %2510 = vmatprep.subr.bf16.mxu1 %v2791_v17 }
  0x93   :  { %2488 = vmatprep.subr.bf16.mxu0 %v2780_v10 }
  0x95   :  { %2511 = vmatpush3.bf16.msra.mxu1 %v2791_v17 }
  0x96   :  { %2489 = vmatpush3.bf16.msra.mxu0 %v2780_v10  ;;  %2512 = vmatprep.subr.bf16.mxu1 %v2792_v18 }
  0x97   :  { %2490 = vmatprep.subr.bf16.mxu0 %v2781_v12 }
  0x99   :  { %2513 = vmatpush3.bf16.msra.mxu1 %v2792_v18 }
  0x9a   :  { %2491 = vmatpush3.bf16.msra.mxu0 %v2781_v12  ;;  %2514 = vmatprep.subr.bf16.mxu1 %v2793_v19 }
  0x9b   :  { %2524 = vmatprep.subr.bf16.mxu0 %v2794_v20 }
  0x9d   :  { %2493 = vmatmul.mubr.bf16.vlgmr.msra.gmra.mrb[0].mxu0 %v2783_v14  ;;  %2515 = vmatpush3.bf16.msra.mxu1 %v2793_v19 }
  0x9e   :  { %2496 = vmatprep.mubr.bf16.mxu0 %v2784_v15  ;;  %2525 = vmatpush3.bf16.msra.mxu0 %v2794_v20 }
  0x9f   :  { %2526 = vmatprep.subr.bf16.mxu0 %v2795_v21  ;;  %2548 = vmatprep.subr.bf16.mxu1 %v2802_v1 }
  0xa2   :  { %2527 = vmatpush3.bf16.msra.mxu0 %v2795_v21 }
  0xa3   :  { %2528 = vmatprep.subr.bf16.mxu0 %v2796_v22 }
  0xa5   :  { %2497 = vmatmul.mubr.bf16.gmra.mrb[4].mxu0 %v2785_v16 }
  0xa6   :  { %2529 = vmatpush3.bf16.msra.mxu0 %v2796_v22 }
  0xa7   :  { %2530 = vmatprep.subr.bf16.mxu0 %v2797_v23 }
  0xaa   :  { %2531 = vmatpush3.bf16.msra.mxu0 %v2797_v23 }
  0xab   :  { %2532 = vmatprep.subr.bf16.mxu0 %v2798_v24 }
  0xae   :  { %2533 = vmatpush3.bf16.msra.mxu0 %v2798_v24 }
  0xaf   :  { %2534 = vmatprep.subr.bf16.mxu0 %v2799_v62 }
  0xb2   :  { %2535 = vmatpush3.bf16.msra.mxu0 %v2799_v62 }
  0xb3   :  { %2536 = vmatprep.subr.bf16.mxu0 %v2800_v63 }
  0xb6   :  { %2537 = vmatpush3.bf16.msra.mxu0 %v2800_v63 }
  0xb7   :  { %2538 = vmatprep.subr.bf16.mxu0 %v2801_v0 }
  0xba   :  { %2539 = vmatpush3.bf16.msra.mxu0 %v2801_v0 }
 0x170   :  { %v2494_v26 = vpop.f32.mrb[0].mxu0 }
 0x171   :  { %v287_v27 = vadd.f32 %v2494_v26, %v3273_v25  ;;  %v278_v28 = vpop.f32.mrb[1].mxu0 }
 0x172   :  { %v279_v29 = vadd.f32 %v3273_v25, %v278_v28  ;;  %v2495_v30 = vpop.f32.mrb[2].mxu0 }
 0x173   :  { %v311_v31 = vmul.f32 0.01, %v287_v27  ;;  %v290_v32 = vadd.f32 %v2495_v30, %v3273_v25  ;;  %v281_v33 = vpop.f32.mrb[3].mxu0 }
 0x174   :  { %v309_v34 = vmul.f32 0.01, %v279_v29  ;;  %v282_v35 = vadd.f32 %v3273_v25, %v281_v33 }
 0x175   :  { %v312_v36 = vmul.f32 0.01, %v290_v32  ;;  %v319_v38 = vmax.f32 %v287_v27, %v311_v31 }
 0x176   :  { %v310_v37 = vmul.f32 0.01, %v282_v35  ;;  %v317_v41 = vmax.f32 %v279_v29, %v309_v34 }
 0x177   :  { %v320_v39 = vmax.f32 %v290_v32, %v312_v36 }
 0x178   :  { %v2498_v40 = vpop.f32.mrb[4].mxu0  ;;  %v318_v42 = vmax.f32 %v282_v35, %v310_v37 }
 0x179   :  { %v303_v43 = vadd.f32 %v2498_v40, %v3273_v25  ;;  %v294_v44 = vpop.f32.mrb[5].mxu0  ;;  %v326_v45 = vpack.c.bf16 %v320_v39, %v319_v38 }
 0x17a   :  { %v295_v46 = vadd.f32 %v3273_v25, %v294_v44  ;;  %v2499_v47 = vpop.f32.mrb[6].mxu0  ;;  %v325_v48 = vpack.c.bf16 %v318_v42, %v317_v41  ;;  %v2807_v44 = vld [vmem:[#allocation10 + $0x28] sm:$0xff]  }
 0x17b   :  { %v315_v49 = vmul.f32 0.01, %v303_v43  ;;  %v306_v50 = vadd.f32 %v2499_v47, %v3273_v25  ;;  %v297_v51 = vpop.f32.mrb[7].mxu0  ;;  %v2810_v47 = vld [vmem:[#allocation11] sm:$0xff]  }
 0x17c   :  { %v313_v52 = vmul.f32 0.01, %v295_v46  ;;  %v298_v53 = vadd.f32 %v3273_v25, %v297_v51  ;;  %2516 = vmatprep.mubr.bf16.mxu1 %v325_v48  ;;  %v2811_v48 = vld [vmem:[#allocation11 + $0x8] sm:$0xff]   ;;  %2572 = vmatprep.subr.bf16.mxu0 %v2810_v47  ;;  %v2814_v51 = vld [vmem:[#allocation11 + $0x20] sm:$0xff]  }
 0x17d   :  { %v323_v54 = vmax.f32 %v303_v43, %v315_v49  ;;  %v316_v55 = vmul.f32 0.01, %v306_v50  ;;  %2517 = vmatmul.mubr.bf16.vlgmr.msra.gmra.mrb[0].mxu1 %v326_v45  ;;  %v2808_v45 = vld [vmem:[#allocation10 + $0x30] sm:$0xff]  }
 0x17e   :  { %v321_v56 = vmax.f32 %v295_v46, %v313_v52  ;;  %v314_v57 = vmul.f32 0.01, %v298_v53  ;;  %2549 = vmatpush3.bf16.msra.mxu1 %v2802_v1  ;;  %v2809_v46 = vld [vmem:[#allocation10 + $0x38] sm:$0xff]   ;;  %v2812_v49 = vld [vmem:[#allocation11 + $0x10] sm:$0xff]   ;;  %v3299_v52 = vld [vmem:[%s3417_s6] ss:$0 sm:$0xff] }
 0x17f   :  { %v324_v58 = vmax.f32 %v306_v50, %v316_v55  ;;  %2550 = vmatprep.subr.bf16.mxu1 %v2803_v2  ;;  %v2813_v50 = vld [vmem:[#allocation11 + $0x18] sm:$0xff]  }
 0x180   :  { %v322_v59 = vmax.f32 %v298_v53, %v314_v57 }
 0x181   :  { %v328_v60 = vpack.c.bf16 %v324_v58, %v323_v54 }
 0x182   :  { %v327_v61 = vpack.c.bf16 %v322_v59, %v321_v56  ;;  %2551 = vmatpush3.bf16.msra.mxu1 %v2803_v2 }
 0x183   :  { %2552 = vmatprep.subr.bf16.mxu1 %v2804_v3 }
 0x184   :  { %2520 = vmatprep.mubr.bf16.mxu1 %v327_v61 }
 0x185   :  { %2521 = vmatmul.mubr.bf16.gmra.mrb[4].mxu1 %v328_v60 }
 0x186   :  { %2553 = vmatpush3.bf16.msra.mxu1 %v2804_v3 }
 0x187   :  { %2554 = vmatprep.subr.bf16.mxu1 %v2805_v4 }
 0x18a   :  { %2555 = vmatpush3.bf16.msra.mxu1 %v2805_v4 }
 0x18b   :  { %2556 = vmatprep.subr.bf16.mxu1 %v2806_v5 }
 0x18e   :  { %2557 = vmatpush3.bf16.msra.mxu1 %v2806_v5 }
 0x18f   :  { %2558 = vmatprep.subr.bf16.mxu1 %v2807_v44 }
 0x192   :  { %2559 = vmatpush3.bf16.msra.mxu1 %v2807_v44 }
 0x193   :  { %2560 = vmatprep.subr.bf16.mxu1 %v2808_v45 }
 0x196   :  { %2561 = vmatpush3.bf16.msra.mxu1 %v2808_v45 }
 0x197   :  { %2562 = vmatprep.subr.bf16.mxu1 %v2809_v46 }
 0x19a   :  { %2563 = vmatpush3.bf16.msra.mxu1 %v2809_v46 }
 0x250   :  { %v2518_v7 = vpop.f32.mrb[0].mxu1 }
 0x251   :  { %v443_v8 = vadd.f32 %v2518_v7, %v3286_v6  ;;  %v434_v9 = vpop.f32.mrb[1].mxu1 }
 0x252   :  { %v435_v10 = vadd.f32 %v3286_v6, %v434_v9  ;;  %v2519_v11 = vpop.f32.mrb[2].mxu1 }
 0x253   :  { %v467_v12 = vmul.f32 0.01, %v443_v8  ;;  %v446_v13 = vadd.f32 %v2519_v11, %v3286_v6  ;;  %v437_v14 = vpop.f32.mrb[3].mxu1 }
 0x254   :  { %v465_v15 = vmul.f32 0.01, %v435_v10  ;;  %v438_v16 = vadd.f32 %v3286_v6, %v437_v14 }
 0x255   :  { %v468_v17 = vmul.f32 0.01, %v446_v13  ;;  %v475_v19 = vmax.f32 %v443_v8, %v467_v12 }
 0x256   :  { %v466_v18 = vmul.f32 0.01, %v438_v16  ;;  %v473_v21 = vmax.f32 %v435_v10, %v465_v15 }
 0x257   :  { %v476_v20 = vmax.f32 %v446_v13, %v468_v17 }
 0x258   :  { %v474_v22 = vmax.f32 %v438_v16, %v466_v18  ;;  %v2522_v23 = vpop.f32.mrb[4].mxu1 }
 0x259   :  { %v482_v24 = vpack.c.bf16 %v476_v20, %v475_v19  ;;  %v459_v26 = vadd.f32 %v2522_v23, %v3286_v6  ;;  %v450_v27 = vpop.f32.mrb[5].mxu1 }
 0x25a   :  { %v451_v28 = vadd.f32 %v3286_v6, %v450_v27  ;;  %v2523_v29 = vpop.f32.mrb[6].mxu1  ;;  %v481_v30 = vpack.c.bf16 %v474_v22, %v473_v21  ;;  %v2815_v27 = vld [vmem:[#allocation11 + $0x28] sm:$0xff]  }
 0x25b   :  { %v471_v31 = vmul.f32 0.01, %v459_v26  ;;  %v462_v32 = vadd.f32 %v2523_v29, %v3286_v6  ;;  %v453_v33 = vpop.f32.mrb[7].mxu1  ;;  %v2817_v29 = vld [vmem:[#allocation11 + $0x38] sm:$0xff]  }
 0x25c   :  { %v469_v34 = vmul.f32 0.01, %v451_v28  ;;  %v454_v35 = vadd.f32 %v3286_v6, %v453_v33  ;;  %2540 = vmatprep.mubr.bf16.mxu0 %v481_v30  ;;  %v2818_v30 = vld [vmem:[#allocation5] sm:$0xff]   ;;  %v2832_v33 = vld [vmem:[#allocation13 + $0x10] sm:$0xff]  }
 0x25d   :  { %v479_v36 = vmax.f32 %v459_v26, %v471_v31  ;;  %v472_v37 = vmul.f32 0.01, %v462_v32  ;;  %2541 = vmatmul.mubr.bf16.vlgmr.msra.gmra.mrb[8].mxu0 %v482_v24  ;;  %v2830_v31 = vld [vmem:[#allocation13] sm:$0xff]  }
 0x25e   :  { %v477_v38 = vmax.f32 %v451_v28, %v469_v34  ;;  %v470_v39 = vmul.f32 0.01, %v454_v35  ;;  %2573 = vmatpush3.bf16.msra.mxu0 %v2810_v47  ;;  %v2816_v28 = vld [vmem:[#allocation11 + $0x30] sm:$0xff]   ;;  %2596 = vmatprep.subr.bf16.mxu1 %v2830_v31  ;;  %v2833_v34 = vld [vmem:[#allocation13 + $0x18] sm:$0xff]  }
 0x25f   :  { %v480_v40 = vmax.f32 %v462_v32, %v472_v37  ;;  %2574 = vmatprep.subr.bf16.mxu0 %v2811_v48  ;;  %v2831_v32 = vld [vmem:[#allocation13 + $0x8] sm:$0xff]  }
 0x260   :  { %v478_v41 = vmax.f32 %v454_v35, %v470_v39  ;;  %v2834_v35 = vld [vmem:[#allocation13 + $0x20] sm:$0xff]  }
 0x261   :  { %v484_v42 = vpack.c.bf16 %v480_v40, %v479_v36  ;;  %v3312_v36 = vld [vmem:[%s3419_s8] ss:$0 sm:$0xff] }
 0x262   :  { %v483_v43 = vpack.c.bf16 %v478_v41, %v477_v38  ;;  %2575 = vmatpush3.bf16.msra.mxu0 %v2811_v48 }
 0x263   :  { %2576 = vmatprep.subr.bf16.mxu0 %v2812_v49 }
 0x264   :  { %2544 = vmatprep.mubr.bf16.mxu0 %v483_v43 }
 0x265   :  { %2545 = vmatmul.mubr.bf16.gmra.mrb[12].mxu0 %v484_v42 }
 0x266   :  { %2577 = vmatpush3.bf16.msra.mxu0 %v2812_v49 }
 0x267   :  { %2578 = vmatprep.subr.bf16.mxu0 %v2813_v50 }
 0x26a   :  { %2579 = vmatpush3.bf16.msra.mxu0 %v2813_v50 }
 0x26b   :  { %2580 = vmatprep.subr.bf16.mxu0 %v2814_v51 }
 0x26e   :  { %2581 = vmatpush3.bf16.msra.mxu0 %v2814_v51 }
 0x26f   :  { %2582 = vmatprep.subr.bf16.mxu0 %v2815_v27 }
 0x272   :  { %2583 = vmatpush3.bf16.msra.mxu0 %v2815_v27  ;;  %v3325_v27 = vld [vmem:[%s3421_s10] ss:$0 sm:$0xff] }
 0x273   :  { %2584 = vmatprep.subr.bf16.mxu0 %v2816_v28 }
 0x276   :  { %2585 = vmatpush3.bf16.msra.mxu0 %v2816_v28 }
 0x277   :  { %2586 = vmatprep.subr.bf16.mxu0 %v2817_v29 }
 0x27a   :  { %2587 = vmatpush3.bf16.msra.mxu0 %v2817_v29 }
 0x27b   :  { %2620 = vmatprep.subr.bf16.mxu0 %v2818_v30 }
 0x330   :  { %v2542_v53 = vpop.f32.mrb[8].mxu0 }
 0x331   :  { %v599_v54 = vadd.f32 %v2542_v53, %v3299_v52  ;;  %v590_v55 = vpop.f32.mrb[9].mxu0 }
 0x332   :  { %v591_v56 = vadd.f32 %v3299_v52, %v590_v55  ;;  %v2543_v57 = vpop.f32.mrb[10].mxu0 }
 0x333   :  { %v623_v58 = vmul.f32 0.01, %v599_v54  ;;  %v602_v59 = vadd.f32 %v2543_v57, %v3299_v52  ;;  %v593_v60 = vpop.f32.mrb[11].mxu0 }
 0x334   :  { %v621_v61 = vmul.f32 0.01, %v591_v56  ;;  %v594_v62 = vadd.f32 %v3299_v52, %v593_v60 }
 0x335   :  { %v624_v63 = vmul.f32 0.01, %v602_v59  ;;  %v631_v1 = vmax.f32 %v599_v54, %v623_v58 }
 0x336   :  { %v622_v0 = vmul.f32 0.01, %v594_v62  ;;  %v629_v3 = vmax.f32 %v591_v56, %v621_v61 }
 0x337   :  { %v632_v2 = vmax.f32 %v602_v59, %v624_v63 }
 0x338   :  { %v630_v4 = vmax.f32 %v594_v62, %v622_v0  ;;  %v2546_v5 = vpop.f32.mrb[12].mxu0  ;;  %v2819_v0 = vld [vmem:[#allocation5 + $0x8] sm:$0xff]  }
 0x339   :  { %v638_v7 = vpack.c.bf16 %v632_v2, %v631_v1  ;;  %v615_v8 = vadd.f32 %v2546_v5, %v3299_v52  ;;  %v606_v9 = vpop.f32.mrb[13].mxu0 }
 0x33a   :  { %v607_v10 = vadd.f32 %v3299_v52, %v606_v9  ;;  %v2547_v11 = vpop.f32.mrb[14].mxu0  ;;  %v637_v12 = vpack.c.bf16 %v630_v4, %v629_v3 }
 0x33b   :  { %v627_v13 = vmul.f32 0.01, %v615_v8  ;;  %v618_v14 = vadd.f32 %v2547_v11, %v3299_v52  ;;  %v609_v15 = vpop.f32.mrb[15].mxu0 }
 0x33c   :  { %v625_v16 = vmul.f32 0.01, %v607_v10  ;;  %v610_v17 = vadd.f32 %v3299_v52, %v609_v15  ;;  %2564 = vmatprep.mubr.bf16.mxu1 %v637_v12  ;;  %v2822_v15 = vld [vmem:[#allocation5 + $0x20] sm:$0xff]  }
 0x33d   :  { %v635_v18 = vmax.f32 %v615_v8, %v627_v13  ;;  %v628_v19 = vmul.f32 0.01, %v618_v14  ;;  %2565 = vmatmul.mubr.bf16.vlgmr.msra.gmra.mrb[8].mxu1 %v638_v7  ;;  %v2820_v8 = vld [vmem:[#allocation5 + $0x10] sm:$0xff]   ;;  %v2826_v13 = vld [vmem:[#allocation2 + $0x20] sm:$0xff]  }
 0x33e   :  { %v626_v20 = vmul.f32 0.01, %v610_v17  ;;  %v633_v22 = vmax.f32 %v607_v10, %v625_v16  ;;  %2597 = vmatpush3.bf16.msra.mxu1 %v2830_v31  ;;  %v2823_v16 = vld [vmem:[#allocation5 + $0x28] sm:$0xff]  }
 0x33f   :  { %v636_v21 = vmax.f32 %v618_v14, %v628_v19  ;;  %2598 = vmatprep.subr.bf16.mxu1 %v2831_v32  ;;  %v2821_v14 = vld [vmem:[#allocation5 + $0x18] sm:$0xff]   ;;  %v2827_v19 = vld [vmem:[#allocation2 + $0x28] sm:$0xff]  }
 0x340   :  { %v634_v23 = vmax.f32 %v610_v17, %v626_v20  ;;  %v2824_v17 = vld [vmem:[#allocation5 + $0x30] sm:$0xff]  }
 0x341   :  { %v640_v24 = vpack.c.bf16 %v636_v21, %v635_v18  ;;  %v2825_v18 = vld [vmem:[#allocation5 + $0x38] sm:$0xff]   ;;  %v2828_v20 = vld [vmem:[#allocation2 + $0x30] sm:$0xff]  }
 0x342   :  { %v639_v26 = vpack.c.bf16 %v634_v23, %v633_v22  ;;  %2599 = vmatpush3.bf16.msra.mxu1 %v2831_v32  ;;  %v2829_v21 = vld [vmem:[#allocation2 + $0x38] sm:$0xff]   ;;  %v2835_v22 = vld [vmem:[#allocation13 + $0x28] sm:$0xff]   ;;  %v2836_v23 = vld [vmem:[#allocation13 + $0x30] sm:$0xff]  }
 0x343   :  { %2600 = vmatprep.subr.bf16.mxu1 %v2832_v33 }
 0x344   :  { %2568 = vmatprep.mubr.bf16.mxu1 %v639_v26  ;;  %v2838_v26 = vld [vmem:[#allocation7] sm:$0xff]  }
 0x345   :  { %2569 = vmatmul.mubr.bf16.gmra.mrb[12].mxu1 %v640_v24  ;;  %v2837_v24 = vld [vmem:[#allocation13 + $0x38] sm:$0xff]  }
 0x346   :  { %2601 = vmatpush3.bf16.msra.mxu1 %v2832_v33 }
 0x347   :  { %2602 = vmatprep.subr.bf16.mxu1 %v2833_v34 }
 0x34a   :  { %2603 = vmatpush3.bf16.msra.mxu1 %v2833_v34 }
 0x34b   :  { %2604 = vmatprep.subr.bf16.mxu1 %v2834_v35 }
 0x34e   :  { %2605 = vmatpush3.bf16.msra.mxu1 %v2834_v35 }
 0x34f   :  { %2606 = vmatprep.subr.bf16.mxu1 %v2835_v22 }
 0x352   :  { %2607 = vmatpush3.bf16.msra.mxu1 %v2835_v22 }
 0x353   :  { %2608 = vmatprep.subr.bf16.mxu1 %v2836_v23 }
 0x356   :  { %2609 = vmatpush3.bf16.msra.mxu1 %v2836_v23 }
 0x357   :  { %2610 = vmatprep.subr.bf16.mxu1 %v2837_v24 }
 0x35a   :  { %2611 = vmatpush3.bf16.msra.mxu1 %v2837_v24 }
 0x35b   :  { %2644 = vmatprep.subr.bf16.mxu1 %v2838_v26 }
 0x410   :  { %v2566_v37 = vpop.f32.mrb[8].mxu1 }
 0x411   :  { %v755_v38 = vadd.f32 %v2566_v37, %v3312_v36  ;;  %v746_v39 = vpop.f32.mrb[9].mxu1 }
 0x412   :  { %v747_v40 = vadd.f32 %v3312_v36, %v746_v39  ;;  %v2567_v41 = vpop.f32.mrb[10].mxu1 }
 0x413   :  { %v779_v42 = vmul.f32 0.01, %v755_v38  ;;  %v758_v43 = vadd.f32 %v2567_v41, %v3312_v36  ;;  %v749_v44 = vpop.f32.mrb[11].mxu1 }
 0x414   :  { %v777_v45 = vmul.f32 0.01, %v747_v40  ;;  %v750_v46 = vadd.f32 %v3312_v36, %v749_v44 }
 0x415   :  { %v780_v47 = vmul.f32 0.01, %v758_v43  ;;  %v787_v49 = vmax.f32 %v755_v38, %v779_v42 }
 0x416   :  { %v778_v48 = vmul.f32 0.01, %v750_v46  ;;  %v785_v51 = vmax.f32 %v747_v40, %v777_v45 }
 0x417   :  { %v788_v50 = vmax.f32 %v758_v43, %v780_v47 }
 0x418   :  { %v786_v53 = vmax.f32 %v750_v46, %v778_v48  ;;  %v2570_v54 = vpop.f32.mrb[12].mxu1 }
 0x419   :  { %v794_v55 = vpack.c.bf16 %v788_v50, %v787_v49  ;;  %v771_v56 = vadd.f32 %v2570_v54, %v3312_v36  ;;  %v762_v57 = vpop.f32.mrb[13].mxu1 }
 0x41a   :  { %v763_v58 = vadd.f32 %v3312_v36, %v762_v57  ;;  %v2571_v59 = vpop.f32.mrb[14].mxu1  ;;  %v793_v60 = vpack.c.bf16 %v786_v53, %v785_v51 }
 0x41b   :  { %v783_v61 = vmul.f32 0.01, %v771_v56  ;;  %v774_v62 = vadd.f32 %v2571_v59, %v3312_v36  ;;  %v765_v63 = vpop.f32.mrb[15].mxu1 }
 0x41c   :  { %v781_v1 = vmul.f32 0.01, %v763_v58  ;;  %v766_v2 = vadd.f32 %v3312_v36, %v765_v63  ;;  %2588 = vmatprep.mubr.bf16.mxu0 %v793_v60  ;;  %v2840_v63 = vld [vmem:[#allocation7 + $0x10] sm:$0xff]  }
 0x41d   :  { %v784_v3 = vmul.f32 0.01, %v774_v62  ;;  %2589 = vmatmul.mubr.bf16.vlgmr.msra.gmra.mrb[16].mxu0 %v794_v55  ;;  %v791_v5 = vmax.f32 %v771_v56, %v783_v61  ;;  %v2839_v56 = vld [vmem:[#allocation7 + $0x8] sm:$0xff]  }
 0x41e   :  { %v782_v4 = vmul.f32 0.01, %v766_v2  ;;  %2621 = vmatpush3.bf16.msra.mxu0 %v2818_v30  ;;  %v789_v9 = vmax.f32 %v763_v58, %v781_v1 }
 0x41f   :  { %v792_v7 = vmax.f32 %v774_v62, %v784_v3  ;;  %2622 = vmatprep.subr.bf16.mxu0 %v2819_v0 }
 0x420   :  { %v790_v10 = vmax.f32 %v766_v2, %v782_v4  ;;  %v2841_v4 = vld [vmem:[#allocation7 + $0x18] sm:$0xff]  }
 0x421   :  { %v796_v11 = vpack.c.bf16 %v792_v7, %v791_v5  ;;  %v2842_v5 = vld [vmem:[#allocation7 + $0x20] sm:$0xff]   ;;  %v2843_v7 = vld [vmem:[#allocation7 + $0x28] sm:$0xff]  }
 0x422   :  { %2623 = vmatpush3.bf16.msra.mxu0 %v2819_v0  ;;  %v795_v12 = vpack.c.bf16 %v790_v10, %v789_v9 }
 0x423   :  { %2624 = vmatprep.subr.bf16.mxu0 %v2820_v8 }
 0x424   :  { %2592 = vmatprep.mubr.bf16.mxu0 %v795_v12 }
 0x425   :  { %2593 = vmatmul.mubr.bf16.gmra.mrb[20].mxu0 %v796_v11 }
 0x426   :  { %2625 = vmatpush3.bf16.msra.mxu0 %v2820_v8  ;;  %2636 = vmatprep.mubr.bf16.mxu0 %v2826_v13  ;;  %v2844_v8 = vld [vmem:[#allocation7 + $0x30] sm:$0xff]  }
 0x427   :  { %2626 = vmatprep.subr.bf16.mxu0 %v2821_v14 }
 0x42a   :  { %2627 = vmatpush3.bf16.msra.mxu0 %v2821_v14 }
 0x42b   :  { %2628 = vmatprep.subr.bf16.mxu0 %v2822_v15 }
 0x42e   :  { %2629 = vmatpush3.bf16.msra.mxu0 %v2822_v15 }
 0x42f   :  { %2630 = vmatprep.subr.bf16.mxu0 %v2823_v16 }
 0x432   :  { %2631 = vmatpush3.bf16.msra.mxu0 %v2823_v16 }
 0x433   :  { %2632 = vmatprep.subr.bf16.mxu0 %v2824_v17 }
 0x436   :  { %2633 = vmatpush3.bf16.msra.mxu0 %v2824_v17  ;;  %v2845_v17 = vld [vmem:[#allocation7 + $0x38] sm:$0xff]  }
 0x437   :  { %2634 = vmatprep.subr.bf16.mxu0 %v2825_v18 }
 0x43a   :  { %2635 = vmatpush3.bf16.msra.mxu0 %v2825_v18 }
 0x43d   :  { %2637 = vmatmul.mubr.bf16.vlgmr.msra.gmra.mrb[24].mxu0 %v2827_v19 }
 0x43e   :  { %2640 = vmatprep.mubr.bf16.mxu0 %v2828_v20 }
 0x445   :  { %2641 = vmatmul.mubr.bf16.gmra.mrb[28].mxu0 %v2829_v21 }
 0x4f0   :  { %v2590_v28 = vpop.f32.mrb[16].mxu0 }
 0x4f1   :  { %v911_v29 = vadd.f32 %v2590_v28, %v3325_v27  ;;  %v902_v30 = vpop.f32.mrb[17].mxu0 }
 0x4f2   :  { %v903_v31 = vadd.f32 %v3325_v27, %v902_v30  ;;  %v2591_v32 = vpop.f32.mrb[18].mxu0 }
 0x4f3   :  { %v935_v33 = vmul.f32 0.01, %v911_v29  ;;  %v914_v34 = vadd.f32 %v2591_v32, %v3325_v27  ;;  %v905_v35 = vpop.f32.mrb[19].mxu0 }
 0x4f4   :  { %v933_v37 = vmul.f32 0.01, %v903_v31  ;;  %v906_v38 = vadd.f32 %v3325_v27, %v905_v35 }
 0x4f5   :  { %v936_v39 = vmul.f32 0.01, %v914_v34  ;;  %v943_v41 = vmax.f32 %v911_v29, %v935_v33 }
 0x4f6   :  { %v934_v40 = vmul.f32 0.01, %v906_v38  ;;  %v941_v43 = vmax.f32 %v903_v31, %v933_v37 }
 0x4f7   :  { %v944_v42 = vmax.f32 %v914_v34, %v936_v39 }
 0x4f8   :  { %v942_v44 = vmax.f32 %v906_v38, %v934_v40  ;;  %v2594_v45 = vpop.f32.mrb[20].mxu0 }
 0x4f9   :  { %v950_v46 = vpack.c.bf16 %v944_v42, %v943_v41  ;;  %v927_v47 = vadd.f32 %v2594_v45, %v3325_v27  ;;  %v918_v48 = vpop.f32.mrb[21].mxu0 }
 0x4fa   :  { %v919_v49 = vadd.f32 %v3325_v27, %v918_v48  ;;  %v2595_v50 = vpop.f32.mrb[22].mxu0  ;;  %v949_v51 = vpack.c.bf16 %v942_v44, %v941_v43 }
 0x4fb   :  { %v939_v53 = vmul.f32 0.01, %v927_v47  ;;  %v930_v54 = vadd.f32 %v2595_v50, %v3325_v27  ;;  %v921_v55 = vpop.f32.mrb[23].mxu0  ;;  %v2847_v50 = vld [vmem:[#allocation8 + $0x8] sm:$0xff]  }
 0x4fc   :  { %v937_v57 = vmul.f32 0.01, %v919_v49  ;;  %v922_v58 = vadd.f32 %v3325_v27, %v921_v55  ;;  %2612 = vmatprep.mubr.bf16.mxu1 %v949_v51  ;;  %v2848_v51 = vld [vmem:[#allocation8 + $0x10] sm:$0xff]  }
 0x4fd   :  { %v940_v59 = vmul.f32 0.01, %v930_v54  ;;  %2613 = vmatmul.mubr.bf16.vlgmr.msra.gmra.mrb[16].mxu1 %v950_v46  ;;  %v947_v61 = vmax.f32 %v927_v47, %v939_v53  ;;  %v2850_v53 = vld [vmem:[#allocation8 + $0x20] sm:$0xff]   ;;  %v2852_v55 = vld [vmem:[#allocation8 + $0x30] sm:$0xff]  }
 0x4fe   :  { %v938_v60 = vmul.f32 0.01, %v922_v58  ;;  %2645 = vmatpush3.bf16.msra.mxu1 %v2838_v26  ;;  %v945_v0 = vmax.f32 %v919_v49, %v937_v57  ;;  %v2846_v49 = vld [vmem:[#allocation8] sm:$0xff]  }
 0x4ff   :  { %v948_v62 = vmax.f32 %v930_v54, %v940_v59  ;;  %2646 = vmatprep.subr.bf16.mxu1 %v2839_v56  ;;  %2668 = vmatprep.subr.bf16.mxu0 %v2846_v49  ;;  %v2851_v54 = vld [vmem:[#allocation8 + $0x28] sm:$0xff]   ;;  %v2854_v57 = vld [vmem:[#allocation10] sm:$0xff]   ;;  %v2856_v59 = vld [vmem:[#allocation10 + $0x10] sm:$0xff]  }
 0x500   :  { %v946_v1 = vmax.f32 %v922_v58, %v938_v60  ;;  %2669 = vmatpush3.bf16.msra.mxu0 %v2846_v49  ;;  %v2855_v58 = vld [vmem:[#allocation10 + $0x8] sm:$0xff]   ;;  %v2857_v60 = vld [vmem:[#allocation10 + $0x18] sm:$0xff]  }
 0x501   :  { %v952_v2 = vpack.c.bf16 %v948_v62, %v947_v61  ;;  %2670 = vmatprep.subr.bf16.mxu0 %v2847_v50  ;;  %v2858_v61 = vld [vmem:[#allocation10 + $0x20] sm:$0xff]  }
 0x502   :  { %2647 = vmatpush3.bf16.msra.mxu1 %v2839_v56  ;;  %v951_v3 = vpack.c.bf16 %v946_v1, %v945_v0  ;;  %v2853_v56 = vld [vmem:[#allocation8 + $0x38] sm:$0xff]  }
 0x503   :  { %2648 = vmatprep.subr.bf16.mxu1 %v2840_v63 }
 0x504   :  { %2616 = vmatprep.mubr.bf16.mxu1 %v951_v3  ;;  %2671 = vmatpush3.bf16.msra.mxu0 %v2847_v50 }
 0x505   :  { %2617 = vmatmul.mubr.bf16.gmra.mrb[20].mxu1 %v952_v2  ;;  %2672 = vmatprep.subr.bf16.mxu0 %v2848_v51 }
 0x506   :  { %2649 = vmatpush3.bf16.msra.mxu1 %v2840_v63  ;;  %v3346_v63 = vld [vmem:[%s3423_s12] ss:$0 sm:$0xff]  ;;  %s3073_s12 = smov [#allocation14]  }
 0x507   :  { %2650 = vmatprep.subr.bf16.mxu1 %v2841_v4  ;;  %s2122_s5 = sshll.u32 %s3073_s12, 4  ;;  %s2123_s5 = int_to_ptr.vmem [resolvable:$true] %s2122_s5 }
 0x508   :  { %2673 = vmatpush3.bf16.msra.mxu0 %v2848_v51  ;;  %s3032_s3 = scalar_lea.vmem %s2123_s5, 1024  ;;  %p3037_p1 = scmp.lt.s32.totalorder %s2123_s5, %s2123_s5 }
 0x509   :  { %p3033_p0 = scmp.ne.s32.totalorder %s2123_s5, %s3032_s3  ;;  %p3038_p2 = scmp.lt.s32.totalorder %s3032_s3, %s3032_s3 }
 0x50a   :  { %2651 = vmatpush3.bf16.msra.mxu1 %v2841_v4 }
 0x50b   :  { %2652 = vmatprep.subr.bf16.mxu1 %v2842_v5  ;;  %p3039_p3 = por %p3038_p2, %p3037_p1 }
 0x50d   :  { %p3040_p4 = pnand %p3039_p3, %p3033_p0 }
 0x50e   :  { %2653 = vmatpush3.bf16.msra.mxu1 %v2842_v5 }
 0x50f   :  { %2654 = vmatprep.subr.bf16.mxu1 %v2843_v7 }
 0x510   :  { %v2638_v9 = vpop.f32.mrb[24].mxu0 }
 0x511   :  { %v1275_v10 = vadd.f32 %v2638_v9, %v3273_v25  ;;  %v1266_v11 = vpop.f32.mrb[25].mxu0 }
 0x512   :  { %v1267_v12 = vadd.f32 %v3273_v25, %v1266_v11  ;;  %v2639_v13 = vpop.f32.mrb[26].mxu0  ;;  %2655 = vmatpush3.bf16.msra.mxu1 %v2843_v7 }
 0x513   :  { %v1299_v14 = vmul.f32 0.01, %v1275_v10  ;;  %v1278_v15 = vadd.f32 %v2639_v13, %v3273_v25  ;;  %v1269_v16 = vpop.f32.mrb[27].mxu0  ;;  %2656 = vmatprep.subr.bf16.mxu1 %v2844_v8 }
 0x514   :  { %v1297_v18 = vmul.f32 0.01, %v1267_v12  ;;  %v1270_v19 = vadd.f32 %v3273_v25, %v1269_v16 }
 0x515   :  { %v1300_v20 = vmul.f32 0.01, %v1278_v15  ;;  %v1307_v22 = vmax.f32 %v1275_v10, %v1299_v14 }
 0x516   :  { %v1298_v21 = vmul.f32 0.01, %v1270_v19  ;;  %2657 = vmatpush3.bf16.msra.mxu1 %v2844_v8  ;;  %v1305_v24 = vmax.f32 %v1267_v12, %v1297_v18 }
 0x517   :  { %v1308_v23 = vmax.f32 %v1278_v15, %v1300_v20  ;;  %2658 = vmatprep.subr.bf16.mxu1 %v2845_v17 }
 0x518   :  { %v1306_v26 = vmax.f32 %v1270_v19, %v1298_v21  ;;  %v2642_v28 = vpop.f32.mrb[28].mxu0 }
 0x519   :  { %v1314_v29 = vpack.c.bf16 %v1308_v23, %v1307_v22  ;;  %v1291_v30 = vadd.f32 %v2642_v28, %v3273_v25  ;;  %v1282_v31 = vpop.f32.mrb[29].mxu0 }
 0x51a   :  { %v1283_v32 = vadd.f32 %v3273_v25, %v1282_v31  ;;  %v2643_v33 = vpop.f32.mrb[30].mxu0  ;;  %2659 = vmatpush3.bf16.msra.mxu1 %v2845_v17  ;;  %v1313_v34 = vpack.c.bf16 %v1306_v26, %v1305_v24 }
 0x51b   :  { %v1303_v35 = vmul.f32 0.01, %v1291_v30  ;;  %v1294_v37 = vadd.f32 %v2643_v33, %v3273_v25  ;;  %v1285_v38 = vpop.f32.mrb[31].mxu0  ;;  %2692 = vmatprep.subr.bf16.mxu1 %v2854_v57 }
 0x51c   :  { %v1301_v39 = vmul.f32 0.01, %v1283_v32  ;;  %v1286_v40 = vadd.f32 %v3273_v25, %v1285_v38  ;;  %2660 = vmatprep.mubr.bf16.mxu1 %v1313_v34  ;;  %v2849_v25 = vld [vmem:[#allocation8 + $0x18] sm:$0xff]  }
 0x51d   :  { %v1304_v41 = vmul.f32 0.01, %v1294_v37  ;;  %2661 = vmatmul.mubr.bf16.vlgmr.msra.gmra.mrb[24].mxu1 %v1314_v29  ;;  %v1311_v43 = vmax.f32 %v1291_v30, %v1303_v35  ;;  %2674 = vmatprep.subr.bf16.mxu0 %v2849_v25 }
 0x51e   :  { %v1302_v42 = vmul.f32 0.01, %v1286_v40  ;;  %v1309_v45 = vmax.f32 %v1283_v32, %v1301_v39  ;;  %2675 = vmatpush3.bf16.msra.mxu0 %v2849_v25  ;;  %2693 = vmatpush3.bf16.msra.mxu1 %v2854_v57 }
 0x51f   :  { %v1312_v44 = vmax.f32 %v1294_v37, %v1304_v41  ;;  %2676 = vmatprep.subr.bf16.mxu0 %v2850_v53  ;;  %2694 = vmatprep.subr.bf16.mxu1 %v2855_v58 }
 0x520   :  { %v1310_v46 = vmax.f32 %v1286_v40, %v1302_v42 }
 0x521   :  { %v1316_v47 = vpack.c.bf16 %v1312_v44, %v1311_v43 }
 0x522   :  { %v1315_v48 = vpack.c.bf16 %v1310_v46, %v1309_v45  ;;  %2677 = vmatpush3.bf16.msra.mxu0 %v2850_v53  ;;  %2695 = vmatpush3.bf16.msra.mxu1 %v2855_v58 }
 0x523   :  { %2678 = vmatprep.subr.bf16.mxu0 %v2851_v54  ;;  %2696 = vmatprep.subr.bf16.mxu1 %v2856_v59 }
 0x524   :  { %2664 = vmatprep.mubr.bf16.mxu1 %v1315_v48 }
 0x525   :  { %2665 = vmatmul.mubr.bf16.gmra.mrb[28].mxu1 %v1316_v47 }
 0x526   :  { %2679 = vmatpush3.bf16.msra.mxu0 %v2851_v54  ;;  %2697 = vmatpush3.bf16.msra.mxu1 %v2856_v59  ;;  %v2859_v59 = vld [vmem:[#allocation10 + $0x28] sm:$0xff]  }
 0x527   :  { %2680 = vmatprep.subr.bf16.mxu0 %v2852_v55  ;;  %2698 = vmatprep.subr.bf16.mxu1 %v2857_v60 }
 0x52a   :  { %2681 = vmatpush3.bf16.msra.mxu0 %v2852_v55  ;;  %2699 = vmatpush3.bf16.msra.mxu1 %v2857_v60  ;;  %v2860_v60 = vld [vmem:[#allocation10 + $0x30] sm:$0xff]  }
 0x52b   :  { %2682 = vmatprep.subr.bf16.mxu0 %v2853_v56  ;;  %2700 = vmatprep.subr.bf16.mxu1 %v2858_v61 }
 0x52e   :  { %2683 = vmatpush3.bf16.msra.mxu0 %v2853_v56  ;;  %2701 = vmatpush3.bf16.msra.mxu1 %v2858_v61  ;;  %v2861_v61 = vld [vmem:[#allocation10 + $0x38] sm:$0xff]  }
 0x52f   :  { %2702 = vmatprep.subr.bf16.mxu1 %v2859_v59 }
 0x532   :  { %2703 = vmatpush3.bf16.msra.mxu1 %v2859_v59 }
 0x533   :  { %2704 = vmatprep.subr.bf16.mxu1 %v2860_v60 }
 0x536   :  { %2705 = vmatpush3.bf16.msra.mxu1 %v2860_v60 }
 0x537   :  { %2706 = vmatprep.subr.bf16.mxu1 %v2861_v61 }
 0x53a   :  { %2707 = vmatpush3.bf16.msra.mxu1 %v2861_v61 }
 0x5d0   :  { %v2614_v62 = vpop.f32.mrb[16].mxu1 }
 0x5d1   :  { %v1058_v0 = vpop.f32.mrb[17].mxu1  ;;  %v1067_v2 = vadd.f32 %v2614_v62, %v3346_v63  ;;  %v2863_v62 = vld [vmem:[#allocation11 + $0x8] sm:$0xff]  }
 0x5d2   :  { %v2615_v1 = vpop.f32.mrb[18].mxu1  ;;  %v1059_v5 = vadd.f32 %v3346_v63, %v1058_v0  ;;  %v2864_v0 = vld [vmem:[#allocation11 + $0x10] sm:$0xff]  }
 0x5d3   :  { %v1070_v3 = vadd.f32 %v2615_v1, %v3346_v63  ;;  %v1061_v4 = vpop.f32.mrb[19].mxu1  ;;  %v2865_v1 = vld [vmem:[#allocation11 + $0x18] sm:$0xff]  }
 0x5d4   :  { %v1062_v7 = vadd.f32 %v3346_v63, %v1061_v4 }
 0x5d5   :  { %v2293_v8 = vpack.c.bf16 %v1070_v3, %v1067_v2  ;;  %v2866_v2 = vld [vmem:[#allocation11 + $0x20] sm:$0xff]  }
 0x5d6   :  { %v2288_v9 = vpack.c.bf16 %v1062_v7, %v1059_v5 }
 0x5d7   :  { %2325 = vst [vmem:[#allocation14 + $0x8] sm:$0xff] %v2293_v8  }
 0x5d8   :  { %2289 = vst [vmem:[#allocation14] sm:$0xff] %v2288_v9   ;;  %v2618_v10 = vpop.f32.mrb[20].mxu1 }
 0x5d9   :  { %v1074_v11 = vpop.f32.mrb[21].mxu1  ;;  %v1083_v13 = vadd.f32 %v2618_v10, %v3346_v63 }
 0x5da   :  { %v2619_v12 = vpop.f32.mrb[22].mxu1  ;;  %v1075_v16 = vadd.f32 %v3346_v63, %v1074_v11 }
 0x5db   :  { %v1086_v14 = vadd.f32 %v2619_v12, %v3346_v63  ;;  %v1077_v15 = vpop.f32.mrb[23].mxu1 }
 0x5dc   :  { %v1078_v17 = vadd.f32 %v3346_v63, %v1077_v15 }
 0x5dd   :  { %v2303_v18 = vpack.c.bf16 %v1086_v14, %v1083_v13 }
 0x5de   :  { %v2298_v19 = vpack.c.bf16 %v1078_v17, %v1075_v16 }
 0x5df   :  { %2327 = vst [vmem:[#allocation14 + $0x18] sm:$0xff] %v2303_v18  }
 0x5e0   :  { %2326 = vst [vmem:[#allocation14 + $0x10] sm:$0xff] %v2298_v19  }
 0x5f0   :  { %v2662_v20 = vpop.f32.mrb[24].mxu1 }
 0x5f1   :  { %v1431_v21 = vadd.f32 %v2662_v20, %v3286_v6  ;;  %v1422_v22 = vpop.f32.mrb[25].mxu1 }
 0x5f2   :  { %v1423_v23 = vadd.f32 %v3286_v6, %v1422_v22  ;;  %v2663_v24 = vpop.f32.mrb[26].mxu1 }
 0x5f3   :  { %v1455_v26 = vmul.f32 0.01, %v1431_v21  ;;  %v1434_v28 = vadd.f32 %v2663_v24, %v3286_v6  ;;  %v1425_v29 = vpop.f32.mrb[27].mxu1 }
 0x5f4   :  { %v1453_v30 = vmul.f32 0.01, %v1423_v23  ;;  %v1426_v31 = vadd.f32 %v3286_v6, %v1425_v29 }
 0x5f5   :  { %v1456_v32 = vmul.f32 0.01, %v1434_v28  ;;  %v1463_v34 = vmax.f32 %v1431_v21, %v1455_v26 }
 0x5f6   :  { %v1454_v33 = vmul.f32 0.01, %v1426_v31  ;;  %v1461_v37 = vmax.f32 %v1423_v23, %v1453_v30 }
 0x5f7   :  { %v1464_v35 = vmax.f32 %v1434_v28, %v1456_v32 }
 0x5f8   :  { %v1462_v38 = vmax.f32 %v1426_v31, %v1454_v33  ;;  %v2666_v39 = vpop.f32.mrb[28].mxu1 }
 0x5f9   :  { %v1470_v40 = vpack.c.bf16 %v1464_v35, %v1463_v34  ;;  %v1447_v41 = vadd.f32 %v2666_v39, %v3286_v6  ;;  %v1438_v42 = vpop.f32.mrb[29].mxu1 }
 0x5fa   :  { %v1439_v43 = vadd.f32 %v3286_v6, %v1438_v42  ;;  %v2667_v44 = vpop.f32.mrb[30].mxu1  ;;  %v1469_v45 = vpack.c.bf16 %v1462_v38, %v1461_v37 }
 0x5fb   :  { %v1459_v46 = vmul.f32 0.01, %v1447_v41  ;;  %v1450_v47 = vadd.f32 %v2667_v44, %v3286_v6  ;;  %v1441_v48 = vpop.f32.mrb[31].mxu1  ;;  %v2868_v44 = vld [vmem:[#allocation11 + $0x30] sm:$0xff]  }
 0x5fc   :  { %v1457_v49 = vmul.f32 0.01, %v1439_v43  ;;  %v1442_v50 = vadd.f32 %v3286_v6, %v1441_v48  ;;  %2684 = vmatprep.mubr.bf16.mxu0 %v1469_v45  ;;  %v2862_v6 = vld [vmem:[#allocation11] sm:$0xff]   ;;  %v2869_v45 = vld [vmem:[#allocation11 + $0x38] sm:$0xff]  }
 0x5fd   :  { %v1460_v51 = vmul.f32 0.01, %v1450_v47  ;;  %2685 = vmatmul.mubr.bf16.vlgmr.msra.gmra.mrb[32].mxu0 %v1470_v40  ;;  %v1467_v53 = vmax.f32 %v1447_v41, %v1459_v46  ;;  %2716 = vmatprep.subr.bf16.mxu0 %v2862_v6  ;;  %v2871_v46 = vld [vmem:[#allocation13 + $0x8] sm:$0xff]   ;;  %v2873_v48 = vld [vmem:[#allocation13 + $0x18] sm:$0xff]  }
 0x5fe   :  { %v1458_v25 = vmul.f32 0.01, %v1442_v50  ;;  %v1465_v55 = vmax.f32 %v1439_v43, %v1457_v49  ;;  %2717 = vmatpush3.bf16.msra.mxu0 %v2862_v6  ;;  %v2867_v43 = vld [vmem:[#allocation11 + $0x28] sm:$0xff]   ;;  %v2874_v49 = vld [vmem:[#allocation13 + $0x20] sm:$0xff]  }
 0x5ff   :  { %v1468_v54 = vmax.f32 %v1450_v47, %v1460_v51  ;;  %2718 = vmatprep.subr.bf16.mxu0 %v2863_v62  ;;  %v2872_v47 = vld [vmem:[#allocation13 + $0x10] sm:$0xff]  }
 0x600   :  { %v1466_v56 = vmax.f32 %v1442_v50, %v1458_v25 }
 0x601   :  { %v1472_v57 = vpack.c.bf16 %v1468_v54, %v1467_v53 }
 0x602   :  { %v1471_v58 = vpack.c.bf16 %v1466_v56, %v1465_v55  ;;  %2719 = vmatpush3.bf16.msra.mxu0 %v2863_v62 }
 0x603   :  { %2720 = vmatprep.subr.bf16.mxu0 %v2864_v0 }
 0x604   :  { %2688 = vmatprep.mubr.bf16.mxu0 %v1471_v58 }
 0x605   :  { %2689 = vmatmul.mubr.bf16.gmra.mrb[36].mxu0 %v1472_v57 }
 0x606   :  { %2721 = vmatpush3.bf16.msra.mxu0 %v2864_v0 }
 0x607   :  { %2722 = vmatprep.subr.bf16.mxu0 %v2865_v1 }
 0x60a   :  { %2723 = vmatpush3.bf16.msra.mxu0 %v2865_v1 }
 0x60b   :  { %2724 = vmatprep.subr.bf16.mxu0 %v2866_v2 }
 0x60e   :  { %2725 = vmatpush3.bf16.msra.mxu0 %v2866_v2 }
 0x60f   :  { %2726 = vmatprep.subr.bf16.mxu0 %v2867_v43 }
 0x612   :  { %2727 = vmatpush3.bf16.msra.mxu0 %v2867_v43 }
 0x613   :  { %2728 = vmatprep.subr.bf16.mxu0 %v2868_v44 }
 0x616   :  { %2729 = vmatpush3.bf16.msra.mxu0 %v2868_v44 }
 0x617   :  { %2730 = vmatprep.subr.bf16.mxu0 %v2869_v45 }
 0x61a   :  { %2731 = vmatpush3.bf16.msra.mxu0 %v2869_v45 }
 0x6d0   :  { %v2686_v3 = vpop.f32.mrb[32].mxu0 }
 0x6d1   :  { %v1587_v4 = vadd.f32 %v2686_v3, %v3299_v52  ;;  %v1578_v5 = vpop.f32.mrb[33].mxu0 }
 0x6d2   :  { %v1579_v7 = vadd.f32 %v3299_v52, %v1578_v5  ;;  %v2687_v8 = vpop.f32.mrb[34].mxu0 }
 0x6d3   :  { %v1611_v9 = vmul.f32 0.01, %v1587_v4  ;;  %v1590_v10 = vadd.f32 %v2687_v8, %v3299_v52  ;;  %v1581_v11 = vpop.f32.mrb[35].mxu0 }
 0x6d4   :  { %v1609_v12 = vmul.f32 0.01, %v1579_v7  ;;  %v1582_v13 = vadd.f32 %v3299_v52, %v1581_v11 }
 0x6d5   :  { %v1612_v14 = vmul.f32 0.01, %v1590_v10  ;;  %v1619_v16 = vmax.f32 %v1587_v4, %v1611_v9 }
 0x6d6   :  { %v1610_v15 = vmul.f32 0.01, %v1582_v13  ;;  %v1617_v18 = vmax.f32 %v1579_v7, %v1609_v12 }
 0x6d7   :  { %v1620_v17 = vmax.f32 %v1590_v10, %v1612_v14 }
 0x6d8   :  { %v1618_v19 = vmax.f32 %v1582_v13, %v1610_v15  ;;  %v2690_v20 = vpop.f32.mrb[36].mxu0 }
 0x6d9   :  { %v1626_v21 = vpack.c.bf16 %v1620_v17, %v1619_v16  ;;  %v1603_v22 = vadd.f32 %v2690_v20, %v3299_v52  ;;  %v1594_v23 = vpop.f32.mrb[37].mxu0 }
 0x6da   :  { %v1595_v24 = vadd.f32 %v3299_v52, %v1594_v23  ;;  %v2691_v26 = vpop.f32.mrb[38].mxu0  ;;  %v1625_v28 = vpack.c.bf16 %v1618_v19, %v1617_v18  ;;  %v2875_v23 = vld [vmem:[#allocation13 + $0x28] sm:$0xff]  }
 0x6db   :  { %v1615_v29 = vmul.f32 0.01, %v1603_v22  ;;  %v1606_v30 = vadd.f32 %v2691_v26, %v3299_v52  ;;  %v1597_v31 = vpop.f32.mrb[39].mxu0  ;;  %v2877_v26 = vld [vmem:[#allocation13 + $0x38] sm:$0xff]  }
 0x6dc   :  { %v1613_v32 = vmul.f32 0.01, %v1595_v24  ;;  %v1598_v33 = vadd.f32 %v3299_v52, %v1597_v31  ;;  %2708 = vmatprep.mubr.bf16.mxu1 %v1625_v28  ;;  %v2870_v52 = vld [vmem:[#allocation13] sm:$0xff]  }
 0x6dd   :  { %v1616_v34 = vmul.f32 0.01, %v1606_v30  ;;  %2709 = vmatmul.mubr.bf16.vlgmr.msra.gmra.mrb[32].mxu1 %v1626_v21  ;;  %v1623_v37 = vmax.f32 %v1603_v22, %v1615_v29  ;;  %2740 = vmatprep.subr.bf16.mxu1 %v2870_v52 }
 0x6de   :  { %v1614_v35 = vmul.f32 0.01, %v1598_v33  ;;  %v1621_v39 = vmax.f32 %v1595_v24, %v1613_v32  ;;  %2741 = vmatpush3.bf16.msra.mxu1 %v2870_v52  ;;  %v2876_v24 = vld [vmem:[#allocation13 + $0x30] sm:$0xff]  }
 0x6df   :  { %v1624_v38 = vmax.f32 %v1606_v30, %v1616_v34  ;;  %2742 = vmatprep.subr.bf16.mxu1 %v2871_v46 }
 0x6e0   :  { %v1622_v40 = vmax.f32 %v1598_v33, %v1614_v35 }
 0x6e1   :  { %v1628_v41 = vpack.c.bf16 %v1624_v38, %v1623_v37 }
 0x6e2   :  { %v1627_v42 = vpack.c.bf16 %v1622_v40, %v1621_v39  ;;  %2743 = vmatpush3.bf16.msra.mxu1 %v2871_v46 }
 0x6e3   :  { %2744 = vmatprep.subr.bf16.mxu1 %v2872_v47 }
 0x6e4   :  { %2712 = vmatprep.mubr.bf16.mxu1 %v1627_v42 }
 0x6e5   :  { %2713 = vmatmul.mubr.bf16.gmra.mrb[36].mxu1 %v1628_v41 }
 0x6e6   :  { %2745 = vmatpush3.bf16.msra.mxu1 %v2872_v47 }
 0x6e7   :  { %2746 = vmatprep.subr.bf16.mxu1 %v2873_v48 }
 0x6ea   :  { %2747 = vmatpush3.bf16.msra.mxu1 %v2873_v48 }
 0x6eb   :  { %2748 = vmatprep.subr.bf16.mxu1 %v2874_v49 }
 0x6ee   :  { %2749 = vmatpush3.bf16.msra.mxu1 %v2874_v49 }
 0x6ef   :  { %2750 = vmatprep.subr.bf16.mxu1 %v2875_v23 }
 0x6f2   :  { %2751 = vmatpush3.bf16.msra.mxu1 %v2875_v23 }
 0x6f3   :  { %2752 = vmatprep.subr.bf16.mxu1 %v2876_v24 }
 0x6f6   :  { %2753 = vmatpush3.bf16.msra.mxu1 %v2876_v24 }
 0x6f7   :  { %2754 = vmatprep.subr.bf16.mxu1 %v2877_v26 }
 0x6fa   :  { %2755 = vmatpush3.bf16.msra.mxu1 %v2877_v26 }
 0x7b0   :  { %v2710_v50 = vpop.f32.mrb[32].mxu1 }
 0x7b1   :  { %v1743_v51 = vadd.f32 %v2710_v50, %v3312_v36  ;;  %v1734_v25 = vpop.f32.mrb[33].mxu1 }
 0x7b2   :  { %v1735_v53 = vadd.f32 %v3312_v36, %v1734_v25  ;;  %v2711_v54 = vpop.f32.mrb[34].mxu1 }
 0x7b3   :  { %v1767_v55 = vmul.f32 0.01, %v1743_v51  ;;  %v1746_v56 = vadd.f32 %v2711_v54, %v3312_v36  ;;  %v1737_v57 = vpop.f32.mrb[35].mxu1 }
 0x7b4   :  { %v1765_v58 = vmul.f32 0.01, %v1735_v53  ;;  %v1738_v59 = vadd.f32 %v3312_v36, %v1737_v57 }
 0x7b5   :  { %v1768_v60 = vmul.f32 0.01, %v1746_v56  ;;  %v1775_v6 = vmax.f32 %v1743_v51, %v1767_v55 }
 0x7b6   :  { %v1766_v61 = vmul.f32 0.01, %v1738_v59  ;;  %v1773_v0 = vmax.f32 %v1735_v53, %v1765_v58 }
 0x7b7   :  { %v1776_v62 = vmax.f32 %v1746_v56, %v1768_v60 }
 0x7b8   :  { %v1774_v1 = vmax.f32 %v1738_v59, %v1766_v61  ;;  %v2714_v2 = vpop.f32.mrb[36].mxu1 }
 0x7b9   :  { %v1782_v3 = vpack.c.bf16 %v1776_v62, %v1775_v6  ;;  %v1759_v4 = vadd.f32 %v2714_v2, %v3312_v36  ;;  %v1750_v5 = vpop.f32.mrb[37].mxu1 }
 0x7ba   :  { %v1751_v7 = vadd.f32 %v3312_v36, %v1750_v5  ;;  %v2715_v8 = vpop.f32.mrb[38].mxu1  ;;  %v1781_v9 = vpack.c.bf16 %v1774_v1, %v1773_v0 }
 0x7bb   :  { %v1771_v10 = vmul.f32 0.01, %v1759_v4  ;;  %v1762_v11 = vadd.f32 %v2715_v8, %v3312_v36  ;;  %v1753_v12 = vpop.f32.mrb[39].mxu1 }
 0x7bc   :  { %v1769_v13 = vmul.f32 0.01, %v1751_v7  ;;  %v1754_v14 = vadd.f32 %v3312_v36, %v1753_v12  ;;  %2732 = vmatprep.mubr.bf16.mxu0 %v1781_v9 }
 0x7bd   :  { %v1772_v15 = vmul.f32 0.01, %v1762_v11  ;;  %2733 = vmatmul.mubr.bf16.vlgmr.msra.gmra.mrb[40].mxu0 %v1782_v3  ;;  %v1779_v17 = vmax.f32 %v1759_v4, %v1771_v10 }
 0x7be   :  { %v1770_v16 = vmul.f32 0.01, %v1754_v14  ;;  %v1777_v19 = vmax.f32 %v1751_v7, %v1769_v13 }
 0x7bf   :  { %v1780_v18 = vmax.f32 %v1762_v11, %v1772_v15 }
 0x7c0   :  { %v1778_v20 = vmax.f32 %v1754_v14, %v1770_v16 }
 0x7c1   :  { %v1784_v21 = vpack.c.bf16 %v1780_v18, %v1779_v17 }
 0x7c2   :  { %v1783_v22 = vpack.c.bf16 %v1778_v20, %v1777_v19 }
 0x7c4   :  { %2736 = vmatprep.mubr.bf16.mxu0 %v1783_v22 }
 0x7c5   :  { %2737 = vmatmul.mubr.bf16.gmra.mrb[44].mxu0 %v1784_v21 }
 0x890   :  { %v2734_v36 = vpop.f32.mrb[40].mxu0 }
 0x891   :  { %v1899_v28 = vadd.f32 %v2734_v36, %v3325_v27  ;;  %v1890_v29 = vpop.f32.mrb[41].mxu0 }
 0x892   :  { %v1891_v30 = vadd.f32 %v3325_v27, %v1890_v29  ;;  %v2735_v31 = vpop.f32.mrb[42].mxu0 }
 0x893   :  { %v1923_v32 = vmul.f32 0.01, %v1899_v28  ;;  %v1902_v33 = vadd.f32 %v2735_v31, %v3325_v27  ;;  %v1893_v34 = vpop.f32.mrb[43].mxu0 }
 0x894   :  { %v1921_v35 = vmul.f32 0.01, %v1891_v30  ;;  %v1894_v37 = vadd.f32 %v3325_v27, %v1893_v34 }
 0x895   :  { %v1924_v38 = vmul.f32 0.01, %v1902_v33  ;;  %v1931_v40 = vmax.f32 %v1899_v28, %v1923_v32 }
 0x896   :  { %v1922_v39 = vmul.f32 0.01, %v1894_v37  ;;  %v1929_v42 = vmax.f32 %v1891_v30, %v1921_v35 }
 0x897   :  { %v1932_v41 = vmax.f32 %v1902_v33, %v1924_v38 }
 0x898   :  { %v1930_v43 = vmax.f32 %v1894_v37, %v1922_v39  ;;  %v2738_v44 = vpop.f32.mrb[44].mxu0 }
 0x899   :  { %v1938_v45 = vpack.c.bf16 %v1932_v41, %v1931_v40  ;;  %v1915_v52 = vadd.f32 %v2738_v44, %v3325_v27  ;;  %v1906_v46 = vpop.f32.mrb[45].mxu0 }
 0x89a   :  { %v1907_v47 = vadd.f32 %v3325_v27, %v1906_v46  ;;  %v2739_v48 = vpop.f32.mrb[46].mxu0  ;;  %v1937_v49 = vpack.c.bf16 %v1930_v43, %v1929_v42 }
 0x89b   :  { %v1927_v50 = vmul.f32 0.01, %v1915_v52  ;;  %v1918_v51 = vadd.f32 %v2739_v48, %v3325_v27  ;;  %v1909_v25 = vpop.f32.mrb[47].mxu0 }
 0x89c   :  { %v1925_v53 = vmul.f32 0.01, %v1907_v47  ;;  %v1910_v54 = vadd.f32 %v3325_v27, %v1909_v25  ;;  %2756 = vmatprep.mubr.bf16.mxu1 %v1937_v49 }
 0x89d   :  { %v1928_v55 = vmul.f32 0.01, %v1918_v51  ;;  %2757 = vmatmul.mubr.bf16.vlgmr.msra.gmra.mrb[40].mxu1 %v1938_v45  ;;  %v1935_v57 = vmax.f32 %v1915_v52, %v1927_v50 }
 0x89e   :  { %v1926_v56 = vmul.f32 0.01, %v1910_v54  ;;  %v1933_v59 = vmax.f32 %v1907_v47, %v1925_v53 }
 0x89f   :  { %v1936_v58 = vmax.f32 %v1918_v51, %v1928_v55 }
 0x8a0   :  { %v1934_v60 = vmax.f32 %v1910_v54, %v1926_v56 }
 0x8a1   :  { %v1940_v61 = vpack.c.bf16 %v1936_v58, %v1935_v57 }
 0x8a2   :  { %v1939_v6 = vpack.c.bf16 %v1934_v60, %v1933_v59 }
 0x8a4   :  { %2760 = vmatprep.mubr.bf16.mxu1 %v1939_v6 }
 0x8a5   :  { %2761 = vmatmul.mubr.bf16.gmra.mrb[44].mxu1 %v1940_v61 }
 0x970   :  { %v2758_v62 = vpop.f32.mrb[40].mxu1 }
 0x971   :  { %v2046_v0 = vpop.f32.mrb[41].mxu1  ;;  %v2055_v2 = vadd.f32 %v2758_v62, %v3346_v63 }
 0x972   :  { %v2759_v1 = vpop.f32.mrb[42].mxu1  ;;  %v2047_v4 = vadd.f32 %v3346_v63, %v2046_v0 }
 0x973   :  { %v2058_v3 = vadd.f32 %v2759_v1, %v3346_v63  ;;  %v2049_v27 = vpop.f32.mrb[43].mxu1 }
 0x974   :  { %v2050_v5 = vadd.f32 %v3346_v63, %v2049_v27 }
 0x975   :  { %v2313_v7 = vpack.c.bf16 %v2058_v3, %v2055_v2 }
 0x976   :  { %v2308_v8 = vpack.c.bf16 %v2050_v5, %v2047_v4 }
 0x977   :  { %2329 = vst [vmem:[#allocation14 + $0x28] sm:$0xff] %v2313_v7  }
 0x978   :  { %2328 = vst [vmem:[#allocation14 + $0x20] sm:$0xff] %v2308_v8   ;;  %v2762_v9 = vpop.f32.mrb[44].mxu1 }
 0x979   :  { %v2062_v10 = vpop.f32.mrb[45].mxu1  ;;  %v2071_v12 = vadd.f32 %v2762_v9, %v3346_v63 }
 0x97a   :  { %v2763_v11 = vpop.f32.mrb[46].mxu1  ;;  %v2063_v15 = vadd.f32 %v3346_v63, %v2062_v10 }
 0x97b   :  { %v2074_v13 = vadd.f32 %v2763_v11, %v3346_v63  ;;  %v2065_v14 = vpop.f32.mrb[47].mxu1 }
 0x97c   :  { %v2066_v16 = vadd.f32 %v3346_v63, %v2065_v14 }
 0x97d   :  { %v2323_v17 = vpack.c.bf16 %v2074_v13, %v2071_v12 }
 0x97e   :  { %v2318_v18 = vpack.c.bf16 %v2066_v16, %v2063_v15 }
 0x97f   :  { %2331 = vst [vmem:[#allocation14 + $0x38] sm:$0xff] %v2323_v17  }
 0x980   :  { %2330 = vst [vmem:[#allocation14 + $0x30] sm:$0xff] %v2318_v18  }
 0x981   :  { %3043 = shalt.err (!%p3040_p4)
}
 0x982   :  { %s3044_s15 = scalar_lea.hbm %s3424_s13, 1024 }
 0x983   :  { %p3045_p5 = scmp.ne.s32.totalorder %s3424_s13, %s3044_s15  ;;  %p3048_p6 = scmp.lt.u32.totalorder %s3044_s15, %s3424_s13 }
 0x985   :  { %p3050_p7 = pnand %p3048_p6, %p3045_p5 }
 0x987   :  { %3053 = shalt.err (!%p3050_p7)
}
 0x988   :  { %2128 = dma.vmem_to_hbm [thread:$0]  %s2123_s5, 1024, %s3424_s13, [#allocation4], %s3066_s20, %s3066_s20, %s3067_s21  }
 0x989   :  { %3062 = dma.done.wait [#allocation4], 1024  }
 0x98a   :  { %3063 = vsyncadd [#allocation4], 4294966272 }
 0x98b   :  { %2132 = vsyncpa [#allocation3], 1 }
 0x98c   :  { %2133 = vsyncpa [#allocation6], 1 }
 0x98d   :  { %2134 = vsyncpa [#allocation9], 1 }
 0x98e   :  { %2135 = vsyncpa [#allocation12], 1 }
 0x98f   :  { %2136 = vsyncpa [#allocation4], 1 }

// kernel: tpu_custom_call.1
= control target key start
LH: loop header
LB: loop body
LE: loop exit
PB: predicated region body
PF: predicated region fallthrough
CT: control target
= control target key end

     0   :  { %18 = vsyncpa [#allocation3], 0  ;;  %s3411_s0 = inlined_call_operand.hbm [shape: bf16[128,128], index: 0, kind: input, shape index: {}]   ;;  %s3412_s1 = inlined_call_operand.hbm [shape: bf16[128,128], index: 1, kind: input, shape index: {}]   ;;  %s3413_s2 = inlined_call_operand.vmem [shape: f32[1,128], index: 2, kind: input, shape index: {}]   ;;  %s3414_s3 = inlined_call_operand.hbm [shape: bf16[128,128], index: 3, kind: input, shape index: {}]   ;;  %s3415_s4 = inlined_call_operand.vmem [shape: f32[1,128], index: 4, kind: input, shape index: {}]   ;;  %s3416_s5 = inlined_call_operand.hbm [shape: bf16[128,128], index: 5, kind: input, shape index: {}]   ;;  %s3417_s6 = inlined_call_operand.vmem [shape: f32[1,128], index: 6, kind: input, shape index: {}]   ;;  %s3418_s7 = inlined_call_operand.hbm [shape: bf16[128,128], index: 7, kind: input, shape index: {}]   ;;  %s3419_s8 = inlined_call_operand.vmem [shape: f32[1,128], index: 8, kind: input, shape index: {}]   ;;  %s3420_s9 = inlined_call_operand.hbm [shape: bf16[128,128], index: 9, kind: input, shape index: {}]   ;;  %s3421_s10 = inlined_call_operand.vmem [shape: f32[1,128], index: 10, kind: input, shape index: {}]   ;;  %s3422_s11 = inlined_call_operand.hbm [shape: bf16[128,128], index: 11, kind: input, shape index: {}]   ;;  %s3423_s12 = inlined_call_operand.vmem [shape: f32[1,128], index: 12, kind: input, shape index: {}]   ;;  %s3424_s13 = inlined_call_operand.hbm [shape: bf16[128,128], index: 13, kind: output, shape index: {}]  }
   0x1   :  { %19 = vsyncpa [#allocation6], 0 }
   0x2   :  { %20 = vsyncpa [#allocation9], 0 }
   0x3   :  { %21 = vsyncpa [#allocation12], 0 }
   0x4   :  { %22 = vsyncpa [#allocation4], 0  ;;  %s3064_s25 = smov [#allocation5]   ;;  %s3065_s27 = smov [#allocation8]  }
   0x5   :  { %s40_s26 = sshll.u32 %s3064_s25, 4  ;;  %s68_s28 = sshll.u32 %s3065_s27, 4  ;;  %s41_s26 = int_to_ptr.vmem [resolvable:$true] %s40_s26  ;;  %s3144_s28 = int_to_ptr.vmem [resolvable:$true] %s68_s28 }
   0x6   :  { %s2878_s14 = scalar_lea.hbm %s3412_s1, 1024 }
   0x7   :  { %p2879_p0 = scmp.ne.s32.totalorder %s3412_s1, %s2878_s14  ;;  %p2882_p1 = scmp.lt.u32.totalorder %s2878_s14, %s3412_s1 }
   0x9   :  { %p2884_p2 = pnand %p2882_p1, %p2879_p0 }
   0xb   :  { %2887 = shalt.err (!%p2884_p2)
}
   0xc   :  { %s2888_s19 = scalar_lea.vmem %s41_s26, 1024  ;;  %p2893_p4 = scmp.lt.s32.totalorder %s41_s26, %s41_s26 }
   0xd   :  { %p2889_p3 = scmp.ne.s32.totalorder %s41_s26, %s2888_s19  ;;  %p2894_p5 = scmp.lt.s32.totalorder %s2888_s19, %s2888_s19 }
   0xf   :  { %p2895_p6 = por %p2894_p5, %p2893_p4 }
  0x11   :  { %p2896_p7 = pnand %p2895_p6, %p2889_p3 }
  0x13   :  { %2899 = shalt.err (!%p2896_p7)
}
  0x14   :  { %s3066_s20 = smov 64   ;;  %s3067_s21 = smov 4  }
  0x15   :  { %46 = dma.hbm_to_vmem [thread:$0]  %s3412_s1, 1024, %s41_s26, [#allocation6], %s3066_s20, %s3066_s20, %s3067_s21  }
  0x16   :  { %s2900_s27 = scalar_lea.hbm %s3416_s5, 1024 }
  0x17   :  { %p2901_p8 = scmp.ne.s32.totalorder %s3416_s5, %s2900_s27  ;;  %p2904_p9 = scmp.lt.u32.totalorder %s2900_s27, %s3416_s5 }
  0x19   :  { %p2906_p10 = pnand %p2904_p9, %p2901_p8 }
  0x1b   :  { %2909 = shalt.err (!%p2906_p10)
}
  0x1c   :  { %s2910_s16 = scalar_lea.vmem %s3144_s28, 1024  ;;  %p2915_p12 = scmp.lt.s32.totalorder %s3144_s28, %s3144_s28 }
  0x1d   :  { %p2911_p11 = scmp.ne.s32.totalorder %s3144_s28, %s2910_s16  ;;  %p2916_p13 = scmp.lt.s32.totalorder %s2910_s16, %s2910_s16 }
  0x1f   :  { %p2917_p0 = por %p2916_p13, %p2915_p12 }
  0x21   :  { %p2918_p1 = pnand %p2917_p0, %p2911_p11 }
  0x23   :  { %2921 = shalt.err (!%p2918_p1)
}
  0x24   :  { %74 = dma.hbm_to_vmem [thread:$0]  %s3416_s5, 1024, %s3144_s28, [#allocation9], %s3066_s20, %s3066_s20, %s3067_s21  }
  0x25   :  { %s3068_s17 = smov [#allocation11]   ;;  %s3069_s19 = smov [#allocation2]  }
  0x26   :  { %s96_s18 = sshll.u32 %s3068_s17, 4  ;;  %s28_s22 = sshll.u32 %s3069_s19, 4  ;;  %s97_s18 = int_to_ptr.vmem [resolvable:$true] %s96_s18  ;;  %s3181_s22 = int_to_ptr.vmem [resolvable:$true] %s28_s22 }
  0x27   :  { %s2922_s25 = scalar_lea.hbm %s3420_s9, 1024 }
  0x28   :  { %p2923_p2 = scmp.ne.s32.totalorder %s3420_s9, %s2922_s25  ;;  %p2926_p3 = scmp.lt.u32.totalorder %s2922_s25, %s3420_s9 }
  0x2a   :  { %p2928_p4 = pnand %p2926_p3, %p2923_p2 }
  0x2c   :  { %2931 = shalt.err (!%p2928_p4)
}
  0x2d   :  { %s2932_s5 = scalar_lea.vmem %s97_s18, 1024  ;;  %p2937_p6 = scmp.lt.s32.totalorder %s97_s18, %s97_s18 }
  0x2e   :  { %p2933_p5 = scmp.ne.s32.totalorder %s97_s18, %s2932_s5  ;;  %p2938_p7 = scmp.lt.s32.totalorder %s2932_s5, %s2932_s5 }
  0x30   :  { %p2939_p8 = por %p2938_p7, %p2937_p6 }
  0x32   :  { %p2940_p9 = pnand %p2939_p8, %p2933_p5 }
  0x34   :  { %2943 = shalt.err (!%p2940_p9)
}
  0x35   :  { %102 = dma.hbm_to_vmem [thread:$0]  %s3420_s9, 1024, %s97_s18, [#allocation12], %s3066_s20, %s3066_s20, %s3067_s21  }
  0x36   :  { %s2944_s26 = scalar_lea.hbm %s3411_s0, 1024 }
  0x37   :  { %p2945_p10 = scmp.ne.s32.totalorder %s3411_s0, %s2944_s26  ;;  %p2948_p11 = scmp.lt.u32.totalorder %s2944_s26, %s3411_s0 }
  0x39   :  { %p2950_p12 = pnand %p2948_p11, %p2945_p10 }
  0x3b   :  { %2953 = shalt.err (!%p2950_p12)
}
  0x3c   :  { %s2954_s25 = scalar_lea.vmem %s3181_s22, 1024  ;;  %p2959_p0 = scmp.lt.s32.totalorder %s3181_s22, %s3181_s22 }
  0x3d   :  { %p2955_p13 = scmp.ne.s32.totalorder %s3181_s22, %s2954_s25  ;;  %p2960_p1 = scmp.lt.s32.totalorder %s2954_s25, %s2954_s25 }
  0x3f   :  { %p2961_p2 = por %p2960_p1, %p2959_p0 }
  0x41   :  { %p2962_p3 = pnand %p2961_p2, %p2955_p13 }
  0x43   :  { %2965 = shalt.err (!%p2962_p3)
}
  0x44   :  { %34 = dma.hbm_to_vmem [thread:$0]  %s3411_s0, 1024, %s3181_s22, [#allocation3], %s3066_s20, %s3066_s20, %s3067_s21  }
  0x45   :  { %s3070_s27 = smov [#allocation7]   ;;  %s3071_s30 = smov [#allocation10]  }
  0x46   :  { %s54_s29 = sshll.u32 %s3070_s27, 4  ;;  %s82_s14 = sshll.u32 %s3071_s30, 4  ;;  %s55_s29 = int_to_ptr.vmem [resolvable:$true] %s54_s29  ;;  %s3218_s14 = int_to_ptr.vmem [resolvable:$true] %s82_s14 }
  0x47   :  { %s2966_s15 = scalar_lea.hbm %s3414_s3, 1024 }
  0x48   :  { %p2967_p4 = scmp.ne.s32.totalorder %s3414_s3, %s2966_s15  ;;  %p2970_p5 = scmp.lt.u32.totalorder %s2966_s15, %s3414_s3 }
  0x4a   :  { %p2972_p6 = pnand %p2970_p5, %p2967_p4 }
  0x4c   :  { %2975 = shalt.err (!%p2972_p6)
}
  0x4d   :  { %s2976_s0 = scalar_lea.vmem %s55_s29, 1024  ;;  %p2981_p8 = scmp.lt.s32.totalorder %s55_s29, %s55_s29 }
  0x4e   :  { %p2977_p7 = scmp.ne.s32.totalorder %s55_s29, %s2976_s0  ;;  %p2982_p9 = scmp.lt.s32.totalorder %s2976_s0, %s2976_s0 }
  0x50   :  { %p2983_p10 = por %p2982_p9, %p2981_p8 }
  0x52   :  { %p2984_p11 = pnand %p2983_p10, %p2977_p7 }
  0x54   :  { %2987 = shalt.err (!%p2984_p11)
}
  0x55   :  { %60 = dma.hbm_to_vmem [thread:$0]  %s3414_s3, 1024, %s55_s29, [#allocation6], %s3066_s20, %s3066_s20, %s3067_s21  }
  0x56   :  { %s2988_s25 = scalar_lea.hbm %s3418_s7, 1024 }
  0x57   :  { %p2989_p12 = scmp.ne.s32.totalorder %s3418_s7, %s2988_s25  ;;  %p2992_p13 = scmp.lt.u32.totalorder %s2988_s25, %s3418_s7 }
  0x59   :  { %p2994_p0 = pnand %p2992_p13, %p2989_p12 }
  0x5b   :  { %2997 = shalt.err (!%p2994_p0)
}
  0x5c   :  { %s2998_s5 = scalar_lea.vmem %s3218_s14, 1024  ;;  %p3003_p2 = scmp.lt.s32.totalorder %s3218_s14, %s3218_s14 }
  0x5d   :  { %p2999_p1 = scmp.ne.s32.totalorder %s3218_s14, %s2998_s5  ;;  %p3004_p3 = scmp.lt.s32.totalorder %s2998_s5, %s2998_s5 }
  0x5f   :  { %p3005_p4 = por %p3004_p3, %p3003_p2 }
  0x61   :  { %p3006_p5 = pnand %p3005_p4, %p2999_p1 }
  0x63   :  { %3009 = shalt.err (!%p3006_p5)
}
  0x64   :  { %88 = dma.hbm_to_vmem [thread:$0]  %s3418_s7, 1024, %s3218_s14, [#allocation9], %s3066_s20, %s3066_s20, %s3067_s21  }
  0x65   :  { %s3072_s28 = smov [#allocation13]   ;;  %s3010_s26 = scalar_lea.hbm %s3422_s11, 1024 }
  0x66   :  { %s110_s15 = sshll.u32 %s3072_s28, 4  ;;  %p3011_p6 = scmp.ne.s32.totalorder %s3422_s11, %s3010_s26  ;;  %s111_s15 = int_to_ptr.vmem [resolvable:$true] %s110_s15 }
  0x67   :  { %p3014_p7 = scmp.lt.u32.totalorder %s3010_s26, %s3422_s11 }
  0x69   :  { %p3016_p8 = pnand %p3014_p7, %p3011_p6 }
  0x6b   :  { %3019 = shalt.err (!%p3016_p8)
}
  0x6c   :  { %s3020_s23 = scalar_lea.vmem %s111_s15, 1024  ;;  %p3025_p10 = scmp.lt.s32.totalorder %s111_s15, %s111_s15 }
  0x6d   :  { %p3021_p9 = scmp.ne.s32.totalorder %s111_s15, %s3020_s23  ;;  %p3026_p11 = scmp.lt.s32.totalorder %s3020_s23, %s3020_s23 }
  0x6f   :  { %p3027_p12 = por %p3026_p11, %p3025_p10 }
  0x71   :  { %p3028_p13 = pnand %p3027_p12, %p3021_p9 }
  0x73   :  { %3031 = shalt.err (!%p3028_p13)
}
  0x74   :  { %116 = dma.hbm_to_vmem [thread:$0]  %s3422_s11, 1024, %s111_s15, [#allocation12], %s3066_s20, %s3066_s20, %s3067_s21  }
  0x75   :  { %3054 = dma.done.wait [#allocation3], 1024  }
  0x76   :  { %3055 = vsyncadd [#allocation3], 4294966272 }
  0x77   :  { %3056 = dma.done.wait [#allocation6], 2048  }
  0x78   :  { %3057 = vsyncadd [#allocation6], 4294965248 }
  0x79   :  { %3058 = dma.done.wait [#allocation9], 2048  }
  0x7a   :  { %3059 = vsyncadd [#allocation9], 4294965248 }
  0x7b   :  { %3060 = dma.done.wait [#allocation12], 2048  }
  0x7c   :  { %3061 = vsyncadd [#allocation12], 4294965248  ;;  %v2774_v0 = vld [vmem:[#allocation5] sm:$0xff]   ;;  %v2775_v1 = vld [vmem:[#allocation5 + $0x8] sm:$0xff]  }
  0x7d   :  { %2476 = vmatprep.subr.bf16.mxu0 %v2774_v0  ;;  %v2776_v2 = vld [vmem:[#allocation5 + $0x10] sm:$0xff]   ;;  %v2777_v3 = vld [vmem:[#allocation5 + $0x18] sm:$0xff]   ;;  %v2782_v4 = vld [vmem:[#allocation2] sm:$0xff]  }
  0x7e   :  { %2477 = vmatpush3.bf16.msra.mxu0 %v2774_v0  ;;  %2492 = vmatprep.mubr.bf16.mxu0 %v2782_v4  ;;  %v2778_v5 = vld [vmem:[#allocation5 + $0x20] sm:$0xff]   ;;  %v2787_v7 = vld [vmem:[#allocation7 + $0x8] sm:$0xff]   ;;  %v2788_v9 = vld [vmem:[#allocation7 + $0x10] sm:$0xff]  }
  0x7f   :  { %2478 = vmatprep.subr.bf16.mxu0 %v2775_v1  ;;  %v2786_v6 = vld [vmem:[#allocation7] sm:$0xff]   ;;  %v2779_v8 = vld [vmem:[#allocation5 + $0x28] sm:$0xff]   ;;  %v2780_v10 = vld [vmem:[#allocation5 + $0x30] sm:$0xff]  }
  0x80   :  { %2500 = vmatprep.subr.bf16.mxu1 %v2786_v6  ;;  %v2789_v11 = vld [vmem:[#allocation7 + $0x18] sm:$0xff]   ;;  %v2790_v13 = vld [vmem:[#allocation7 + $0x20] sm:$0xff]   ;;  %v2783_v14 = vld [vmem:[#allocation2 + $0x8] sm:$0xff]  }
  0x81   :  { %2501 = vmatpush3.bf16.msra.mxu1 %v2786_v6  ;;  %v2781_v12 = vld [vmem:[#allocation5 + $0x38] sm:$0xff]   ;;  %v2784_v15 = vld [vmem:[#allocation2 + $0x10] sm:$0xff]   ;;  %v2791_v17 = vld [vmem:[#allocation7 + $0x28] sm:$0xff]  }
  0x82   :  { %2479 = vmatpush3.bf16.msra.mxu0 %v2775_v1  ;;  %2502 = vmatprep.subr.bf16.mxu1 %v2787_v7  ;;  %v2785_v16 = vld [vmem:[#allocation2 + $0x18] sm:$0xff]   ;;  %v2792_v18 = vld [vmem:[#allocation7 + $0x30] sm:$0xff]   ;;  %v2794_v20 = vld [vmem:[#allocation8] sm:$0xff]  }
  0x83   :  { %2480 = vmatprep.subr.bf16.mxu0 %v2776_v2  ;;  %v2793_v19 = vld [vmem:[#allocation7 + $0x38] sm:$0xff]   ;;  %v2795_v21 = vld [vmem:[#allocation8 + $0x8] sm:$0xff]   ;;  %v2796_v22 = vld [vmem:[#allocation8 + $0x10] sm:$0xff]  }
  0x84   :  { %v2797_v23 = vld [vmem:[#allocation8 + $0x18] sm:$0xff]   ;;  %v2798_v24 = vld [vmem:[#allocation8 + $0x20] sm:$0xff]   ;;  %v2799_v62 = vld [vmem:[#allocation8 + $0x28] sm:$0xff]  }
  0x85   :  { %2503 = vmatpush3.bf16.msra.mxu1 %v2787_v7  ;;  %v3273_v25 = vld [vmem:[%s3413_s2] ss:$0 sm:$0xff]  ;;  %v2800_v63 = vld [vmem:[#allocation8 + $0x30] sm:$0xff]   ;;  %v2801_v0 = vld [vmem:[#allocation8 + $0x38] sm:$0xff]  }
  0x86   :  { %2481 = vmatpush3.bf16.msra.mxu0 %v2776_v2  ;;  %2504 = vmatprep.subr.bf16.mxu1 %v2788_v9  ;;  %v2802_v1 = vld [vmem:[#allocation10] sm:$0xff]   ;;  %v2803_v2 = vld [vmem:[#allocation10 + $0x8] sm:$0xff]   ;;  %v2805_v4 = vld [vmem:[#allocation10 + $0x18] sm:$0xff]  }
  0x87   :  { %2482 = vmatprep.subr.bf16.mxu0 %v2777_v3  ;;  %v3286_v6 = vld [vmem:[%s3415_s4] ss:$0 sm:$0xff] }
  0x89   :  { %2505 = vmatpush3.bf16.msra.mxu1 %v2788_v9 }
  0x8a   :  { %2483 = vmatpush3.bf16.msra.mxu0 %v2777_v3  ;;  %2506 = vmatprep.subr.bf16.mxu1 %v2789_v11  ;;  %v2804_v3 = vld [vmem:[#allocation10 + $0x10] sm:$0xff]  }
  0x8b   :  { %2484 = vmatprep.subr.bf16.mxu0 %v2778_v5 }
  0x8d   :  { %2507 = vmatpush3.bf16.msra.mxu1 %v2789_v11 }
  0x8e   :  { %2485 = vmatpush3.bf16.msra.mxu0 %v2778_v5  ;;  %2508 = vmatprep.subr.bf16.mxu1 %v2790_v13  ;;  %v2806_v5 = vld [vmem:[#allocation10 + $0x20] sm:$0xff]  }
  0x8f   :  { %2486 = vmatprep.subr.bf16.mxu0 %v2779_v8 }
  0x91   :  { %2509 = vmatpush3.bf16.msra.mxu1 %v2790_v13 }
  0x92   :  { %2487 = vmatpush3.bf16.msra.mxu0 %v2779_v8  ;;  %2510 = vmatprep.subr.bf16.mxu1 %v2791_v17 }
  0x93   :  { %2488 = vmatprep.subr.bf16.mxu0 %v2780_v10 }
  0x95   :  { %2511 = vmatpush3.bf16.msra.mxu1 %v2791_v17 }
  0x96   :  { %2489 = vmatpush3.bf16.msra.mxu0 %v2780_v10  ;;  %2512 = vmatprep.subr.bf16.mxu1 %v2792_v18 }
  0x97   :  { %2490 = vmatprep.subr.bf16.mxu0 %v2781_v12 }
  0x99   :  { %2513 = vmatpush3.bf16.msra.mxu1 %v2792_v18 }
  0x9a   :  { %2491 = vmatpush3.bf16.msra.mxu0 %v2781_v12  ;;  %2514 = vmatprep.subr.bf16.mxu1 %v2793_v19 }
  0x9b   :  { %2524 = vmatprep.subr.bf16.mxu0 %v2794_v20 }
  0x9d   :  { %2493 = vmatmul.mubr.bf16.vlgmr.msra.gmra.mrb[0].mxu0 %v2783_v14  ;;  %2515 = vmatpush3.bf16.msra.mxu1 %v2793_v19 }
  0x9e   :  { %2496 = vmatprep.mubr.bf16.mxu0 %v2784_v15  ;;  %2525 = vmatpush3.bf16.msra.mxu0 %v2794_v20 }
  0x9f   :  { %2526 = vmatprep.subr.bf16.mxu0 %v2795_v21  ;;  %2548 = vmatprep.subr.bf16.mxu1 %v2802_v1 }
  0xa2   :  { %2527 = vmatpush3.bf16.msra.mxu0 %v2795_v21 }
  0xa3   :  { %2528 = vmatprep.subr.bf16.mxu0 %v2796_v22 }
  0xa5   :  { %2497 = vmatmul.mubr.bf16.gmra.mrb[4].mxu0 %v2785_v16 }
  0xa6   :  { %2529 = vmatpush3.bf16.msra.mxu0 %v2796_v22 }
  0xa7   :  { %2530 = vmatprep.subr.bf16.mxu0 %v2797_v23 }
  0xaa   :  { %2531 = vmatpush3.bf16.msra.mxu0 %v2797_v23 }
  0xab   :  { %2532 = vmatprep.subr.bf16.mxu0 %v2798_v24 }
  0xae   :  { %2533 = vmatpush3.bf16.msra.mxu0 %v2798_v24 }
  0xaf   :  { %2534 = vmatprep.subr.bf16.mxu0 %v2799_v62 }
  0xb2   :  { %2535 = vmatpush3.bf16.msra.mxu0 %v2799_v62 }
  0xb3   :  { %2536 = vmatprep.subr.bf16.mxu0 %v2800_v63 }
  0xb6   :  { %2537 = vmatpush3.bf16.msra.mxu0 %v2800_v63 }
  0xb7   :  { %2538 = vmatprep.subr.bf16.mxu0 %v2801_v0 }
  0xba   :  { %2539 = vmatpush3.bf16.msra.mxu0 %v2801_v0 }
 0x170   :  { %v2494_v26 = vpop.f32.mrb[0].mxu0 }
 0x171   :  { %v287_v27 = vadd.f32 %v2494_v26, %v3273_v25  ;;  %v278_v28 = vpop.f32.mrb[1].mxu0 }
 0x172   :  { %v279_v29 = vadd.f32 %v3273_v25, %v278_v28  ;;  %v2495_v30 = vpop.f32.mrb[2].mxu0 }
 0x173   :  { %v311_v31 = vmul.f32 0.01, %v287_v27  ;;  %v290_v32 = vadd.f32 %v2495_v30, %v3273_v25  ;;  %v281_v33 = vpop.f32.mrb[3].mxu0 }
 0x174   :  { %v309_v34 = vmul.f32 0.01, %v279_v29  ;;  %v282_v35 = vadd.f32 %v3273_v25, %v281_v33 }
 0x175   :  { %v312_v36 = vmul.f32 0.01, %v290_v32  ;;  %v319_v38 = vmax.f32 %v287_v27, %v311_v31 }
 0x176   :  { %v310_v37 = vmul.f32 0.01, %v282_v35  ;;  %v317_v41 = vmax.f32 %v279_v29, %v309_v34 }
 0x177   :  { %v320_v39 = vmax.f32 %v290_v32, %v312_v36 }
 0x178   :  { %v2498_v40 = vpop.f32.mrb[4].mxu0  ;;  %v318_v42 = vmax.f32 %v282_v35, %v310_v37 }
 0x179   :  { %v303_v43 = vadd.f32 %v2498_v40, %v3273_v25  ;;  %v294_v44 = vpop.f32.mrb[5].mxu0  ;;  %v326_v45 = vpack.c.bf16 %v320_v39, %v319_v38 }
 0x17a   :  { %v295_v46 = vadd.f32 %v3273_v25, %v294_v44  ;;  %v2499_v47 = vpop.f32.mrb[6].mxu0  ;;  %v325_v48 = vpack.c.bf16 %v318_v42, %v317_v41  ;;  %v2807_v44 = vld [vmem:[#allocation10 + $0x28] sm:$0xff]  }
 0x17b   :  { %v315_v49 = vmul.f32 0.01, %v303_v43  ;;  %v306_v50 = vadd.f32 %v2499_v47, %v3273_v25  ;;  %v297_v51 = vpop.f32.mrb[7].mxu0  ;;  %v2810_v47 = vld [vmem:[#allocation11] sm:$0xff]  }
 0x17c   :  { %v313_v52 = vmul.f32 0.01, %v295_v46  ;;  %v298_v53 = vadd.f32 %v3273_v25, %v297_v51  ;;  %2516 = vmatprep.mubr.bf16.mxu1 %v325_v48  ;;  %v2811_v48 = vld [vmem:[#allocation11 + $0x8] sm:$0xff]   ;;  %2572 = vmatprep.subr.bf16.mxu0 %v2810_v47  ;;  %v2814_v51 = vld [vmem:[#allocation11 + $0x20] sm:$0xff]  }
 0x17d   :  { %v323_v54 = vmax.f32 %v303_v43, %v315_v49  ;;  %v316_v55 = vmul.f32 0.01, %v306_v50  ;;  %2517 = vmatmul.mubr.bf16.vlgmr.msra.gmra.mrb[0].mxu1 %v326_v45  ;;  %v2808_v45 = vld [vmem:[#allocation10 + $0x30] sm:$0xff]  }
 0x17e   :  { %v321_v56 = vmax.f32 %v295_v46, %v313_v52  ;;  %v314_v57 = vmul.f32 0.01, %v298_v53  ;;  %2549 = vmatpush3.bf16.msra.mxu1 %v2802_v1  ;;  %v2809_v46 = vld [vmem:[#allocation10 + $0x38] sm:$0xff]   ;;  %v2812_v49 = vld [vmem:[#allocation11 + $0x10] sm:$0xff]   ;;  %v3299_v52 = vld [vmem:[%s3417_s6] ss:$0 sm:$0xff] }
 0x17f   :  { %v324_v58 = vmax.f32 %v306_v50, %v316_v55  ;;  %2550 = vmatprep.subr.bf16.mxu1 %v2803_v2  ;;  %v2813_v50 = vld [vmem:[#allocation11 + $0x18] sm:$0xff]  }
 0x180   :  { %v322_v59 = vmax.f32 %v298_v53, %v314_v57 }
 0x181   :  { %v328_v60 = vpack.c.bf16 %v324_v58, %v323_v54 }
 0x182   :  { %v327_v61 = vpack.c.bf16 %v322_v59, %v321_v56  ;;  %2551 = vmatpush3.bf16.msra.mxu1 %v2803_v2 }
 0x183   :  { %2552 = vmatprep.subr.bf16.mxu1 %v2804_v3 }
 0x184   :  { %2520 = vmatprep.mubr.bf16.mxu1 %v327_v61 }
 0x185   :  { %2521 = vmatmul.mubr.bf16.gmra.mrb[4].mxu1 %v328_v60 }
 0x186   :  { %2553 = vmatpush3.bf16.msra.mxu1 %v2804_v3 }
 0x187   :  { %2554 = vmatprep.subr.bf16.mxu1 %v2805_v4 }
 0x18a   :  { %2555 = vmatpush3.bf16.msra.mxu1 %v2805_v4 }
 0x18b   :  { %2556 = vmatprep.subr.bf16.mxu1 %v2806_v5 }
 0x18e   :  { %2557 = vmatpush3.bf16.msra.mxu1 %v2806_v5 }
 0x18f   :  { %2558 = vmatprep.subr.bf16.mxu1 %v2807_v44 }
 0x192   :  { %2559 = vmatpush3.bf16.msra.mxu1 %v2807_v44 }
 0x193   :  { %2560 = vmatprep.subr.bf16.mxu1 %v2808_v45 }
 0x196   :  { %2561 = vmatpush3.bf16.msra.mxu1 %v2808_v45 }
 0x197   :  { %2562 = vmatprep.subr.bf16.mxu1 %v2809_v46 }
 0x19a   :  { %2563 = vmatpush3.bf16.msra.mxu1 %v2809_v46 }
 0x250   :  { %v2518_v7 = vpop.f32.mrb[0].mxu1 }
 0x251   :  { %v443_v8 = vadd.f32 %v2518_v7, %v3286_v6  ;;  %v434_v9 = vpop.f32.mrb[1].mxu1 }
 0x252   :  { %v435_v10 = vadd.f32 %v3286_v6, %v434_v9  ;;  %v2519_v11 = vpop.f32.mrb[2].mxu1 }
 0x253   :  { %v467_v12 = vmul.f32 0.01, %v443_v8  ;;  %v446_v13 = vadd.f32 %v2519_v11, %v3286_v6  ;;  %v437_v14 = vpop.f32.mrb[3].mxu1 }
 0x254   :  { %v465_v15 = vmul.f32 0.01, %v435_v10  ;;  %v438_v16 = vadd.f32 %v3286_v6, %v437_v14 }
 0x255   :  { %v468_v17 = vmul.f32 0.01, %v446_v13  ;;  %v475_v19 = vmax.f32 %v443_v8, %v467_v12 }
 0x256   :  { %v466_v18 = vmul.f32 0.01, %v438_v16  ;;  %v473_v21 = vmax.f32 %v435_v10, %v465_v15 }
 0x257   :  { %v476_v20 = vmax.f32 %v446_v13, %v468_v17 }
 0x258   :  { %v474_v22 = vmax.f32 %v438_v16, %v466_v18  ;;  %v2522_v23 = vpop.f32.mrb[4].mxu1 }
 0x259   :  { %v482_v24 = vpack.c.bf16 %v476_v20, %v475_v19  ;;  %v459_v26 = vadd.f32 %v2522_v23, %v3286_v6  ;;  %v450_v27 = vpop.f32.mrb[5].mxu1 }
 0x25a   :  { %v451_v28 = vadd.f32 %v3286_v6, %v450_v27  ;;  %v2523_v29 = vpop.f32.mrb[6].mxu1  ;;  %v481_v30 = vpack.c.bf16 %v474_v22, %v473_v21  ;;  %v2815_v27 = vld [vmem:[#allocation11 + $0x28] sm:$0xff]  }
 0x25b   :  { %v471_v31 = vmul.f32 0.01, %v459_v26  ;;  %v462_v32 = vadd.f32 %v2523_v29, %v3286_v6  ;;  %v453_v33 = vpop.f32.mrb[7].mxu1  ;;  %v2817_v29 = vld [vmem:[#allocation11 + $0x38] sm:$0xff]  }
 0x25c   :  { %v469_v34 = vmul.f32 0.01, %v451_v28  ;;  %v454_v35 = vadd.f32 %v3286_v6, %v453_v33  ;;  %2540 = vmatprep.mubr.bf16.mxu0 %v481_v30  ;;  %v2818_v30 = vld [vmem:[#allocation5] sm:$0xff]   ;;  %v2832_v33 = vld [vmem:[#allocation13 + $0x10] sm:$0xff]  }
 0x25d   :  { %v479_v36 = vmax.f32 %v459_v26, %v471_v31  ;;  %v472_v37 = vmul.f32 0.01, %v462_v32  ;;  %2541 = vmatmul.mubr.bf16.vlgmr.msra.gmra.mrb[8].mxu0 %v482_v24  ;;  %v2830_v31 = vld [vmem:[#allocation13] sm:$0xff]  }
 0x25e   :  { %v477_v38 = vmax.f32 %v451_v28, %v469_v34  ;;  %v470_v39 = vmul.f32 0.01, %v454_v35  ;;  %2573 = vmatpush3.bf16.msra.mxu0 %v2810_v47  ;;  %v2816_v28 = vld [vmem:[#allocation11 + $0x30] sm:$0xff]   ;;  %2596 = vmatprep.subr.bf16.mxu1 %v2830_v31  ;;  %v2833_v34 = vld [vmem:[#allocation13 + $0x18] sm:$0xff]  }
 0x25f   :  { %v480_v40 = vmax.f32 %v462_v32, %v472_v37  ;;  %2574 = vmatprep.subr.bf16.mxu0 %v2811_v48  ;;  %v2831_v32 = vld [vmem:[#allocation13 + $0x8] sm:$0xff]  }
 0x260   :  { %v478_v41 = vmax.f32 %v454_v35, %v470_v39  ;;  %v2834_v35 = vld [vmem:[#allocation13 + $0x20] sm:$0xff]  }
 0x261   :  { %v484_v42 = vpack.c.bf16 %v480_v40, %v479_v36  ;;  %v3312_v36 = vld [vmem:[%s3419_s8] ss:$0 sm:$0xff] }
 0x262   :  { %v483_v43 = vpack.c.bf16 %v478_v41, %v477_v38  ;;  %2575 = vmatpush3.bf16.msra.mxu0 %v2811_v48 }
 0x263   :  { %2576 = vmatprep.subr.bf16.mxu0 %v2812_v49 }
 0x264   :  { %2544 = vmatprep.mubr.bf16.mxu0 %v483_v43 }
 0x265   :  { %2545 = vmatmul.mubr.bf16.gmra.mrb[12].mxu0 %v484_v42 }
 0x266   :  { %2577 = vmatpush3.bf16.msra.mxu0 %v2812_v49 }
 0x267   :  { %2578 = vmatprep.subr.bf16.mxu0 %v2813_v50 }
 0x26a   :  { %2579 = vmatpush3.bf16.msra.mxu0 %v2813_v50 }
 0x26b   :  { %2580 = vmatprep.subr.bf16.mxu0 %v2814_v51 }
 0x26e   :  { %2581 = vmatpush3.bf16.msra.mxu0 %v2814_v51 }
 0x26f   :  { %2582 = vmatprep.subr.bf16.mxu0 %v2815_v27 }
 0x272   :  { %2583 = vmatpush3.bf16.msra.mxu0 %v2815_v27  ;;  %v3325_v27 = vld [vmem:[%s3421_s10] ss:$0 sm:$0xff] }
 0x273   :  { %2584 = vmatprep.subr.bf16.mxu0 %v2816_v28 }
 0x276   :  { %2585 = vmatpush3.bf16.msra.mxu0 %v2816_v28 }
 0x277   :  { %2586 = vmatprep.subr.bf16.mxu0 %v2817_v29 }
 0x27a   :  { %2587 = vmatpush3.bf16.msra.mxu0 %v2817_v29 }
 0x27b   :  { %2620 = vmatprep.subr.bf16.mxu0 %v2818_v30 }
 0x330   :  { %v2542_v53 = vpop.f32.mrb[8].mxu0 }
 0x331   :  { %v599_v54 = vadd.f32 %v2542_v53, %v3299_v52  ;;  %v590_v55 = vpop.f32.mrb[9].mxu0 }
 0x332   :  { %v591_v56 = vadd.f32 %v3299_v52, %v590_v55  ;;  %v2543_v57 = vpop.f32.mrb[10].mxu0 }
 0x333   :  { %v623_v58 = vmul.f32 0.01, %v599_v54  ;;  %v602_v59 = vadd.f32 %v2543_v57, %v3299_v52  ;;  %v593_v60 = vpop.f32.mrb[11].mxu0 }
 0x334   :  { %v621_v61 = vmul.f32 0.01, %v591_v56  ;;  %v594_v62 = vadd.f32 %v3299_v52, %v593_v60 }
 0x335   :  { %v624_v63 = vmul.f32 0.01, %v602_v59  ;;  %v631_v1 = vmax.f32 %v599_v54, %v623_v58 }
 0x336   :  { %v622_v0 = vmul.f32 0.01, %v594_v62  ;;  %v629_v3 = vmax.f32 %v591_v56, %v621_v61 }
 0x337   :  { %v632_v2 = vmax.f32 %v602_v59, %v624_v63 }
 0x338   :  { %v630_v4 = vmax.f32 %v594_v62, %v622_v0  ;;  %v2546_v5 = vpop.f32.mrb[12].mxu0  ;;  %v2819_v0 = vld [vmem:[#allocation5 + $0x8] sm:$0xff]  }
 0x339   :  { %v638_v7 = vpack.c.bf16 %v632_v2, %v631_v1  ;;  %v615_v8 = vadd.f32 %v2546_v5, %v3299_v52  ;;  %v606_v9 = vpop.f32.mrb[13].mxu0 }
 0x33a   :  { %v607_v10 = vadd.f32 %v3299_v52, %v606_v9  ;;  %v2547_v11 = vpop.f32.mrb[14].mxu0  ;;  %v637_v12 = vpack.c.bf16 %v630_v4, %v629_v3 }
 0x33b   :  { %v627_v13 = vmul.f32 0.01, %v615_v8  ;;  %v618_v14 = vadd.f32 %v2547_v11, %v3299_v52  ;;  %v609_v15 = vpop.f32.mrb[15].mxu0 }
 0x33c   :  { %v625_v16 = vmul.f32 0.01, %v607_v10  ;;  %v610_v17 = vadd.f32 %v3299_v52, %v609_v15  ;;  %2564 = vmatprep.mubr.bf16.mxu1 %v637_v12  ;;  %v2822_v15 = vld [vmem:[#allocation5 + $0x20] sm:$0xff]  }
 0x33d   :  { %v635_v18 = vmax.f32 %v615_v8, %v627_v13  ;;  %v628_v19 = vmul.f32 0.01, %v618_v14  ;;  %2565 = vmatmul.mubr.bf16.vlgmr.msra.gmra.mrb[8].mxu1 %v638_v7  ;;  %v2820_v8 = vld [vmem:[#allocation5 + $0x10] sm:$0xff]   ;;  %v2826_v13 = vld [vmem:[#allocation2 + $0x20] sm:$0xff]  }
 0x33e   :  { %v626_v20 = vmul.f32 0.01, %v610_v17  ;;  %v633_v22 = vmax.f32 %v607_v10, %v625_v16  ;;  %2597 = vmatpush3.bf16.msra.mxu1 %v2830_v31  ;;  %v2823_v16 = vld [vmem:[#allocation5 + $0x28] sm:$0xff]  }
 0x33f   :  { %v636_v21 = vmax.f32 %v618_v14, %v628_v19  ;;  %2598 = vmatprep.subr.bf16.mxu1 %v2831_v32  ;;  %v2821_v14 = vld [vmem:[#allocation5 + $0x18] sm:$0xff]   ;;  %v2827_v19 = vld [vmem:[#allocation2 + $0x28] sm:$0xff]  }
 0x340   :  { %v634_v23 = vmax.f32 %v610_v17, %v626_v20  ;;  %v2824_v17 = vld [vmem:[#allocation5 + $0x30] sm:$0xff]  }
 0x341   :  { %v640_v24 = vpack.c.bf16 %v636_v21, %v635_v18  ;;  %v2825_v18 = vld [vmem:[#allocation5 + $0x38] sm:$0xff]   ;;  %v2828_v20 = vld [vmem:[#allocation2 + $0x30] sm:$0xff]  }
 0x342   :  { %v639_v26 = vpack.c.bf16 %v634_v23, %v633_v22  ;;  %2599 = vmatpush3.bf16.msra.mxu1 %v2831_v32  ;;  %v2829_v21 = vld [vmem:[#allocation2 + $0x38] sm:$0xff]   ;;  %v2835_v22 = vld [vmem:[#allocation13 + $0x28] sm:$0xff]   ;;  %v2836_v23 = vld [vmem:[#allocation13 + $0x30] sm:$0xff]  }
 0x343   :  { %2600 = vmatprep.subr.bf16.mxu1 %v2832_v33 }
 0x344   :  { %2568 = vmatprep.mubr.bf16.mxu1 %v639_v26  ;;  %v2838_v26 = vld [vmem:[#allocation7] sm:$0xff]  }
 0x345   :  { %2569 = vmatmul.mubr.bf16.gmra.mrb[12].mxu1 %v640_v24  ;;  %v2837_v24 = vld [vmem:[#allocation13 + $0x38] sm:$0xff]  }
 0x346   :  { %2601 = vmatpush3.bf16.msra.mxu1 %v2832_v33 }
 0x347   :  { %2602 = vmatprep.subr.bf16.mxu1 %v2833_v34 }
 0x34a   :  { %2603 = vmatpush3.bf16.msra.mxu1 %v2833_v34 }
 0x34b   :  { %2604 = vmatprep.subr.bf16.mxu1 %v2834_v35 }
 0x34e   :  { %2605 = vmatpush3.bf16.msra.mxu1 %v2834_v35 }
 0x34f   :  { %2606 = vmatprep.subr.bf16.mxu1 %v2835_v22 }
 0x352   :  { %2607 = vmatpush3.bf16.msra.mxu1 %v2835_v22 }
 0x353   :  { %2608 = vmatprep.subr.bf16.mxu1 %v2836_v23 }
 0x356   :  { %2609 = vmatpush3.bf16.msra.mxu1 %v2836_v23 }
 0x357   :  { %2610 = vmatprep.subr.bf16.mxu1 %v2837_v24 }
 0x35a   :  { %2611 = vmatpush3.bf16.msra.mxu1 %v2837_v24 }
 0x35b   :  { %2644 = vmatprep.subr.bf16.mxu1 %v2838_v26 }
 0x410   :  { %v2566_v37 = vpop.f32.mrb[8].mxu1 }
 0x411   :  { %v755_v38 = vadd.f32 %v2566_v37, %v3312_v36  ;;  %v746_v39 = vpop.f32.mrb[9].mxu1 }
 0x412   :  { %v747_v40 = vadd.f32 %v3312_v36, %v746_v39  ;;  %v2567_v41 = vpop.f32.mrb[10].mxu1 }
 0x413   :  { %v779_v42 = vmul.f32 0.01, %v755_v38  ;;  %v758_v43 = vadd.f32 %v2567_v41, %v3312_v36  ;;  %v749_v44 = vpop.f32.mrb[11].mxu1 }
 0x414   :  { %v777_v45 = vmul.f32 0.01, %v747_v40  ;;  %v750_v46 = vadd.f32 %v3312_v36, %v749_v44 }
 0x415   :  { %v780_v47 = vmul.f32 0.01, %v758_v43  ;;  %v787_v49 = vmax.f32 %v755_v38, %v779_v42 }
 0x416   :  { %v778_v48 = vmul.f32 0.01, %v750_v46  ;;  %v785_v51 = vmax.f32 %v747_v40, %v777_v45 }
 0x417   :  { %v788_v50 = vmax.f32 %v758_v43, %v780_v47 }
 0x418   :  { %v786_v53 = vmax.f32 %v750_v46, %v778_v48  ;;  %v2570_v54 = vpop.f32.mrb[12].mxu1 }
 0x419   :  { %v794_v55 = vpack.c.bf16 %v788_v50, %v787_v49  ;;  %v771_v56 = vadd.f32 %v2570_v54, %v3312_v36  ;;  %v762_v57 = vpop.f32.mrb[13].mxu1 }
 0x41a   :  { %v763_v58 = vadd.f32 %v3312_v36, %v762_v57  ;;  %v2571_v59 = vpop.f32.mrb[14].mxu1  ;;  %v793_v60 = vpack.c.bf16 %v786_v53, %v785_v51 }
 0x41b   :  { %v783_v61 = vmul.f32 0.01, %v771_v56  ;;  %v774_v62 = vadd.f32 %v2571_v59, %v3312_v36  ;;  %v765_v63 = vpop.f32.mrb[15].mxu1 }
 0x41c   :  { %v781_v1 = vmul.f32 0.01, %v763_v58  ;;  %v766_v2 = vadd.f32 %v3312_v36, %v765_v63  ;;  %2588 = vmatprep.mubr.bf16.mxu0 %v793_v60  ;;  %v2840_v63 = vld [vmem:[#allocation7 + $0x10] sm:$0xff]  }
 0x41d   :  { %v784_v3 = vmul.f32 0.01, %v774_v62  ;;  %2589 = vmatmul.mubr.bf16.vlgmr.msra.gmra.mrb[16].mxu0 %v794_v55  ;;  %v791_v5 = vmax.f32 %v771_v56, %v783_v61  ;;  %v2839_v56 = vld [vmem:[#allocation7 + $0x8] sm:$0xff]  }
 0x41e   :  { %v782_v4 = vmul.f32 0.01, %v766_v2  ;;  %2621 = vmatpush3.bf16.msra.mxu0 %v2818_v30  ;;  %v789_v9 = vmax.f32 %v763_v58, %v781_v1 }
 0x41f   :  { %v792_v7 = vmax.f32 %v774_v62, %v784_v3  ;;  %2622 = vmatprep.subr.bf16.mxu0 %v2819_v0 }
 0x420   :  { %v790_v10 = vmax.f32 %v766_v2, %v782_v4  ;;  %v2841_v4 = vld [vmem:[#allocation7 + $0x18] sm:$0xff]  }
 0x421   :  { %v796_v11 = vpack.c.bf16 %v792_v7, %v791_v5  ;;  %v2842_v5 = vld [vmem:[#allocation7 + $0x20] sm:$0xff]   ;;  %v2843_v7 = vld [vmem:[#allocation7 + $0x28] sm:$0xff]  }
 0x422   :  { %2623 = vmatpush3.bf16.msra.mxu0 %v2819_v0  ;;  %v795_v12 = vpack.c.bf16 %v790_v10, %v789_v9 }
 0x423   :  { %2624 = vmatprep.subr.bf16.mxu0 %v2820_v8 }
 0x424   :  { %2592 = vmatprep.mubr.bf16.mxu0 %v795_v12 }
 0x425   :  { %2593 = vmatmul.mubr.bf16.gmra.mrb[20].mxu0 %v796_v11 }
 0x426   :  { %2625 = vmatpush3.bf16.msra.mxu0 %v2820_v8  ;;  %2636 = vmatprep.mubr.bf16.mxu0 %v2826_v13  ;;  %v2844_v8 = vld [vmem:[#allocation7 + $0x30] sm:$0xff]  }
 0x427   :  { %2626 = vmatprep.subr.bf16.mxu0 %v2821_v14 }
 0x42a   :  { %2627 = vmatpush3.bf16.msra.mxu0 %v2821_v14 }
 0x42b   :  { %2628 = vmatprep.subr.bf16.mxu0 %v2822_v15 }
 0x42e   :  { %2629 = vmatpush3.bf16.msra.mxu0 %v2822_v15 }
 0x42f   :  { %2630 = vmatprep.subr.bf16.mxu0 %v2823_v16 }
 0x432   :  { %2631 = vmatpush3.bf16.msra.mxu0 %v2823_v16 }
 0x433   :  { %2632 = vmatprep.subr.bf16.mxu0 %v2824_v17 }
 0x436   :  { %2633 = vmatpush3.bf16.msra.mxu0 %v2824_v17  ;;  %v2845_v17 = vld [vmem:[#allocation7 + $0x38] sm:$0xff]  }
 0x437   :  { %2634 = vmatprep.subr.bf16.mxu0 %v2825_v18 }
 0x43a   :  { %2635 = vmatpush3.bf16.msra.mxu0 %v2825_v18 }
 0x43d   :  { %2637 = vmatmul.mubr.bf16.vlgmr.msra.gmra.mrb[24].mxu0 %v2827_v19 }
 0x43e   :  { %2640 = vmatprep.mubr.bf16.mxu0 %v2828_v20 }
 0x445   :  { %2641 = vmatmul.mubr.bf16.gmra.mrb[28].mxu0 %v2829_v21 }
 0x4f0   :  { %v2590_v28 = vpop.f32.mrb[16].mxu0 }
 0x4f1   :  { %v911_v29 = vadd.f32 %v2590_v28, %v3325_v27  ;;  %v902_v30 = vpop.f32.mrb[17].mxu0 }
 0x4f2   :  { %v903_v31 = vadd.f32 %v3325_v27, %v902_v30  ;;  %v2591_v32 = vpop.f32.mrb[18].mxu0 }
 0x4f3   :  { %v935_v33 = vmul.f32 0.01, %v911_v29  ;;  %v914_v34 = vadd.f32 %v2591_v32, %v3325_v27  ;;  %v905_v35 = vpop.f32.mrb[19].mxu0 }
 0x4f4   :  { %v933_v37 = vmul.f32 0.01, %v903_v31  ;;  %v906_v38 = vadd.f32 %v3325_v27, %v905_v35 }
 0x4f5   :  { %v936_v39 = vmul.f32 0.01, %v914_v34  ;;  %v943_v41 = vmax.f32 %v911_v29, %v935_v33 }
 0x4f6   :  { %v934_v40 = vmul.f32 0.01, %v906_v38  ;;  %v941_v43 = vmax.f32 %v903_v31, %v933_v37 }
 0x4f7   :  { %v944_v42 = vmax.f32 %v914_v34, %v936_v39 }
 0x4f8   :  { %v942_v44 = vmax.f32 %v906_v38, %v934_v40  ;;  %v2594_v45 = vpop.f32.mrb[20].mxu0 }
 0x4f9   :  { %v950_v46 = vpack.c.bf16 %v944_v42, %v943_v41  ;;  %v927_v47 = vadd.f32 %v2594_v45, %v3325_v27  ;;  %v918_v48 = vpop.f32.mrb[21].mxu0 }
 0x4fa   :  { %v919_v49 = vadd.f32 %v3325_v27, %v918_v48  ;;  %v2595_v50 = vpop.f32.mrb[22].mxu0  ;;  %v949_v51 = vpack.c.bf16 %v942_v44, %v941_v43 }
 0x4fb   :  { %v939_v53 = vmul.f32 0.01, %v927_v47  ;;  %v930_v54 = vadd.f32 %v2595_v50, %v3325_v27  ;;  %v921_v55 = vpop.f32.mrb[23].mxu0  ;;  %v2847_v50 = vld [vmem:[#allocation8 + $0x8] sm:$0xff]  }
 0x4fc   :  { %v937_v57 = vmul.f32 0.01, %v919_v49  ;;  %v922_v58 = vadd.f32 %v3325_v27, %v921_v55  ;;  %2612 = vmatprep.mubr.bf16.mxu1 %v949_v51  ;;  %v2848_v51 = vld [vmem:[#allocation8 + $0x10] sm:$0xff]  }
 0x4fd   :  { %v940_v59 = vmul.f32 0.01, %v930_v54  ;;  %2613 = vmatmul.mubr.bf16.vlgmr.msra.gmra.mrb[16].mxu1 %v950_v46  ;;  %v947_v61 = vmax.f32 %v927_v47, %v939_v53  ;;  %v2850_v53 = vld [vmem:[#allocation8 + $0x20] sm:$0xff]   ;;  %v2852_v55 = vld [vmem:[#allocation8 + $0x30] sm:$0xff]  }
 0x4fe   :  { %v938_v60 = vmul.f32 0.01, %v922_v58  ;;  %2645 = vmatpush3.bf16.msra.mxu1 %v2838_v26  ;;  %v945_v0 = vmax.f32 %v919_v49, %v937_v57  ;;  %v2846_v49 = vld [vmem:[#allocation8] sm:$0xff]  }
 0x4ff   :  { %v948_v62 = vmax.f32 %v930_v54, %v940_v59  ;;  %2646 = vmatprep.subr.bf16.mxu1 %v2839_v56  ;;  %2668 = vmatprep.subr.bf16.mxu0 %v2846_v49  ;;  %v2851_v54 = vld [vmem:[#allocation8 + $0x28] sm:$0xff]   ;;  %v2854_v57 = vld [vmem:[#allocation10] sm:$0xff]   ;;  %v2856_v59 = vld [vmem:[#allocation10 + $0x10] sm:$0xff]  }
 0x500   :  { %v946_v1 = vmax.f32 %v922_v58, %v938_v60  ;;  %2669 = vmatpush3.bf16.msra.mxu0 %v2846_v49  ;;  %v2855_v58 = vld [vmem:[#allocation10 + $0x8] sm:$0xff]   ;;  %v2857_v60 = vld [vmem:[#allocation10 + $0x18] sm:$0xff]  }
 0x501   :  { %v952_v2 = vpack.c.bf16 %v948_v62, %v947_v61  ;;  %2670 = vmatprep.subr.bf16.mxu0 %v2847_v50  ;;  %v2858_v61 = vld [vmem:[#allocation10 + $0x20] sm:$0xff]  }
 0x502   :  { %2647 = vmatpush3.bf16.msra.mxu1 %v2839_v56  ;;  %v951_v3 = vpack.c.bf16 %v946_v1, %v945_v0  ;;  %v2853_v56 = vld [vmem:[#allocation8 + $0x38] sm:$0xff]  }
 0x503   :  { %2648 = vmatprep.subr.bf16.mxu1 %v2840_v63 }
 0x504   :  { %2616 = vmatprep.mubr.bf16.mxu1 %v951_v3  ;;  %2671 = vmatpush3.bf16.msra.mxu0 %v2847_v50 }
 0x505   :  { %2617 = vmatmul.mubr.bf16.gmra.mrb[20].mxu1 %v952_v2  ;;  %2672 = vmatprep.subr.bf16.mxu0 %v2848_v51 }
 0x506   :  { %2649 = vmatpush3.bf16.msra.mxu1 %v2840_v63  ;;  %v3346_v63 = vld [vmem:[%s3423_s12] ss:$0 sm:$0xff]  ;;  %s3073_s12 = smov [#allocation14]  }
 0x507   :  { %2650 = vmatprep.subr.bf16.mxu1 %v2841_v4  ;;  %s2122_s5 = sshll.u32 %s3073_s12, 4  ;;  %s2123_s5 = int_to_ptr.vmem [resolvable:$true] %s2122_s5 }
 0x508   :  { %2673 = vmatpush3.bf16.msra.mxu0 %v2848_v51  ;;  %s3032_s3 = scalar_lea.vmem %s2123_s5, 1024  ;;  %p3037_p1 = scmp.lt.s32.totalorder %s2123_s5, %s2123_s5 }
 0x509   :  { %p3033_p0 = scmp.ne.s32.totalorder %s2123_s5, %s3032_s3  ;;  %p3038_p2 = scmp.lt.s32.totalorder %s3032_s3, %s3032_s3 }
 0x50a   :  { %2651 = vmatpush3.bf16.msra.mxu1 %v2841_v4 }
 0x50b   :  { %2652 = vmatprep.subr.bf16.mxu1 %v2842_v5  ;;  %p3039_p3 = por %p3038_p2, %p3037_p1 }
 0x50d   :  { %p3040_p4 = pnand %p3039_p3, %p3033_p0 }
 0x50e   :  { %2653 = vmatpush3.bf16.msra.mxu1 %v2842_v5 }
 0x50f   :  { %2654 = vmatprep.subr.bf16.mxu1 %v2843_v7 }
 0x510   :  { %v2638_v9 = vpop.f32.mrb[24].mxu0 }
 0x511   :  { %v1275_v10 = vadd.f32 %v2638_v9, %v3273_v25  ;;  %v1266_v11 = vpop.f32.mrb[25].mxu0 }
 0x512   :  { %v1267_v12 = vadd.f32 %v3273_v25, %v1266_v11  ;;  %v2639_v13 = vpop.f32.mrb[26].mxu0  ;;  %2655 = vmatpush3.bf16.msra.mxu1 %v2843_v7 }
 0x513   :  { %v1299_v14 = vmul.f32 0.01, %v1275_v10  ;;  %v1278_v15 = vadd.f32 %v2639_v13, %v3273_v25  ;;  %v1269_v16 = vpop.f32.mrb[27].mxu0  ;;  %2656 = vmatprep.subr.bf16.mxu1 %v2844_v8 }
 0x514   :  { %v1297_v18 = vmul.f32 0.01, %v1267_v12  ;;  %v1270_v19 = vadd.f32 %v3273_v25, %v1269_v16 }
 0x515   :  { %v1300_v20 = vmul.f32 0.01, %v1278_v15  ;;  %v1307_v22 = vmax.f32 %v1275_v10, %v1299_v14 }
 0x516   :  { %v1298_v21 = vmul.f32 0.01, %v1270_v19  ;;  %2657 = vmatpush3.bf16.msra.mxu1 %v2844_v8  ;;  %v1305_v24 = vmax.f32 %v1267_v12, %v1297_v18 }
 0x517   :  { %v1308_v23 = vmax.f32 %v1278_v15, %v1300_v20  ;;  %2658 = vmatprep.subr.bf16.mxu1 %v2845_v17 }
 0x518   :  { %v1306_v26 = vmax.f32 %v1270_v19, %v1298_v21  ;;  %v2642_v28 = vpop.f32.mrb[28].mxu0 }
 0x519   :  { %v1314_v29 = vpack.c.bf16 %v1308_v23, %v1307_v22  ;;  %v1291_v30 = vadd.f32 %v2642_v28, %v3273_v25  ;;  %v1282_v31 = vpop.f32.mrb[29].mxu0 }
 0x51a   :  { %v1283_v32 = vadd.f32 %v3273_v25, %v1282_v31  ;;  %v2643_v33 = vpop.f32.mrb[30].mxu0  ;;  %2659 = vmatpush3.bf16.msra.mxu1 %v2845_v17  ;;  %v1313_v34 = vpack.c.bf16 %v1306_v26, %v1305_v24 }
 0x51b   :  { %v1303_v35 = vmul.f32 0.01, %v1291_v30  ;;  %v1294_v37 = vadd.f32 %v2643_v33, %v3273_v25  ;;  %v1285_v38 = vpop.f32.mrb[31].mxu0  ;;  %2692 = vmatprep.subr.bf16.mxu1 %v2854_v57 }
 0x51c   :  { %v1301_v39 = vmul.f32 0.01, %v1283_v32  ;;  %v1286_v40 = vadd.f32 %v3273_v25, %v1285_v38  ;;  %2660 = vmatprep.mubr.bf16.mxu1 %v1313_v34  ;;  %v2849_v25 = vld [vmem:[#allocation8 + $0x18] sm:$0xff]  }
 0x51d   :  { %v1304_v41 = vmul.f32 0.01, %v1294_v37  ;;  %2661 = vmatmul.mubr.bf16.vlgmr.msra.gmra.mrb[24].mxu1 %v1314_v29  ;;  %v1311_v43 = vmax.f32 %v1291_v30, %v1303_v35  ;;  %2674 = vmatprep.subr.bf16.mxu0 %v2849_v25 }
 0x51e   :  { %v1302_v42 = vmul.f32 0.01, %v1286_v40  ;;  %v1309_v45 = vmax.f32 %v1283_v32, %v1301_v39  ;;  %2675 = vmatpush3.bf16.msra.mxu0 %v2849_v25  ;;  %2693 = vmatpush3.bf16.msra.mxu1 %v2854_v57 }
 0x51f   :  { %v1312_v44 = vmax.f32 %v1294_v37, %v1304_v41  ;;  %2676 = vmatprep.subr.bf16.mxu0 %v2850_v53  ;;  %2694 = vmatprep.subr.bf16.mxu1 %v2855_v58 }
 0x520   :  { %v1310_v46 = vmax.f32 %v1286_v40, %v1302_v42 }
 0x521   :  { %v1316_v47 = vpack.c.bf16 %v1312_v44, %v1311_v43 }
 0x522   :  { %v1315_v48 = vpack.c.bf16 %v1310_v46, %v1309_v45  ;;  %2677 = vmatpush3.bf16.msra.mxu0 %v2850_v53  ;;  %2695 = vmatpush3.bf16.msra.mxu1 %v2855_v58 }
 0x523   :  { %2678 = vmatprep.subr.bf16.mxu0 %v2851_v54  ;;  %2696 = vmatprep.subr.bf16.mxu1 %v2856_v59 }
 0x524   :  { %2664 = vmatprep.mubr.bf16.mxu1 %v1315_v48 }
 0x525   :  { %2665 = vmatmul.mubr.bf16.gmra.mrb[28].mxu1 %v1316_v47 }
 0x526   :  { %2679 = vmatpush3.bf16.msra.mxu0 %v2851_v54  ;;  %2697 = vmatpush3.bf16.msra.mxu1 %v2856_v59  ;;  %v2859_v59 = vld [vmem:[#allocation10 + $0x28] sm:$0xff]  }
 0x527   :  { %2680 = vmatprep.subr.bf16.mxu0 %v2852_v55  ;;  %2698 = vmatprep.subr.bf16.mxu1 %v2857_v60 }
 0x52a   :  { %2681 = vmatpush3.bf16.msra.mxu0 %v2852_v55  ;;  %2699 = vmatpush3.bf16.msra.mxu1 %v2857_v60  ;;  %v2860_v60 = vld [vmem:[#allocation10 + $0x30] sm:$0xff]  }
 0x52b   :  { %2682 = vmatprep.subr.bf16.mxu0 %v2853_v56  ;;  %2700 = vmatprep.subr.bf16.mxu1 %v2858_v61 }
 0x52e   :  { %2683 = vmatpush3.bf16.msra.mxu0 %v2853_v56  ;;  %2701 = vmatpush3.bf16.msra.mxu1 %v2858_v61  ;;  %v2861_v61 = vld [vmem:[#allocation10 + $0x38] sm:$0xff]  }
 0x52f   :  { %2702 = vmatprep.subr.bf16.mxu1 %v2859_v59 }
 0x532   :  { %2703 = vmatpush3.bf16.msra.mxu1 %v2859_v59 }
 0x533   :  { %2704 = vmatprep.subr.bf16.mxu1 %v2860_v60 }
 0x536   :  { %2705 = vmatpush3.bf16.msra.mxu1 %v2860_v60 }
 0x537   :  { %2706 = vmatprep.subr.bf16.mxu1 %v2861_v61 }
 0x53a   :  { %2707 = vmatpush3.bf16.msra.mxu1 %v2861_v61 }
 0x5d0   :  { %v2614_v62 = vpop.f32.mrb[16].mxu1 }
 0x5d1   :  { %v1058_v0 = vpop.f32.mrb[17].mxu1  ;;  %v1067_v2 = vadd.f32 %v2614_v62, %v3346_v63  ;;  %v2863_v62 = vld [vmem:[#allocation11 + $0x8] sm:$0xff]  }
 0x5d2   :  { %v2615_v1 = vpop.f32.mrb[18].mxu1  ;;  %v1059_v5 = vadd.f32 %v3346_v63, %v1058_v0  ;;  %v2864_v0 = vld [vmem:[#allocation11 + $0x10] sm:$0xff]  }
 0x5d3   :  { %v1070_v3 = vadd.f32 %v2615_v1, %v3346_v63  ;;  %v1061_v4 = vpop.f32.mrb[19].mxu1  ;;  %v2865_v1 = vld [vmem:[#allocation11 + $0x18] sm:$0xff]  }
 0x5d4   :  { %v1062_v7 = vadd.f32 %v3346_v63, %v1061_v4 }
 0x5d5   :  { %v2293_v8 = vpack.c.bf16 %v1070_v3, %v1067_v2  ;;  %v2866_v2 = vld [vmem:[#allocation11 + $0x20] sm:$0xff]  }
 0x5d6   :  { %v2288_v9 = vpack.c.bf16 %v1062_v7, %v1059_v5 }
 0x5d7   :  { %2325 = vst [vmem:[#allocation14 + $0x8] sm:$0xff] %v2293_v8  }
 0x5d8   :  { %2289 = vst [vmem:[#allocation14] sm:$0xff] %v2288_v9   ;;  %v2618_v10 = vpop.f32.mrb[20].mxu1 }
 0x5d9   :  { %v1074_v11 = vpop.f32.mrb[21].mxu1  ;;  %v1083_v13 = vadd.f32 %v2618_v10, %v3346_v63 }
 0x5da   :  { %v2619_v12 = vpop.f32.mrb[22].mxu1  ;;  %v1075_v16 = vadd.f32 %v3346_v63, %v1074_v11 }
 0x5db   :  { %v1086_v14 = vadd.f32 %v2619_v12, %v3346_v63  ;;  %v1077_v15 = vpop.f32.mrb[23].mxu1 }
 0x5dc   :  { %v1078_v17 = vadd.f32 %v3346_v63, %v1077_v15 }
 0x5dd   :  { %v2303_v18 = vpack.c.bf16 %v1086_v14, %v1083_v13 }
 0x5de   :  { %v2298_v19 = vpack.c.bf16 %v1078_v17, %v1075_v16 }
 0x5df   :  { %2327 = vst [vmem:[#allocation14 + $0x18] sm:$0xff] %v2303_v18  }
 0x5e0   :  { %2326 = vst [vmem:[#allocation14 + $0x10] sm:$0xff] %v2298_v19  }
 0x5f0   :  { %v2662_v20 = vpop.f32.mrb[24].mxu1 }
 0x5f1   :  { %v1431_v21 = vadd.f32 %v2662_v20, %v3286_v6  ;;  %v1422_v22 = vpop.f32.mrb[25].mxu1 }
 0x5f2   :  { %v1423_v23 = vadd.f32 %v3286_v6, %v1422_v22  ;;  %v2663_v24 = vpop.f32.mrb[26].mxu1 }
 0x5f3   :  { %v1455_v26 = vmul.f32 0.01, %v1431_v21  ;;  %v1434_v28 = vadd.f32 %v2663_v24, %v3286_v6  ;;  %v1425_v29 = vpop.f32.mrb[27].mxu1 }
 0x5f4   :  { %v1453_v30 = vmul.f32 0.01, %v1423_v23  ;;  %v1426_v31 = vadd.f32 %v3286_v6, %v1425_v29 }
 0x5f5   :  { %v1456_v32 = vmul.f32 0.01, %v1434_v28  ;;  %v1463_v34 = vmax.f32 %v1431_v21, %v1455_v26 }
 0x5f6   :  { %v1454_v33 = vmul.f32 0.01, %v1426_v31  ;;  %v1461_v37 = vmax.f32 %v1423_v23, %v1453_v30 }
 0x5f7   :  { %v1464_v35 = vmax.f32 %v1434_v28, %v1456_v32 }
 0x5f8   :  { %v1462_v38 = vmax.f32 %v1426_v31, %v1454_v33  ;;  %v2666_v39 = vpop.f32.mrb[28].mxu1 }
 0x5f9   :  { %v1470_v40 = vpack.c.bf16 %v1464_v35, %v1463_v34  ;;  %v1447_v41 = vadd.f32 %v2666_v39, %v3286_v6  ;;  %v1438_v42 = vpop.f32.mrb[29].mxu1 }
 0x5fa   :  { %v1439_v43 = vadd.f32 %v3286_v6, %v1438_v42  ;;  %v2667_v44 = vpop.f32.mrb[30].mxu1  ;;  %v1469_v45 = vpack.c.bf16 %v1462_v38, %v1461_v37 }
 0x5fb   :  { %v1459_v46 = vmul.f32 0.01, %v1447_v41  ;;  %v1450_v47 = vadd.f32 %v2667_v44, %v3286_v6  ;;  %v1441_v48 = vpop.f32.mrb[31].mxu1  ;;  %v2868_v44 = vld [vmem:[#allocation11 + $0x30] sm:$0xff]  }
 0x5fc   :  { %v1457_v49 = vmul.f32 0.01, %v1439_v43  ;;  %v1442_v50 = vadd.f32 %v3286_v6, %v1441_v48  ;;  %2684 = vmatprep.mubr.bf16.mxu0 %v1469_v45  ;;  %v2862_v6 = vld [vmem:[#allocation11] sm:$0xff]   ;;  %v2869_v45 = vld [vmem:[#allocation11 + $0x38] sm:$0xff]  }
 0x5fd   :  { %v1460_v51 = vmul.f32 0.01, %v1450_v47  ;;  %2685 = vmatmul.mubr.bf16.vlgmr.msra.gmra.mrb[32].mxu0 %v1470_v40  ;;  %v1467_v53 = vmax.f32 %v1447_v41, %v1459_v46  ;;  %2716 = vmatprep.subr.bf16.mxu0 %v2862_v6  ;;  %v2871_v46 = vld [vmem:[#allocation13 + $0x8] sm:$0xff]   ;;  %v2873_v48 = vld [vmem:[#allocation13 + $0x18] sm:$0xff]  }
 0x5fe   :  { %v1458_v25 = vmul.f32 0.01, %v1442_v50  ;;  %v1465_v55 = vmax.f32 %v1439_v43, %v1457_v49  ;;  %2717 = vmatpush3.bf16.msra.mxu0 %v2862_v6  ;;  %v2867_v43 = vld [vmem:[#allocation11 + $0x28] sm:$0xff]   ;;  %v2874_v49 = vld [vmem:[#allocation13 + $0x20] sm:$0xff]  }
 0x5ff   :  { %v1468_v54 = vmax.f32 %v1450_v47, %v1460_v51  ;;  %2718 = vmatprep.subr.bf16.mxu0 %v2863_v62  ;;  %v2872_v47 = vld [vmem:[#allocation13 + $0x10] sm:$0xff]  }
 0x600   :  { %v1466_v56 = vmax.f32 %v1442_v50, %v1458_v25 }
 0x601   :  { %v1472_v57 = vpack.c.bf16 %v1468_v54, %v1467_v53 }
 0x602   :  { %v1471_v58 = vpack.c.bf16 %v1466_v56, %v1465_v55  ;;  %2719 = vmatpush3.bf16.msra.mxu0 %v2863_v62 }
 0x603   :  { %2720 = vmatprep.subr.bf16.mxu0 %v2864_v0 }
 0x604   :  { %2688 = vmatprep.mubr.bf16.mxu0 %v1471_v58 }
 0x605   :  { %2689 = vmatmul.mubr.bf16.gmra.mrb[36].mxu0 %v1472_v57 }
 0x606   :  { %2721 = vmatpush3.bf16.msra.mxu0 %v2864_v0 }
 0x607   :  { %2722 = vmatprep.subr.bf16.mxu0 %v2865_v1 }
 0x60a   :  { %2723 = vmatpush3.bf16.msra.mxu0 %v2865_v1 }
 0x60b   :  { %2724 = vmatprep.subr.bf16.mxu0 %v2866_v2 }
 0x60e   :  { %2725 = vmatpush3.bf16.msra.mxu0 %v2866_v2 }
 0x60f   :  { %2726 = vmatprep.subr.bf16.mxu0 %v2867_v43 }
 0x612   :  { %2727 = vmatpush3.bf16.msra.mxu0 %v2867_v43 }
 0x613   :  { %2728 = vmatprep.subr.bf16.mxu0 %v2868_v44 }
 0x616   :  { %2729 = vmatpush3.bf16.msra.mxu0 %v2868_v44 }
 0x617   :  { %2730 = vmatprep.subr.bf16.mxu0 %v2869_v45 }
 0x61a   :  { %2731 = vmatpush3.bf16.msra.mxu0 %v2869_v45 }
 0x6d0   :  { %v2686_v3 = vpop.f32.mrb[32].mxu0 }
 0x6d1   :  { %v1587_v4 = vadd.f32 %v2686_v3, %v3299_v52  ;;  %v1578_v5 = vpop.f32.mrb[33].mxu0 }
 0x6d2   :  { %v1579_v7 = vadd.f32 %v3299_v52, %v1578_v5  ;;  %v2687_v8 = vpop.f32.mrb[34].mxu0 }
 0x6d3   :  { %v1611_v9 = vmul.f32 0.01, %v1587_v4  ;;  %v1590_v10 = vadd.f32 %v2687_v8, %v3299_v52  ;;  %v1581_v11 = vpop.f32.mrb[35].mxu0 }
 0x6d4   :  { %v1609_v12 = vmul.f32 0.01, %v1579_v7  ;;  %v1582_v13 = vadd.f32 %v3299_v52, %v1581_v11 }
 0x6d5   :  { %v1612_v14 = vmul.f32 0.01, %v1590_v10  ;;  %v1619_v16 = vmax.f32 %v1587_v4, %v1611_v9 }
 0x6d6   :  { %v1610_v15 = vmul.f32 0.01, %v1582_v13  ;;  %v1617_v18 = vmax.f32 %v1579_v7, %v1609_v12 }
 0x6d7   :  { %v1620_v17 = vmax.f32 %v1590_v10, %v1612_v14 }
 0x6d8   :  { %v1618_v19 = vmax.f32 %v1582_v13, %v1610_v15  ;;  %v2690_v20 = vpop.f32.mrb[36].mxu0 }
 0x6d9   :  { %v1626_v21 = vpack.c.bf16 %v1620_v17, %v1619_v16  ;;  %v1603_v22 = vadd.f32 %v2690_v20, %v3299_v52  ;;  %v1594_v23 = vpop.f32.mrb[37].mxu0 }
 0x6da   :  { %v1595_v24 = vadd.f32 %v3299_v52, %v1594_v23  ;;  %v2691_v26 = vpop.f32.mrb[38].mxu0  ;;  %v1625_v28 = vpack.c.bf16 %v1618_v19, %v1617_v18  ;;  %v2875_v23 = vld [vmem:[#allocation13 + $0x28] sm:$0xff]  }
 0x6db   :  { %v1615_v29 = vmul.f32 0.01, %v1603_v22  ;;  %v1606_v30 = vadd.f32 %v2691_v26, %v3299_v52  ;;  %v1597_v31 = vpop.f32.mrb[39].mxu0  ;;  %v2877_v26 = vld [vmem:[#allocation13 + $0x38] sm:$0xff]  }
 0x6dc   :  { %v1613_v32 = vmul.f32 0.01, %v1595_v24  ;;  %v1598_v33 = vadd.f32 %v3299_v52, %v1597_v31  ;;  %2708 = vmatprep.mubr.bf16.mxu1 %v1625_v28  ;;  %v2870_v52 = vld [vmem:[#allocation13] sm:$0xff]  }
 0x6dd   :  { %v1616_v34 = vmul.f32 0.01, %v1606_v30  ;;  %2709 = vmatmul.mubr.bf16.vlgmr.msra.gmra.mrb[32].mxu1 %v1626_v21  ;;  %v1623_v37 = vmax.f32 %v1603_v22, %v1615_v29  ;;  %2740 = vmatprep.subr.bf16.mxu1 %v2870_v52 }
 0x6de   :  { %v1614_v35 = vmul.f32 0.01, %v1598_v33  ;;  %v1621_v39 = vmax.f32 %v1595_v24, %v1613_v32  ;;  %2741 = vmatpush3.bf16.msra.mxu1 %v2870_v52  ;;  %v2876_v24 = vld [vmem:[#allocation13 + $0x30] sm:$0xff]  }
 0x6df   :  { %v1624_v38 = vmax.f32 %v1606_v30, %v1616_v34  ;;  %2742 = vmatprep.subr.bf16.mxu1 %v2871_v46 }
 0x6e0   :  { %v1622_v40 = vmax.f32 %v1598_v33, %v1614_v35 }
 0x6e1   :  { %v1628_v41 = vpack.c.bf16 %v1624_v38, %v1623_v37 }
 0x6e2   :  { %v1627_v42 = vpack.c.bf16 %v1622_v40, %v1621_v39  ;;  %2743 = vmatpush3.bf16.msra.mxu1 %v2871_v46 }
 0x6e3   :  { %2744 = vmatprep.subr.bf16.mxu1 %v2872_v47 }
 0x6e4   :  { %2712 = vmatprep.mubr.bf16.mxu1 %v1627_v42 }
 0x6e5   :  { %2713 = vmatmul.mubr.bf16.gmra.mrb[36].mxu1 %v1628_v41 }
 0x6e6   :  { %2745 = vmatpush3.bf16.msra.mxu1 %v2872_v47 }
 0x6e7   :  { %2746 = vmatprep.subr.bf16.mxu1 %v2873_v48 }
 0x6ea   :  { %2747 = vmatpush3.bf16.msra.mxu1 %v2873_v48 }
 0x6eb   :  { %2748 = vmatprep.subr.bf16.mxu1 %v2874_v49 }
 0x6ee   :  { %2749 = vmatpush3.bf16.msra.mxu1 %v2874_v49 }
 0x6ef   :  { %2750 = vmatprep.subr.bf16.mxu1 %v2875_v23 }
 0x6f2   :  { %2751 = vmatpush3.bf16.msra.mxu1 %v2875_v23 }
 0x6f3   :  { %2752 = vmatprep.subr.bf16.mxu1 %v2876_v24 }
 0x6f6   :  { %2753 = vmatpush3.bf16.msra.mxu1 %v2876_v24 }
 0x6f7   :  { %2754 = vmatprep.subr.bf16.mxu1 %v2877_v26 }
 0x6fa   :  { %2755 = vmatpush3.bf16.msra.mxu1 %v2877_v26 }
 0x7b0   :  { %v2710_v50 = vpop.f32.mrb[32].mxu1 }
 0x7b1   :  { %v1743_v51 = vadd.f32 %v2710_v50, %v3312_v36  ;;  %v1734_v25 = vpop.f32.mrb[33].mxu1 }
 0x7b2   :  { %v1735_v53 = vadd.f32 %v3312_v36, %v1734_v25  ;;  %v2711_v54 = vpop.f32.mrb[34].mxu1 }
 0x7b3   :  { %v1767_v55 = vmul.f32 0.01, %v1743_v51  ;;  %v1746_v56 = vadd.f32 %v2711_v54, %v3312_v36  ;;  %v1737_v57 = vpop.f32.mrb[35].mxu1 }
 0x7b4   :  { %v1765_v58 = vmul.f32 0.01, %v1735_v53  ;;  %v1738_v59 = vadd.f32 %v3312_v36, %v1737_v57 }
 0x7b5   :  { %v1768_v60 = vmul.f32 0.01, %v1746_v56  ;;  %v1775_v6 = vmax.f32 %v1743_v51, %v1767_v55 }
 0x7b6   :  { %v1766_v61 = vmul.f32 0.01, %v1738_v59  ;;  %v1773_v0 = vmax.f32 %v1735_v53, %v1765_v58 }
 0x7b7   :  { %v1776_v62 = vmax.f32 %v1746_v56, %v1768_v60 }
 0x7b8   :  { %v1774_v1 = vmax.f32 %v1738_v59, %v1766_v61  ;;  %v2714_v2 = vpop.f32.mrb[36].mxu1 }
 0x7b9   :  { %v1782_v3 = vpack.c.bf16 %v1776_v62, %v1775_v6  ;;  %v1759_v4 = vadd.f32 %v2714_v2, %v3312_v36  ;;  %v1750_v5 = vpop.f32.mrb[37].mxu1 }
 0x7ba   :  { %v1751_v7 = vadd.f32 %v3312_v36, %v1750_v5  ;;  %v2715_v8 = vpop.f32.mrb[38].mxu1  ;;  %v1781_v9 = vpack.c.bf16 %v1774_v1, %v1773_v0 }
 0x7bb   :  { %v1771_v10 = vmul.f32 0.01, %v1759_v4  ;;  %v1762_v11 = vadd.f32 %v2715_v8, %v3312_v36  ;;  %v1753_v12 = vpop.f32.mrb[39].mxu1 }
 0x7bc   :  { %v1769_v13 = vmul.f32 0.01, %v1751_v7  ;;  %v1754_v14 = vadd.f32 %v3312_v36, %v1753_v12  ;;  %2732 = vmatprep.mubr.bf16.mxu0 %v1781_v9 }
 0x7bd   :  { %v1772_v15 = vmul.f32 0.01, %v1762_v11  ;;  %2733 = vmatmul.mubr.bf16.vlgmr.msra.gmra.mrb[40].mxu0 %v1782_v3  ;;  %v1779_v17 = vmax.f32 %v1759_v4, %v1771_v10 }
 0x7be   :  { %v1770_v16 = vmul.f32 0.01, %v1754_v14  ;;  %v1777_v19 = vmax.f32 %v1751_v7, %v1769_v13 }
 0x7bf   :  { %v1780_v18 = vmax.f32 %v1762_v11, %v1772_v15 }
 0x7c0   :  { %v1778_v20 = vmax.f32 %v1754_v14, %v1770_v16 }
 0x7c1   :  { %v1784_v21 = vpack.c.bf16 %v1780_v18, %v1779_v17 }
 0x7c2   :  { %v1783_v22 = vpack.c.bf16 %v1778_v20, %v1777_v19 }
 0x7c4   :  { %2736 = vmatprep.mubr.bf16.mxu0 %v1783_v22 }
 0x7c5   :  { %2737 = vmatmul.mubr.bf16.gmra.mrb[44].mxu0 %v1784_v21 }
 0x890   :  { %v2734_v36 = vpop.f32.mrb[40].mxu0 }
 0x891   :  { %v1899_v28 = vadd.f32 %v2734_v36, %v3325_v27  ;;  %v1890_v29 = vpop.f32.mrb[41].mxu0 }
 0x892   :  { %v1891_v30 = vadd.f32 %v3325_v27, %v1890_v29  ;;  %v2735_v31 = vpop.f32.mrb[42].mxu0 }
 0x893   :  { %v1923_v32 = vmul.f32 0.01, %v1899_v28  ;;  %v1902_v33 = vadd.f32 %v2735_v31, %v3325_v27  ;;  %v1893_v34 = vpop.f32.mrb[43].mxu0 }
 0x894   :  { %v1921_v35 = vmul.f32 0.01, %v1891_v30  ;;  %v1894_v37 = vadd.f32 %v3325_v27, %v1893_v34 }
 0x895   :  { %v1924_v38 = vmul.f32 0.01, %v1902_v33  ;;  %v1931_v40 = vmax.f32 %v1899_v28, %v1923_v32 }
 0x896   :  { %v1922_v39 = vmul.f32 0.01, %v1894_v37  ;;  %v1929_v42 = vmax.f32 %v1891_v30, %v1921_v35 }
 0x897   :  { %v1932_v41 = vmax.f32 %v1902_v33, %v1924_v38 }
 0x898   :  { %v1930_v43 = vmax.f32 %v1894_v37, %v1922_v39  ;;  %v2738_v44 = vpop.f32.mrb[44].mxu0 }
 0x899   :  { %v1938_v45 = vpack.c.bf16 %v1932_v41, %v1931_v40  ;;  %v1915_v52 = vadd.f32 %v2738_v44, %v3325_v27  ;;  %v1906_v46 = vpop.f32.mrb[45].mxu0 }
 0x89a   :  { %v1907_v47 = vadd.f32 %v3325_v27, %v1906_v46  ;;  %v2739_v48 = vpop.f32.mrb[46].mxu0  ;;  %v1937_v49 = vpack.c.bf16 %v1930_v43, %v1929_v42 }
 0x89b   :  { %v1927_v50 = vmul.f32 0.01, %v1915_v52  ;;  %v1918_v51 = vadd.f32 %v2739_v48, %v3325_v27  ;;  %v1909_v25 = vpop.f32.mrb[47].mxu0 }
 0x89c   :  { %v1925_v53 = vmul.f32 0.01, %v1907_v47  ;;  %v1910_v54 = vadd.f32 %v3325_v27, %v1909_v25  ;;  %2756 = vmatprep.mubr.bf16.mxu1 %v1937_v49 }
 0x89d   :  { %v1928_v55 = vmul.f32 0.01, %v1918_v51  ;;  %2757 = vmatmul.mubr.bf16.vlgmr.msra.gmra.mrb[40].mxu1 %v1938_v45  ;;  %v1935_v57 = vmax.f32 %v1915_v52, %v1927_v50 }
 0x89e   :  { %v1926_v56 = vmul.f32 0.01, %v1910_v54  ;;  %v1933_v59 = vmax.f32 %v1907_v47, %v1925_v53 }
 0x89f   :  { %v1936_v58 = vmax.f32 %v1918_v51, %v1928_v55 }
 0x8a0   :  { %v1934_v60 = vmax.f32 %v1910_v54, %v1926_v56 }
 0x8a1   :  { %v1940_v61 = vpack.c.bf16 %v1936_v58, %v1935_v57 }
 0x8a2   :  { %v1939_v6 = vpack.c.bf16 %v1934_v60, %v1933_v59 }
 0x8a4   :  { %2760 = vmatprep.mubr.bf16.mxu1 %v1939_v6 }
 0x8a5   :  { %2761 = vmatmul.mubr.bf16.gmra.mrb[44].mxu1 %v1940_v61 }
 0x970   :  { %v2758_v62 = vpop.f32.mrb[40].mxu1 }
 0x971   :  { %v2046_v0 = vpop.f32.mrb[41].mxu1  ;;  %v2055_v2 = vadd.f32 %v2758_v62, %v3346_v63 }
 0x972   :  { %v2759_v1 = vpop.f32.mrb[42].mxu1  ;;  %v2047_v4 = vadd.f32 %v3346_v63, %v2046_v0 }
 0x973   :  { %v2058_v3 = vadd.f32 %v2759_v1, %v3346_v63  ;;  %v2049_v27 = vpop.f32.mrb[43].mxu1 }
 0x974   :  { %v2050_v5 = vadd.f32 %v3346_v63, %v2049_v27 }
 0x975   :  { %v2313_v7 = vpack.c.bf16 %v2058_v3, %v2055_v2 }
 0x976   :  { %v2308_v8 = vpack.c.bf16 %v2050_v5, %v2047_v4 }
 0x977   :  { %2329 = vst [vmem:[#allocation14 + $0x28] sm:$0xff] %v2313_v7  }
 0x978   :  { %2328 = vst [vmem:[#allocation14 + $0x20] sm:$0xff] %v2308_v8   ;;  %v2762_v9 = vpop.f32.mrb[44].mxu1 }
 0x979   :  { %v2062_v10 = vpop.f32.mrb[45].mxu1  ;;  %v2071_v12 = vadd.f32 %v2762_v9, %v3346_v63 }
 0x97a   :  { %v2763_v11 = vpop.f32.mrb[46].mxu1  ;;  %v2063_v15 = vadd.f32 %v3346_v63, %v2062_v10 }
 0x97b   :  { %v2074_v13 = vadd.f32 %v2763_v11, %v3346_v63  ;;  %v2065_v14 = vpop.f32.mrb[47].mxu1 }
 0x97c   :  { %v2066_v16 = vadd.f32 %v3346_v63, %v2065_v14 }
 0x97d   :  { %v2323_v17 = vpack.c.bf16 %v2074_v13, %v2071_v12 }
 0x97e   :  { %v2318_v18 = vpack.c.bf16 %v2066_v16, %v2063_v15 }
 0x97f   :  { %2331 = vst [vmem:[#allocation14 + $0x38] sm:$0xff] %v2323_v17  }
 0x980   :  { %2330 = vst [vmem:[#allocation14 + $0x30] sm:$0xff] %v2318_v18  }
 0x981   :  { %3043 = shalt.err (!%p3040_p4)
}
 0x982   :  { %s3044_s15 = scalar_lea.hbm %s3424_s13, 1024 }
 0x983   :  { %p3045_p5 = scmp.ne.s32.totalorder %s3424_s13, %s3044_s15  ;;  %p3048_p6 = scmp.lt.u32.totalorder %s3044_s15, %s3424_s13 }
 0x985   :  { %p3050_p7 = pnand %p3048_p6, %p3045_p5 }
 0x987   :  { %3053 = shalt.err (!%p3050_p7)
}
 0x988   :  { %2128 = dma.vmem_to_hbm [thread:$0]  %s2123_s5, 1024, %s3424_s13, [#allocation4], %s3066_s20, %s3066_s20, %s3067_s21  }
 0x989   :  { %3062 = dma.done.wait [#allocation4], 1024  }
 0x98a   :  { %3063 = vsyncadd [#allocation4], 4294966272 }
 0x98b   :  { %2132 = vsyncpa [#allocation3], 1 }
 0x98c   :  { %2133 = vsyncpa [#allocation6], 1 }
 0x98d   :  { %2134 = vsyncpa [#allocation9], 1 }
 0x98e   :  { %2135 = vsyncpa [#allocation12], 1 }
 0x98f   :  { %2136 = vsyncpa [#allocation4], 1 }

</bundles_post_ra>
